<compile_context>
chip_gen: v7x
topology: tpu7x:2x2x1
jax: 0.10.0
libtpu: 0.0.40
codegen_flags: <defaults>
</compile_context>

<pallas_src>
import functools

import jax
import jax.numpy as jnp
from jax import lax
from jax.experimental import pallas as pl
from jax.experimental.pallas import tpu as pltpu

# Explicit scoped-VMEM cap: safely below v7x's 64 MiB physical VMEM and well
# within v5e/v6e's 128 MiB.
_VMEM_LIMIT = 48 * 1024 * 1024


def _round_up(x, m):
    return ((x + m - 1) // m) * m


def _cast(x, dt):
    return x if x.dtype == dt else x.astype(dt)


def _pad2(x, rows, cols):
    pr, pc = rows - x.shape[0], cols - x.shape[1]
    if pr == 0 and pc == 0:
        return x
    return jnp.pad(x, ((0, pr), (0, pc)))


def _pad_seq(x, length):
    """Pad axis 1 of a (B, L, D) array up to `length`."""
    p = length - x.shape[1]
    if p == 0:
        return x
    return jnp.pad(x, ((0, 0), (0, p), (0, 0)))


# ----------------------------------------------------------------------------
# Fused linear: tiled bf16 matmul, f32 accumulation, bias (+GELU) (+residual)
# ----------------------------------------------------------------------------
def _linear_kernel(x_ref, w_ref, b_ref, *rest, activation, has_residual):
    if has_residual:
        res_ref, o_ref, acc_ref = rest
    else:
        o_ref, acc_ref = rest
        res_ref = None
    k = pl.program_id(2)

    @pl.when(k == 0)
    def _():
        acc_ref[...] = jnp.zeros_like(acc_ref)

    acc_ref[...] += jnp.dot(x_ref[...], w_ref[...],
                            preferred_element_type=jnp.float32)

    @pl.when(k == pl.num_programs(2) - 1)
    def _():
        y = acc_ref[...] + b_ref[...]
        if activation == "gelu":
            # tanh-approx GELU (EUP friendly); torch nn.GELU default is erf.
            y = 0.5 * y * (1.0 + jnp.tanh(0.7978845608028654 *
                                          (y + 0.044715 * y * y * y)))
        if has_residual:
            y = y + res_ref[...].astype(jnp.float32)
        o_ref[...] = y.astype(o_ref.dtype)


def pallas_linear(x, w, b, activation=None, residual=None,
                  out_dtype=jnp.bfloat16, tm=512, tn=512, tk=512):
    """act(x @ w + b) [+ residual].  x:(M,K), w:(K,N), b:(N,) -> (M,N) out_dtype.

    bf16 MXU operands with an f32 VMEM accumulator; bias/GELU/residual fused
    into the epilogue.  Default out_dtype is bf16 so downstream layers read
    half the activation bytes; only the final logits path requests f32.
    Default tiles are 512-multiples (feeds the 256x256 MXU on v6e/v7x).
    """
    M, K = x.shape
    N = w.shape[1]
    tm = min(tm, _round_up(M, 8))
    tn = min(tn, _round_up(N, 128))      # lane-dense output tiles
    tk = min(tk, _round_up(K, 128))
    Mp, Kp, Np = _round_up(M, tm), _round_up(K, tk), _round_up(N, tn)

    xp = _pad2(_cast(x, jnp.bfloat16), Mp, Kp)
    wp = _pad2(_cast(w, jnp.bfloat16), Kp, Np)
    bp = _pad2(_cast(b, jnp.float32).reshape(1, N), 1, Np)

    args = [xp, wp, bp]
    in_specs = [
        pl.BlockSpec((tm, tk), lambda i, j, k: (i, k)),
        pl.BlockSpec((tk, tn), lambda i, j, k: (k, j)),
        pl.BlockSpec((1, tn), lambda i, j, k: (0, j)),
    ]
    has_res = residual is not None
    if has_res:
        rp = _pad2(residual, Mp, Np)     # dtype kept (bf16 or f32); cast in-kernel
        args.append(rp)
        in_specs.append(pl.BlockSpec((tm, tn), lambda i, j, k: (i, j)))

    out = pl.pallas_call(
        functools.partial(_linear_kernel, activation=activation,
                          has_residual=has_res),
        out_shape=jax.ShapeDtypeStruct((Mp, Np), out_dtype),
        grid_spec=pltpu.PrefetchScalarGridSpec(
            num_scalar_prefetch=0,
            grid=(Mp // tm, Np // tn, Kp // tk),
            in_specs=in_specs,
            out_specs=pl.BlockSpec((tm, tn), lambda i, j, k: (i, j)),
            scratch_shapes=[pltpu.VMEM((tm, tn), jnp.float32)]),
        compiler_params=pltpu.CompilerParams(
            dimension_semantics=("parallel", "parallel", "arbitrary"),
            vmem_limit_bytes=_VMEM_LIMIT),
    )(*args)
    if Mp == M and Np == N:
        return out
    return out[:M, :N]


# ----------------------------------------------------------------------------
# Vector quantization: streamed codebook, running (min, argmin) — no one-hot.
# Codebook squared norms are precomputed in the wrapper (hoisted out of the
# per-(row-tile, codebook-block) inner loop).
# ----------------------------------------------------------------------------
def _vq_kernel(x_ref, cb_ref, c2_ref, idx_ref, dmin_sc, amin_sc,
               *, k_actual, tc, need_mask):
    kb = pl.program_id(1)

    @pl.when(kb == 0)
    def _():
        dmin_sc[...] = jnp.full_like(dmin_sc, jnp.inf)
        amin_sc[...] = jnp.zeros_like(amin_sc)

    x = x_ref[...]                                           # (tm, D) bf16
    cb = cb_ref[...]                                         # (tc, D) bf16
    xc = jnp.einsum("md,kd->mk", x, cb,
                    preferred_element_type=jnp.float32)       # (tm, tc)
    # ||x||^2 is constant per row -> dropped for argmin purposes.
    d = c2_ref[...] - 2.0 * xc                                # (1,tc) broadcast
    col = kb * tc + lax.broadcasted_iota(jnp.int32, d.shape, 1)
    if need_mask:
        d = jnp.where(col < k_actual, d, jnp.inf)
    blk_min = jnp.min(d, axis=-1, keepdims=True)              # (tm, 1)
    # first-argmin within the block (by global column index)
    blk_arg = jnp.min(jnp.where(d <= blk_min, col, jnp.int32(2 ** 30)),
                      axis=-1, keepdims=True)
    better = blk_min < dmin_sc[...]                           # strict < keeps first
    amin_sc[...] = jnp.where(better, blk_arg, amin_sc[...])
    dmin_sc[...] = jnp.where(better, blk_min, dmin_sc[...])

    @pl.when(kb == pl.num_programs(1) - 1)
    def _():
        idx_ref[...] = amin_sc[...]


def pallas_vq(x, codebook, tm=128, tc=512):
    """Nearest-codebook indices + gathered codes.  x:(M,D), codebook:(K,D)."""
    M, D = x.shape
    K = codebook.shape[0]
    tm = min(tm, _round_up(M, 8))
    tc = min(tc, _round_up(K, 128))
    Mp, Kp = _round_up(M, tm), _round_up(K, tc)

    xp = _pad2(_cast(x, jnp.bfloat16), Mp, D)
    cbf = codebook.astype(jnp.float32)
    cbp = _pad2(_cast(codebook, jnp.bfloat16), Kp, D)
    c2 = _pad2(jnp.sum(cbf * cbf, axis=-1).reshape(1, K), 1, Kp)  # (1, Kp) f32

    idx = pl.pallas_call(
        functools.partial(_vq_kernel, k_actual=K, tc=tc, need_mask=(Kp != K)),
        out_shape=jax.ShapeDtypeStruct((Mp, 1), jnp.int32),
        grid_spec=pltpu.PrefetchScalarGridSpec(
            num_scalar_prefetch=0,
            grid=(Mp // tm, Kp // tc),
            in_specs=[pl.BlockSpec((tm, D), lambda i, k: (i, 0)),
                      pl.BlockSpec((tc, D), lambda i, k: (k, 0)),
                      pl.BlockSpec((1, tc), lambda i, k: (0, k))],
            out_specs=pl.BlockSpec((tm, 1), lambda i, k: (i, 0)),
            scratch_shapes=[pltpu.VMEM((tm, 1), jnp.float32),
                            pltpu.VMEM((tm, 1), jnp.int32)]),
        compiler_params=pltpu.CompilerParams(
            dimension_semantics=("parallel", "arbitrary"),
            vmem_limit_bytes=_VMEM_LIMIT),
    )(xp, cbp, c2)
    idx = idx[:M, 0]
    quant = jnp.take(codebook, idx, axis=0)   # gather in JAX (no one-hot matmul)
    return quant, idx


# ----------------------------------------------------------------------------
# Flash-style attention (online softmax over KV blocks), heads as lane slices:
# no XLA head transposes, lane-dense (tq, heads*dim_head) output store, all
# heads of a (batch, q-block) handled per grid step.  The softmax scale is
# folded into the Q projection by the caller.
# ----------------------------------------------------------------------------
def _flash_attn_kernel(q_ref, k_ref, v_ref, o_ref, m_sc, l_sc, acc_sc,
                       *, heads, dim_head, lk_actual, tkv, need_mask):
    kv = pl.program_id(2)

    @pl.when(kv == 0)
    def _():
        m_sc[...] = jnp.full_like(m_sc, -jnp.inf)
        l_sc[...] = jnp.zeros_like(l_sc)
        acc_sc[...] = jnp.zeros_like(acc_sc)

    q = q_ref[0]                     # (tq, heads*dim_head) bf16, scale pre-folded
    k = k_ref[0]                     # (tkv, heads*dim_head) bf16
    v = v_ref[0]

    if need_mask:
        col = kv * tkv + lax.broadcasted_iota(
            jnp.int32, (q.shape[0], k.shape[0]), 1)
        kvmask = col < lk_actual     # padding only ever in the last kv block

    for h in range(heads):           # static unroll; heads indexed as lane slices
        lo = h * dim_head
        qh = q[:, lo:lo + dim_head]                       # (tq, Dh)
        kh = k[:, lo:lo + dim_head]                       # (tkv, Dh)
        vh = v[:, lo:lo + dim_head]
        s = jnp.einsum("qd,kd->qk", qh, kh,
                       preferred_element_type=jnp.float32)  # (tq, tkv)
        if need_mask:
            s = jnp.where(kvmask, s, -1e30)
        m_prev = m_sc[:, h:h + 1]                         # (tq, 1)
        m_new = jnp.maximum(m_prev, jnp.max(s, axis=-1, keepdims=True))
        a = jnp.exp(m_prev - m_new)
        p = jnp.exp(s - m_new)
        l_sc[:, lo:lo + dim_head] = (a * l_sc[:, lo:lo + dim_head] +
                                     jnp.sum(p, axis=-1, keepdims=True))
        acc_sc[:, lo:lo + dim_head] = (
            a * acc_sc[:, lo:lo + dim_head] +
            jnp.einsum("qk,kd->qd", p.astype(v.dtype), vh,
                       preferred_element_type=jnp.float32))
        m_sc[:, h:h + 1] = m_new

    @pl.when(kv == pl.num_programs(2) - 1)
    def _():
        # l_sc already holds the per-head denominator broadcast across that
        # head's lanes -> one lane-dense store for the whole (tq, inner) block.
        o_ref[0] = (acc_sc[...] *
                    pl.reciprocal(l_sc[...], approx=True)).astype(o_ref.dtype)


def pallas_attention(q, k, v, heads, dim_head, tq=256, tkv=512):
    """q:(B, Lq, H*Dh), k/v:(B, Lk, H*Dh) -> (B, Lq, H*Dh) bf16."""
    B, Lq, inner = q.shape
    Lk = k.shape[1]
    tq = min(tq, _round_up(Lq, 8))
    tkv = min(tkv, _round_up(Lk, 8))
    Lqp, Lkp = _round_up(Lq, tq), _round_up(Lk, tkv)

    qp = _pad_seq(_cast(q, jnp.bfloat16), Lqp)
    kp = _pad_seq(_cast(k, jnp.bfloat16), Lkp)
    vp = _pad_seq(_cast(v, jnp.bfloat16), Lkp)

    out = pl.pallas_call(
        functools.partial(_flash_attn_kernel, heads=heads, dim_head=dim_head,
                          lk_actual=Lk, tkv=tkv, need_mask=(Lkp != Lk)),
        out_shape=jax.ShapeDtypeStruct((B, Lqp, inner), jnp.bfloat16),
        grid_spec=pltpu.PrefetchScalarGridSpec(
            num_scalar_prefetch=0,
            grid=(B, Lqp // tq, Lkp // tkv),
            in_specs=[pl.BlockSpec((1, tq, inner), lambda b, i, j: (b, i, 0)),
                      pl.BlockSpec((1, tkv, inner), lambda b, i, j: (b, j, 0)),
                      pl.BlockSpec((1, tkv, inner), lambda b, i, j: (b, j, 0))],
            out_specs=pl.BlockSpec((1, tq, inner), lambda b, i, j: (b, i, 0)),
            scratch_shapes=[pltpu.VMEM((tq, heads), jnp.float32),
                            pltpu.VMEM((tq, inner), jnp.float32),
                            pltpu.VMEM((tq, inner), jnp.float32)]),
        compiler_params=pltpu.CompilerParams(
            dimension_semantics=("parallel", "parallel", "arbitrary"),
            vmem_limit_bytes=_VMEM_LIMIT),
    )(qp, kp, vp)
    if Lqp == Lq:
        return out
    return out[:, :Lq, :]


# ----------------------------------------------------------------------------
# Masked, label-smoothed cross-entropy (tiled over rows, SMEM accumulation)
# ----------------------------------------------------------------------------
def _loss_kernel(z_ref, lab_ref, m_ref, o_ref, acc_ref, *, eps):
    i = pl.program_id(0)

    @pl.when(i == 0)
    def _():
        acc_ref[0] = 0.0
        acc_ref[1] = 0.0

    z = z_ref[...]                    # (tm, N) f32 logits
    lab = lab_ref[...]                # (tm, 1) int32
    m = m_ref[...]                    # (tm, 1) f32 (1 == masked, counted)
    zmax = jnp.max(z, axis=-1, keepdims=True)
    lse = jnp.log(jnp.sum(jnp.exp(z - zmax), axis=-1, keepdims=True)) + zmax
    onehot = (lax.broadcasted_iota(jnp.int32, z.shape, 1) == lab).astype(jnp.float32)
    z_lab = jnp.sum(z * onehot, axis=-1, keepdims=True)
    z_mean = jnp.mean(z, axis=-1, keepdims=True)
    # label-smoothed CE:  lse - (1-eps)*z_label - eps*mean(z)
    per = lse - (1.0 - eps) * z_lab - eps * z_mean
    acc_ref[0] += jnp.sum(per * m)
    acc_ref[1] += jnp.sum(m)

    @pl.when(i == pl.num_programs(0) - 1)
    def _():
        o_ref[0, 0] = acc_ref[0] / jnp.maximum(acc_ref[1], 1e-30)


def pallas_masked_ce(logits, labels, mask, label_smoothing=0.1, tm=256):
    """logits:(M,N) f32, labels:(M,1) int32, mask:(M,1) f32 -> scalar."""
    M, N = logits.shape
    # Keep the (tm, N) f32 block x 2 buffers well under the v7x 64 MiB VMEM.
    max_tm = max(8, ((8 * 1024 * 1024) // max(N * 4, 1)) // 8 * 8)
    tm = min(tm, max_tm, _round_up(M, 8))
    Mp = _round_up(M, tm)
    zp = _pad2(logits, Mp, N)
    lp = _pad2(labels, Mp, 1)
    mp = _pad2(mask, Mp, 1)            # padded rows have mask == 0
    # TODO(synk): for 16-32K vocabularies, tile the vocab axis (online LSE) and
    # emit per-block partials on a parallel axis so v7x's 2 TCs both work.

    out = pl.pallas_call(
        functools.partial(_loss_kernel, eps=label_smoothing),
        out_shape=jax.ShapeDtypeStruct((1, 1), jnp.float32),
        grid_spec=pltpu.PrefetchScalarGridSpec(
            num_scalar_prefetch=0,
            grid=(Mp // tm,),
            in_specs=[pl.BlockSpec((tm, N), lambda i: (i, 0)),
                      pl.BlockSpec((tm, 1), lambda i: (i, 0)),
                      pl.BlockSpec((tm, 1), lambda i: (i, 0))],
            out_specs=pl.BlockSpec(memory_space=pltpu.MemorySpace.SMEM),
            scratch_shapes=[pltpu.SMEM((2,), jnp.float32)]),
        compiler_params=pltpu.CompilerParams(
            dimension_semantics=("arbitrary",),
            vmem_limit_bytes=_VMEM_LIMIT),
    )(zp, lp, mp)
    return out[0, 0]


# ----------------------------------------------------------------------------
# Plain-JAX glue
# ----------------------------------------------------------------------------
def layer_norm(x, g, b, eps=1e-5):
    # f32 math, bf16 output (halves the activation bytes fed to the next linear).
    # TODO(synk): fuse LN into the following linear's prologue when K fits one tk.
    xf = x.astype(jnp.float32)
    mu = jnp.mean(xf, axis=-1, keepdims=True)
    var = jnp.mean((xf - mu) ** 2, axis=-1, keepdims=True)
    y = (xf - mu) / jnp.sqrt(var + eps) * g + b
    return y.astype(jnp.bfloat16)


def random_masking(x, mask_token, mask_ratio, key):
    """Per-sample random masking by argsort of random noise (as in reference)."""
    N, L, D = x.shape
    len_mask = max(int(L * mask_ratio), 1)
    len_keep = L - len_mask
    noise = jax.random.uniform(key, (N, L), jnp.float32)
    ids_shuffle = jnp.argsort(noise, axis=1)
    ids_restore = jnp.argsort(ids_shuffle, axis=1)
    ids_keep = ids_shuffle[:, :len_keep]
    gather_keep = jnp.broadcast_to(ids_keep[..., None], (N, len_keep, D))
    x_keep = jnp.take_along_axis(x, gather_keep, axis=1)
    mask_tokens = jnp.broadcast_to(mask_token[None].astype(x.dtype),
                                   (N, L - len_keep, D))
    x_cat = jnp.concatenate([x_keep, mask_tokens], axis=1)
    gather_restore = jnp.broadcast_to(ids_restore[..., None], (N, L, D))
    x_restored = jnp.take_along_axis(x_cat, gather_restore, axis=1)
    mask = jnp.ones((N, L), jnp.float32).at[:, :len_keep].set(0.0)
    mask = jnp.take_along_axis(mask, ids_restore, axis=1)
    return x_restored, mask


def attention_block(x_q, x_kv, wq, bq, wk, bk, wv, bv, wo, bo,
                    heads, dim_head, residual, is_self):
    B, Lq, _ = x_q.shape
    Lk = x_kv.shape[1]
    inner = heads * dim_head
    scale = dim_head ** -0.5
    # Fold the softmax scale into the Q projection (free: a weight-sized op
    # instead of a per-(q,k) multiply inside the attention inner loop).
    wq_s, bq_s = wq * scale, bq * scale
    if is_self:
        # fused QKV projection: one pallas_call instead of three
        w_qkv = jnp.concatenate([wq_s, wk, wv], axis=1)
        b_qkv = jnp.concatenate([bq_s, bk, bv], axis=0)
        qkv = pallas_linear(x_q.reshape(B * Lq, -1), w_qkv, b_qkv)   # bf16
        q, kk, vv = jnp.split(qkv, 3, axis=1)
    else:
        q = pallas_linear(x_q.reshape(B * Lq, -1), wq_s, bq_s)
        # fused KV projection from the context
        w_kv = jnp.concatenate([wk, wv], axis=1)
        b_kv = jnp.concatenate([bk, bv], axis=0)
        kv = pallas_linear(x_kv.reshape(B * Lk, -1), w_kv, b_kv)
        kk, vv = jnp.split(kv, 2, axis=1)

    # No head split/merge transposes: heads stay packed along the lane axis and
    # the flash kernel slices them in-kernel.
    o = pallas_attention(q.reshape(B, Lq, inner), kk.reshape(B, Lk, inner),
                         vv.reshape(B, Lk, inner), heads, dim_head)
    # output projection with the residual add fused into the epilogue
    out = pallas_linear(o.reshape(B * Lq, inner), wo, bo,
                        residual=residual.reshape(B * Lq, -1))
    return out.reshape(B, Lq, -1)


def cond_transformer(params, x, context, cfg):
    """x: (B, L, embed_dim), context: (B, T, context_dim) -> logits (B, L, n_embed)."""
    B, L, _ = x.shape
    dim = cfg["dim"]
    pos = jnp.broadcast_to(params["pos_emb"], (B, L, dim)).reshape(B * L, dim)
    # proj_in with the positional-embedding add fused as a residual
    h = pallas_linear(x.reshape(B * L, -1), params["proj_in_w"],
                      params["proj_in_b"], residual=pos).reshape(B, L, dim)
    for l in params["layers"]:
        # self-attention (residual fused into the o-projection)
        n = layer_norm(h, l["ln1_g"], l["ln1_b"])
        h = attention_block(n, n, l["wq"], l["bq"], l["wk"], l["bk"],
                            l["wv"], l["bv"], l["wo"], l["bo"],
                            cfg["heads"], cfg["dim_head"],
                            residual=h, is_self=True)
        # cross-attention to text context
        n = layer_norm(h, l["lnc_g"], l["lnc_b"])
        h = attention_block(n, context, l["cwq"], l["cbq"], l["cwk"], l["cbk"],
                            l["cwv"], l["cbv"], l["cwo"], l["cbo"],
                            cfg["heads"], cfg["dim_head"],
                            residual=h, is_self=False)
        # MLP (residual fused into the second linear)
        n = layer_norm(h, l["ln2_g"], l["ln2_b"])
        m = pallas_linear(n.reshape(B * L, dim), l["mlp_w1"], l["mlp_b1"],
                          activation="gelu")
        h = pallas_linear(m, l["mlp_w2"], l["mlp_b2"],
                          residual=h.reshape(B * L, dim)).reshape(B, L, dim)
    h = layer_norm(h, params["lnf_g"], params["lnf_b"])
    # Final head in f32 for the CE numerics.
    logits = pallas_linear(h.reshape(B * L, dim), params["head_w"],
                           params["head_b"],
                           out_dtype=jnp.float32).reshape(B, L, cfg["n_embed"])
    return logits


# ----------------------------------------------------------------------------
# Pipeline
# ----------------------------------------------------------------------------
def init_params(key, cfg):
    def dense(k, shape, scale=0.02):
        return (scale * jax.random.normal(k, shape)).astype(jnp.float32)

    keys = iter(jax.random.split(key, 64))
    D, dim = cfg["embed_dim"], cfg["dim"]
    inner = cfg["heads"] * cfg["dim_head"]
    P = {
        "enc_w": dense(next(keys), (cfg["patch_dim"], D)),
        "enc_b": jnp.zeros((D,), jnp.float32),
        "codebook": dense(next(keys), (cfg["n_embed"], D), scale=1.0),
        "mask_token": jnp.zeros((1, D), jnp.float32),
        "proj_in_w": dense(next(keys), (D, dim)),
        "proj_in_b": jnp.zeros((dim,), jnp.float32),
        "pos_emb": dense(next(keys), (1, cfg["num_tokens"], dim)),
        "lnf_g": jnp.ones((dim,), jnp.float32),
        "lnf_b": jnp.zeros((dim,), jnp.float32),
        "head_w": dense(next(keys), (dim, cfg["n_embed"])),
        "head_b": jnp.zeros((cfg["n_embed"],), jnp.float32),
    }
    layers = []
    for _ in range(cfg["depth"]):
        l = {
            "ln1_g": jnp.ones((dim,), jnp.float32), "ln1_b": jnp.zeros((dim,), jnp.float32),
            "wq": dense(next(keys), (dim, inner)), "bq": jnp.zeros((inner,), jnp.float32),
            "wk": dense(next(keys), (dim, inner)), "bk": jnp.zeros((inner,), jnp.float32),
            "wv": dense(next(keys), (dim, inner)), "bv": jnp.zeros((inner,), jnp.float32),
            "wo": dense(next(keys), (inner, dim)), "bo": jnp.zeros((dim,), jnp.float32),
            "lnc_g": jnp.ones((dim,), jnp.float32), "lnc_b": jnp.zeros((dim,), jnp.float32),
            "cwq": dense(next(keys), (dim, inner)), "cbq": jnp.zeros((inner,), jnp.float32),
            "cwk": dense(next(keys), (cfg["context_dim"], inner)), "cbk": jnp.zeros((inner,), jnp.float32),
            "cwv": dense(next(keys), (cfg["context_dim"], inner)), "cbv": jnp.zeros((inner,), jnp.float32),
            "cwo": dense(next(keys), (inner, dim)), "cbo": jnp.zeros((dim,), jnp.float32),
            "ln2_g": jnp.ones((dim,), jnp.float32), "ln2_b": jnp.zeros((dim,), jnp.float32),
            "mlp_w1": dense(next(keys), (dim, cfg["mlp_dim"])), "mlp_b1": jnp.zeros((cfg["mlp_dim"],), jnp.float32),
            "mlp_w2": dense(next(keys), (cfg["mlp_dim"], dim)), "mlp_b2": jnp.zeros((dim,), jnp.float32),
        }
        layers.append(l)
    P["layers"] = layers
    return P


def pipeline_forward(params, img, context, cfg, mask_ratio=0.75, *, mask_key):
    """Mirrors Pipeline.forward: to_latent -> random_masking -> transformer -> loss."""
    B, C, H, W = img.shape
    p = cfg["patch"]
    L = (H // p) * (W // p)
    # to_latent (VQGAN-encode stand-in): patch-embed + VQ nearest codebook
    patches = img.reshape(B, C, H // p, p, W // p, p)
    patches = patches.transpose(0, 2, 4, 1, 3, 5).reshape(B, L, C * p * p)
    z = pallas_linear(patches.reshape(B * L, -1), params["enc_w"], params["enc_b"])
    quant, idx = pallas_vq(z, params["codebook"])
    x = quant.astype(jnp.bfloat16).reshape(B, L, cfg["embed_dim"])
    labels = idx.reshape(B, L)
    # random masking (argsort-based; plain JAX)
    x, mask = random_masking(x, params["mask_token"], mask_ratio, mask_key)
    # token_to_logits (CondTransformer)
    logits = cond_transformer(params, x, context, cfg)
    # masked label-smoothed cross-entropy loss
    loss = pallas_masked_ce(logits.reshape(B * L, cfg["n_embed"]),
                            labels.reshape(B * L, 1).astype(jnp.int32),
                            mask.reshape(B * L, 1).astype(jnp.float32),
                            label_smoothing=0.1)
    return loss


if __name__ == "__main__":
    cfg = dict(
        patch=4, embed_dim=32, n_embed=64,
        dim=32, heads=2, dim_head=16, mlp_dim=64,
        context_dim=32, depth=1,
    )
    B, C, H, W = 2, 4, 16, 16
    cfg["num_tokens"] = (H // cfg["patch"]) ** 2             # 16
    cfg["patch_dim"] = C * cfg["patch"] * cfg["patch"]        # 64

    key = jax.random.PRNGKey(0)
    k_img, k_txt, k_param, k_mask = jax.random.split(key, 4)
    img = jax.random.normal(k_img, (B, C, H, W), jnp.float32)
    # TODO(synk): CLIP text encoder replaced by deterministic random context.
    context = jax.random.normal(k_txt, (B, 8, cfg["context_dim"]), jnp.float32)

    params = init_params(k_param, cfg)

    fwd = jax.jit(functools.partial(pipeline_forward, cfg=cfg, mask_ratio=0.75))
    loss = fwd(params, img, context, mask_key=k_mask)
    jax.block_until_ready(loss)
    assert loss.shape == () and bool(jnp.isfinite(loss))
    print("KERNEL_OK")
</pallas_src>

<mosaic_0001>
module attributes {stable_mosaic.version = 11 : i64} {
  func.func @_linear_kernel(%arg0: i32, %arg1: i32, %arg2: i32, %arg3: memref<32x128xbf16, #tpu.memory_space<vmem>>, %arg4: memref<128x128xbf16, #tpu.memory_space<vmem>>, %arg5: memref<1x128xf32, #tpu.memory_space<vmem>>, %arg6: memref<32x128xbf16, #tpu.memory_space<vmem>>, %arg7: memref<32x128xf32, #tpu.memory_space<vmem>>) attributes {dimension_semantics = [#tpu.dimension_semantics<parallel>, #tpu.dimension_semantics<parallel>, #tpu.dimension_semantics<arbitrary>], iteration_bounds = array<i64: 1, 1, 1>, scalar_prefetch = 0 : i64, scratch_operands = 1 : i64, tpu.core_type = #tpu.core_type<tc>, window_params = [{transform_indices = @transform_0, window_bounds = array<i64: 32, 128>}, {transform_indices = @transform_1, window_bounds = array<i64: 128, 128>}, {transform_indices = @transform_2, window_bounds = array<i64: 1, 128>}, {transform_indices = @transform_3, window_bounds = array<i64: 32, 128>}]} {
    %c0_i32 = arith.constant 0 : i32
    %0 = arith.cmpi eq, %arg2, %c0_i32 : i32
    %1 = arith.extui %0 : i1 to i32
    %c0_i32_0 = arith.constant 0 : i32
    %2 = arith.cmpi ne, %1, %c0_i32_0 : i32
    scf.if %2 {
      %cst_10 = arith.constant 0.000000e+00 : f32
      %12 = vector.broadcast %cst_10 : f32 to vector<32x128xf32>
      %c0_11 = arith.constant 0 : index
      %c0_12 = arith.constant 0 : index
      %13 = vector.load %arg7[%c0_11, %c0_12] : memref<32x128xf32, #tpu.memory_space<vmem>>, vector<32x128xf32>
      tpu.vector_store %arg7[%c0_11, %c0_12], %12 {strides = array<i32>} : memref<32x128xf32, #tpu.memory_space<vmem>>, vector<32x128xf32>,
    } else {
    }
    %c0 = arith.constant 0 : index
    %c0_1 = arith.constant 0 : index
    %3 = vector.load %arg7[%c0, %c0_1] : memref<32x128xf32, #tpu.memory_space<vmem>>, vector<32x128xf32>
    %c0_2 = arith.constant 0 : index
    %c0_3 = arith.constant 0 : index
    %4 = vector.load %arg3[%c0_2, %c0_3] : memref<32x128xbf16, #tpu.memory_space<vmem>>, vector<32x128xbf16>
    %c0_4 = arith.constant 0 : index
    %c0_5 = arith.constant 0 : index
    %5 = vector.load %arg4[%c0_4, %c0_5] : memref<128x128xbf16, #tpu.memory_space<vmem>>, vector<128x128xbf16>
    %cst = arith.constant dense<0.000000e+00> : vector<32x128xf32>
    %6 = tpu.matmul %4, %5, %cst {dimension_numbers = #tpu.dot_dimension_numbers<[1], [0], [0], [1], [0, 0, 1, 1], [], []>} : vector<32x128xbf16>, vector<128x128xbf16>, vector<32x128xf32> -> vector<32x128xf32>
    %7 = arith.addf %3, %6 : vector<32x128xf32>
    %c0_6 = arith.constant 0 : index
    %c0_7 = arith.constant 0 : index
    %8 = vector.load %arg7[%c0_6, %c0_7] : memref<32x128xf32, #tpu.memory_space<vmem>>, vector<32x128xf32>
    tpu.vector_store %arg7[%c0_6, %c0_7], %7 {strides = array<i32>} : memref<32x128xf32, #tpu.memory_space<vmem>>, vector<32x128xf32>,
    %c0_i32_8 = arith.constant 0 : i32
    %9 = arith.cmpi eq, %arg2, %c0_i32_8 : i32
    %10 = arith.extui %9 : i1 to i32
    %c0_i32_9 = arith.constant 0 : i32
    %11 = arith.cmpi ne, %10, %c0_i32_9 : i32
    scf.if %11 {
      %c0_10 = arith.constant 0 : index
      %c0_11 = arith.constant 0 : index
      %12 = vector.load %arg7[%c0_10, %c0_11] : memref<32x128xf32, #tpu.memory_space<vmem>>, vector<32x128xf32>
      %c0_12 = arith.constant 0 : index
      %c0_13 = arith.constant 0 : index
      %13 = vector.load %arg5[%c0_12, %c0_13] : memref<1x128xf32, #tpu.memory_space<vmem>>, vector<1x128xf32>
      %14 = vector.broadcast %13 : vector<1x128xf32> to vector<32x128xf32>
      %15 = arith.addf %12, %14 : vector<32x128xf32>
      %16 = arith.truncf %15 : vector<32x128xf32> to vector<32x128xbf16>
      %c0_14 = arith.constant 0 : index
      %c0_15 = arith.constant 0 : index
      %17 = vector.load %arg6[%c0_14, %c0_15] : memref<32x128xbf16, #tpu.memory_space<vmem>>, vector<32x128xbf16>
      tpu.vector_store %arg6[%c0_14, %c0_15], %16 {strides = array<i32>} : memref<32x128xbf16, #tpu.memory_space<vmem>>, vector<32x128xbf16>,
    } else {
    }
    return
  }
  func.func @transform_0(%arg0: i32, %arg1: i32, %arg2: i32) -> (i32, i32) {
    %c0_i32 = arith.constant 0 : i32
    return %arg0, %arg2 : i32, i32
  }
  func.func @transform_1(%arg0: i32, %arg1: i32, %arg2: i32) -> (i32, i32) {
    %c0_i32 = arith.constant 0 : i32
    return %arg2, %arg1 : i32, i32
  }
  func.func @transform_2(%arg0: i32, %arg1: i32, %arg2: i32) -> (i32, i32) {
    %c0_i32 = arith.constant 0 : i32
    %c0_i32_0 = arith.constant 0 : i32
    return %c0_i32, %arg1 : i32, i32
  }
  func.func @transform_3(%arg0: i32, %arg1: i32, %arg2: i32) -> (i32, i32) {
    %c0_i32 = arith.constant 0 : i32
    return %arg0, %arg1 : i32, i32
  }
}

module attributes {stable_mosaic.version = 11 : i64} {
  func.func @_vq_kernel(%arg0: i32, %arg1: i32, %arg2: memref<32x32xbf16, #tpu.memory_space<vmem>>, %arg3: memref<128x32xbf16, #tpu.memory_space<vmem>>, %arg4: memref<1x128xf32, #tpu.memory_space<vmem>>, %arg5: memref<32x1xi32, #tpu.memory_space<vmem>>, %arg6: memref<32x1xf32, #tpu.memory_space<vmem>>, %arg7: memref<32x1xi32, #tpu.memory_space<vmem>>) attributes {dimension_semantics = [#tpu.dimension_semantics<parallel>, #tpu.dimension_semantics<arbitrary>], iteration_bounds = array<i64: 1, 1>, scalar_prefetch = 0 : i64, scratch_operands = 2 : i64, tpu.core_type = #tpu.core_type<tc>, window_params = [{transform_indices = @transform_0, window_bounds = array<i64: 32, 32>}, {transform_indices = @transform_1, window_bounds = array<i64: 128, 32>}, {transform_indices = @transform_2, window_bounds = array<i64: 1, 128>}, {transform_indices = @transform_3, window_bounds = array<i64: 32, 1>}]} {
    %c0_i32 = arith.constant 0 : i32
    %0 = arith.cmpi eq, %arg1, %c0_i32 : i32
    %1 = arith.extui %0 : i1 to i32
    %c0_i32_0 = arith.constant 0 : i32
    %2 = arith.cmpi ne, %1, %c0_i32_0 : i32
    scf.if %2 {
      %cst_22 = arith.constant 0x7F800000 : f32
      %38 = vector.broadcast %cst_22 : f32 to vector<32x1xf32>
      %c0_23 = arith.constant 0 : index
      %c0_24 = arith.constant 0 : index
      %39 = vector.load %arg6[%c0_23, %c0_24] : memref<32x1xf32, #tpu.memory_space<vmem>>, vector<32x1xf32>
      tpu.vector_store %arg6[%c0_23, %c0_24], %38 {strides = array<i32>} : memref<32x1xf32, #tpu.memory_space<vmem>>, vector<32x1xf32>,
      %c0_i32_25 = arith.constant 0 : i32
      %40 = vector.broadcast %c0_i32_25 : i32 to vector<32x1xi32>
      %c0_26 = arith.constant 0 : index
      %c0_27 = arith.constant 0 : index
      %41 = vector.load %arg7[%c0_26, %c0_27] : memref<32x1xi32, #tpu.memory_space<vmem>>, vector<32x1xi32>
      tpu.vector_store %arg7[%c0_26, %c0_27], %40 {strides = array<i32>} : memref<32x1xi32, #tpu.memory_space<vmem>>, vector<32x1xi32>,
    } else {
    }
    %c0 = arith.constant 0 : index
    %c0_1 = arith.constant 0 : index
    %3 = vector.load %arg2[%c0, %c0_1] : memref<32x32xbf16, #tpu.memory_space<vmem>>, vector<32x32xbf16>
    %c0_2 = arith.constant 0 : index
    %c0_3 = arith.constant 0 : index
    %4 = vector.load %arg3[%c0_2, %c0_3] : memref<128x32xbf16, #tpu.memory_space<vmem>>, vector<128x32xbf16>
    "tpu.trace_start"() <{level = 10 : i32, message = "md,kd->mk"}> : () -> ()
    %cst = arith.constant dense<0.000000e+00> : vector<32x128xf32>
    %5 = tpu.matmul %3, %4, %cst {dimension_numbers = #tpu.dot_dimension_numbers<[1], [1], [0], [0], [0, 0, 1, 0], [], []>} : vector<32x32xbf16>, vector<128x32xbf16>, vector<32x128xf32> -> vector<32x128xf32>
    "tpu.trace_stop"() : () -> ()
    %c0_4 = arith.constant 0 : index
    %c0_5 = arith.constant 0 : index
    %6 = vector.load %arg4[%c0_4, %c0_5] : memref<1x128xf32, #tpu.memory_space<vmem>>, vector<1x128xf32>
    %cst_6 = arith.constant 2.000000e+00 : f32
    %7 = vector.broadcast %cst_6 : f32 to vector<32x128xf32>
    %8 = arith.mulf %7, %5 : vector<32x128xf32>
    %9 = vector.broadcast %6 : vector<1x128xf32> to vector<32x128xf32>
    %10 = arith.subf %9, %8 : vector<32x128xf32>
    %c128_i32 = arith.constant 128 : i32
    %11 = arith.muli %arg1, %c128_i32 : i32
    %12 = tpu.iota {dimensions = array<i32: 1>} : vector<32x128xi32>
    %13 = vector.broadcast %11 : i32 to vector<32x128xi32>
    %14 = arith.addi %13, %12 : vector<32x128xi32>
    %c64_i32 = arith.constant 64 : i32
    %15 = vector.broadcast %c64_i32 : i32 to vector<32x128xi32>
    %16 = arith.cmpi slt, %14, %15 : vector<32x128xi32>
    %cst_7 = arith.constant 0x7F800000 : f32
    %17 = vector.broadcast %cst_7 : f32 to vector<32x128xf32>
    %18 = arith.select %16, %10, %17 : vector<32x128xi1>, vector<32x128xf32>
    %cst_8 = arith.constant dense<0x7F800000> : vector<32xf32>
    %19 = vector.multi_reduction <minimumf>, %18, %cst_8 [1] : vector<32x128xf32> to vector<32xf32>
    %20 = vector.shape_cast %19 : vector<32xf32> to vector<32x1xf32>
    %21 = vector.broadcast %20 : vector<32x1xf32> to vector<32x128xf32>
    %22 = arith.cmpf ole, %18, %21 : vector<32x128xf32>
    %c1073741824_i32 = arith.constant 1073741824 : i32
    %23 = vector.broadcast %c1073741824_i32 : i32 to vector<32x128xi32>
    %24 = arith.select %22, %14, %23 : vector<32x128xi1>, vector<32x128xi32>
    %cst_9 = arith.constant dense<2147483647> : vector<32xi32>
    %25 = vector.multi_reduction <minsi>, %24, %cst_9 [1] : vector<32x128xi32> to vector<32xi32>
    %26 = vector.shape_cast %25 : vector<32xi32> to vector<32x1xi32>
    %c0_10 = arith.constant 0 : index
    %c0_11 = arith.constant 0 : index
    %27 = vector.load %arg6[%c0_10, %c0_11] : memref<32x1xf32, #tpu.memory_space<vmem>>, vector<32x1xf32>
    %28 = arith.cmpf olt, %20, %27 : vector<32x1xf32>
    %c0_12 = arith.constant 0 : index
    %c0_13 = arith.constant 0 : index
    %29 = vector.load %arg7[%c0_12, %c0_13] : memref<32x1xi32, #tpu.memory_space<vmem>>, vector<32x1xi32>
    %30 = arith.select %28, %26, %29 : vector<32x1xi1>, vector<32x1xi32>
    %c0_14 = arith.constant 0 : index
    %c0_15 = arith.constant 0 : index
    %31 = vector.load %arg7[%c0_14, %c0_15] : memref<32x1xi32, #tpu.memory_space<vmem>>, vector<32x1xi32>
    tpu.vector_store %arg7[%c0_14, %c0_15], %30 {strides = array<i32>} : memref<32x1xi32, #tpu.memory_space<vmem>>, vector<32x1xi32>,
    %c0_16 = arith.constant 0 : index
    %c0_17 = arith.constant 0 : index
    %32 = vector.load %arg6[%c0_16, %c0_17] : memref<32x1xf32, #tpu.memory_space<vmem>>, vector<32x1xf32>
    %33 = arith.select %28, %20, %32 : vector<32x1xi1>, vector<32x1xf32>
    %c0_18 = arith.constant 0 : index
    %c0_19 = arith.constant 0 : index
    %34 = vector.load %arg6[%c0_18, %c0_19] : memref<32x1xf32, #tpu.memory_space<vmem>>, vector<32x1xf32>
    tpu.vector_store %arg6[%c0_18, %c0_19], %33 {strides = array<i32>} : memref<32x1xf32, #tpu.memory_space<vmem>>, vector<32x1xf32>,
    %c0_i32_20 = arith.constant 0 : i32
    %35 = arith.cmpi eq, %arg1, %c0_i32_20 : i32
    %36 = arith.extui %35 : i1 to i32
    %c0_i32_21 = arith.constant 0 : i32
    %37 = arith.cmpi ne, %36, %c0_i32_21 : i32
    scf.if %37 {
      %c0_22 = arith.constant 0 : index
      %c0_23 = arith.constant 0 : index
      %38 = vector.load %arg7[%c0_22, %c0_23] : memref<32x1xi32, #tpu.memory_space<vmem>>, vector<32x1xi32>
      %c0_24 = arith.constant 0 : index
      %c0_25 = arith.constant 0 : index
      %39 = vector.load %arg5[%c0_24, %c0_25] : memref<32x1xi32, #tpu.memory_space<vmem>>, vector<32x1xi32>
      tpu.vector_store %arg5[%c0_24, %c0_25], %38 {strides = array<i32>} : memref<32x1xi32, #tpu.memory_space<vmem>>, vector<32x1xi32>,
    } else {
    }
    return
  }
  func.func @transform_0(%arg0: i32, %arg1: i32) -> (i32, i32) {
    %c0_i32 = arith.constant 0 : i32
    %c0_i32_0 = arith.constant 0 : i32
    return %arg0, %c0_i32 : i32, i32
  }
  func.func @transform_1(%arg0: i32, %arg1: i32) -> (i32, i32) {
    %c0_i32 = arith.constant 0 : i32
    %c0_i32_0 = arith.constant 0 : i32
    return %arg1, %c0_i32 : i32, i32
  }
  func.func @transform_2(%arg0: i32, %arg1: i32) -> (i32, i32) {
    %c0_i32 = arith.constant 0 : i32
    %c0_i32_0 = arith.constant 0 : i32
    return %c0_i32, %arg1 : i32, i32
  }
  func.func @transform_3(%arg0: i32, %arg1: i32) -> (i32, i32) {
    %c0_i32 = arith.constant 0 : i32
    %c0_i32_0 = arith.constant 0 : i32
    return %arg0, %c0_i32 : i32, i32
  }
}

module attributes {stable_mosaic.version = 11 : i64} {
  func.func @_linear_kernel(%arg0: i32, %arg1: i32, %arg2: i32, %arg3: memref<32x128xbf16, #tpu.memory_space<vmem>>, %arg4: memref<128x128xbf16, #tpu.memory_space<vmem>>, %arg5: memref<1x128xf32, #tpu.memory_space<vmem>>, %arg6: memref<32x128xf32, #tpu.memory_space<vmem>>, %arg7: memref<32x128xbf16, #tpu.memory_space<vmem>>, %arg8: memref<32x128xf32, #tpu.memory_space<vmem>>) attributes {dimension_semantics = [#tpu.dimension_semantics<parallel>, #tpu.dimension_semantics<parallel>, #tpu.dimension_semantics<arbitrary>], iteration_bounds = array<i64: 1, 1, 1>, scalar_prefetch = 0 : i64, scratch_operands = 1 : i64, tpu.core_type = #tpu.core_type<tc>, window_params = [{transform_indices = @transform_0, window_bounds = array<i64: 32, 128>}, {transform_indices = @transform_1, window_bounds = array<i64: 128, 128>}, {transform_indices = @transform_2, window_bounds = array<i64: 1, 128>}, {transform_indices = @transform_3, window_bounds = array<i64: 32, 128>}, {transform_indices = @transform_4, window_bounds = array<i64: 32, 128>}]} {
    %c0_i32 = arith.constant 0 : i32
    %0 = arith.cmpi eq, %arg2, %c0_i32 : i32
    %1 = arith.extui %0 : i1 to i32
    %c0_i32_0 = arith.constant 0 : i32
    %2 = arith.cmpi ne, %1, %c0_i32_0 : i32
    scf.if %2 {
      %cst_10 = arith.constant 0.000000e+00 : f32
      %12 = vector.broadcast %cst_10 : f32 to vector<32x128xf32>
      %c0_11 = arith.constant 0 : index
      %c0_12 = arith.constant 0 : index
      %13 = vector.load %arg8[%c0_11, %c0_12] : memref<32x128xf32, #tpu.memory_space<vmem>>, vector<32x128xf32>
      tpu.vector_store %arg8[%c0_11, %c0_12], %12 {strides = array<i32>} : memref<32x128xf32, #tpu.memory_space<vmem>>, vector<32x128xf32>,
    } else {
    }
    %c0 = arith.constant 0 : index
    %c0_1 = arith.constant 0 : index
    %3 = vector.load %arg8[%c0, %c0_1] : memref<32x128xf32, #tpu.memory_space<vmem>>, vector<32x128xf32>
    %c0_2 = arith.constant 0 : index
    %c0_3 = arith.constant 0 : index
    %4 = vector.load %arg3[%c0_2, %c0_3] : memref<32x128xbf16, #tpu.memory_space<vmem>>, vector<32x128xbf16>
    %c0_4 = arith.constant 0 : index
    %c0_5 = arith.constant 0 : index
    %5 = vector.load %arg4[%c0_4, %c0_5] : memref<128x128xbf16, #tpu.memory_space<vmem>>, vector<128x128xbf16>
    %cst = arith.constant dense<0.000000e+00> : vector<32x128xf32>
    %6 = tpu.matmul %4, %5, %cst {dimension_numbers = #tpu.dot_dimension_numbers<[1], [0], [0], [1], [0, 0, 1, 1], [], []>} : vector<32x128xbf16>, vector<128x128xbf16>, vector<32x128xf32> -> vector<32x128xf32>
    %7 = arith.addf %3, %6 : vector<32x128xf32>
    %c0_6 = arith.constant 0 : index
    %c0_7 = arith.constant 0 : index
    %8 = vector.load %arg8[%c0_6, %c0_7] : memref<32x128xf32, #tpu.memory_space<vmem>>, vector<32x128xf32>
    tpu.vector_store %arg8[%c0_6, %c0_7], %7 {strides = array<i32>} : memref<32x128xf32, #tpu.memory_space<vmem>>, vector<32x128xf32>,
    %c0_i32_8 = arith.constant 0 : i32
    %9 = arith.cmpi eq, %arg2, %c0_i32_8 : i32
    %10 = arith.extui %9 : i1 to i32
    %c0_i32_9 = arith.constant 0 : i32
    %11 = arith.cmpi ne, %10, %c0_i32_9 : i32
    scf.if %11 {
      %c0_10 = arith.constant 0 : index
      %c0_11 = arith.constant 0 : index
      %12 = vector.load %arg8[%c0_10, %c0_11] : memref<32x128xf32, #tpu.memory_space<vmem>>, vector<32x128xf32>
      %c0_12 = arith.constant 0 : index
      %c0_13 = arith.constant 0 : index
      %13 = vector.load %arg5[%c0_12, %c0_13] : memref<1x128xf32, #tpu.memory_space<vmem>>, vector<1x128xf32>
      %14 = vector.broadcast %13 : vector<1x128xf32> to vector<32x128xf32>
      %15 = arith.addf %12, %14 : vector<32x128xf32>
      %c0_14 = arith.constant 0 : index
      %c0_15 = arith.constant 0 : index
      %16 = vector.load %arg6[%c0_14, %c0_15] : memref<32x128xf32, #tpu.memory_space<vmem>>, vector<32x128xf32>
      %17 = arith.addf %15, %16 : vector<32x128xf32>
      %18 = arith.truncf %17 : vector<32x128xf32> to vector<32x128xbf16>
      %c0_16 = arith.constant 0 : index
      %c0_17 = arith.constant 0 : index
      %19 = vector.load %arg7[%c0_16, %c0_17] : memref<32x128xbf16, #tpu.memory_space<vmem>>, vector<32x128xbf16>
      tpu.vector_store %arg7[%c0_16, %c0_17], %18 {strides = array<i32>} : memref<32x128xbf16, #tpu.memory_space<vmem>>, vector<32x128xbf16>,
    } else {
    }
    return
  }
  func.func @transform_0(%arg0: i32, %arg1: i32, %arg2: i32) -> (i32, i32) {
    %c0_i32 = arith.constant 0 : i32
    return %arg0, %arg2 : i32, i32
  }
  func.func @transform_1(%arg0: i32, %arg1: i32, %arg2: i32) -> (i32, i32) {
    %c0_i32 = arith.constant 0 : i32
    return %arg2, %arg1 : i32, i32
  }
  func.func @transform_2(%arg0: i32, %arg1: i32, %arg2: i32) -> (i32, i32) {
    %c0_i32 = arith.constant 0 : i32
    %c0_i32_0 = arith.constant 0 : i32
    return %c0_i32, %arg1 : i32, i32
  }
  func.func @transform_3(%arg0: i32, %arg1: i32, %arg2: i32) -> (i32, i32) {
    %c0_i32 = arith.constant 0 : i32
    return %arg0, %arg1 : i32, i32
  }
  func.func @transform_4(%arg0: i32, %arg1: i32, %arg2: i32) -> (i32, i32) {
    %c0_i32 = arith.constant 0 : i32
    return %arg0, %arg1 : i32, i32
  }
}

module attributes {stable_mosaic.version = 11 : i64} {
  func.func @_flash_attn_kernel(%arg0: i32, %arg1: i32, %arg2: i32, %arg3: memref<1x16x32xbf16, #tpu.memory_space<vmem>>, %arg4: memref<1x16x32xbf16, #tpu.memory_space<vmem>>, %arg5: memref<1x16x32xbf16, #tpu.memory_space<vmem>>, %arg6: memref<1x16x32xbf16, #tpu.memory_space<vmem>>, %arg7: memref<16x2xf32, #tpu.memory_space<vmem>>, %arg8: memref<16x32xf32, #tpu.memory_space<vmem>>, %arg9: memref<16x32xf32, #tpu.memory_space<vmem>>) attributes {dimension_semantics = [#tpu.dimension_semantics<parallel>, #tpu.dimension_semantics<parallel>, #tpu.dimension_semantics<arbitrary>], iteration_bounds = array<i64: 2, 1, 1>, scalar_prefetch = 0 : i64, scratch_operands = 3 : i64, tpu.core_type = #tpu.core_type<tc>, window_params = [{transform_indices = @transform_0, window_bounds = array<i64: 1, 16, 32>}, {transform_indices = @transform_1, window_bounds = array<i64: 1, 16, 32>}, {transform_indices = @transform_2, window_bounds = array<i64: 1, 16, 32>}, {transform_indices = @transform_3, window_bounds = array<i64: 1, 16, 32>}]} {
    %c0_i32 = arith.constant 0 : i32
    %0 = arith.cmpi eq, %arg2, %c0_i32 : i32
    %1 = arith.extui %0 : i1 to i32
    %c0_i32_0 = arith.constant 0 : i32
    %2 = arith.cmpi ne, %1, %c0_i32_0 : i32
    scf.if %2 {
      %cst_40 = arith.constant 0xFF800000 : f32
      %70 = vector.broadcast %cst_40 : f32 to vector<16x2xf32>
      %c0_41 = arith.constant 0 : index
      %c0_42 = arith.constant 0 : index
      %71 = vector.load %arg7[%c0_41, %c0_42] : memref<16x2xf32, #tpu.memory_space<vmem>>, vector<16x2xf32>
      tpu.vector_store %arg7[%c0_41, %c0_42], %70 {strides = array<i32>} : memref<16x2xf32, #tpu.memory_space<vmem>>, vector<16x2xf32>,
      %cst_43 = arith.constant 0.000000e+00 : f32
      %72 = vector.broadcast %cst_43 : f32 to vector<16x32xf32>
      %c0_44 = arith.constant 0 : index
      %c0_45 = arith.constant 0 : index
      %73 = vector.load %arg8[%c0_44, %c0_45] : memref<16x32xf32, #tpu.memory_space<vmem>>, vector<16x32xf32>
      tpu.vector_store %arg8[%c0_44, %c0_45], %72 {strides = array<i32>} : memref<16x32xf32, #tpu.memory_space<vmem>>, vector<16x32xf32>,
      %cst_46 = arith.constant 0.000000e+00 : f32
      %74 = vector.broadcast %cst_46 : f32 to vector<16x32xf32>
      %c0_47 = arith.constant 0 : index
      %c0_48 = arith.constant 0 : index
      %75 = vector.load %arg9[%c0_47, %c0_48] : memref<16x32xf32, #tpu.memory_space<vmem>>, vector<16x32xf32>
      tpu.vector_store %arg9[%c0_47, %c0_48], %74 {strides = array<i32>} : memref<16x32xf32, #tpu.memory_space<vmem>>, vector<16x32xf32>,
    } else {
    }
    %c0 = arith.constant 0 : index
    %c0_1 = arith.constant 0 : index
    %c0_2 = arith.constant 0 : index
    %3 = vector.load %arg3[%c0, %c0_1, %c0_2] : memref<1x16x32xbf16, #tpu.memory_space<vmem>>, vector<1x16x32xbf16>
    %4 = vector.shape_cast %3 : vector<1x16x32xbf16> to vector<16x32xbf16>
    %c0_3 = arith.constant 0 : index
    %c0_4 = arith.constant 0 : index
    %c0_5 = arith.constant 0 : index
    %5 = vector.load %arg4[%c0_3, %c0_4, %c0_5] : memref<1x16x32xbf16, #tpu.memory_space<vmem>>, vector<1x16x32xbf16>
    %6 = vector.shape_cast %5 : vector<1x16x32xbf16> to vector<16x32xbf16>
    %c0_6 = arith.constant 0 : index
    %c0_7 = arith.constant 0 : index
    %c0_8 = arith.constant 0 : index
    %7 = vector.load %arg5[%c0_6, %c0_7, %c0_8] : memref<1x16x32xbf16, #tpu.memory_space<vmem>>, vector<1x16x32xbf16>
    %8 = vector.shape_cast %7 : vector<1x16x32xbf16> to vector<16x32xbf16>
    %9 = vector.extract_strided_slice %4 {offsets = [0, 0], sizes = [16, 16], strides = [1, 1]} : vector<16x32xbf16> to vector<16x16xbf16>
    %10 = vector.extract_strided_slice %6 {offsets = [0, 0], sizes = [16, 16], strides = [1, 1]} : vector<16x32xbf16> to vector<16x16xbf16>
    %11 = vector.extract_strided_slice %8 {offsets = [0, 0], sizes = [16, 16], strides = [1, 1]} : vector<16x32xbf16> to vector<16x16xbf16>
    "tpu.trace_start"() <{level = 10 : i32, message = "qd,kd->qk"}> : () -> ()
    %cst = arith.constant dense<0.000000e+00> : vector<16x16xf32>
    %12 = tpu.matmul %9, %10, %cst {dimension_numbers = #tpu.dot_dimension_numbers<[1], [1], [0], [0], [0, 0, 1, 0], [], []>} : vector<16x16xbf16>, vector<16x16xbf16>, vector<16x16xf32> -> vector<16x16xf32>
    "tpu.trace_stop"() : () -> ()
    %c0_9 = arith.constant 0 : index
    %c0_10 = arith.constant 0 : index
    %13 = vector.load %arg7[%c0_9, %c0_10] : memref<16x2xf32, #tpu.memory_space<vmem>>, vector<16x1xf32>
    %cst_11 = arith.constant dense<0xFF800000> : vector<16xf32>
    %14 = vector.multi_reduction <maximumf>, %12, %cst_11 [1] : vector<16x16xf32> to vector<16xf32>
    %15 = vector.shape_cast %14 : vector<16xf32> to vector<16x1xf32>
    %16 = arith.maximumf %13, %15 : vector<16x1xf32>
    %17 = arith.subf %13, %16 : vector<16x1xf32>
    %18 = math.exp %17 : vector<16x1xf32>
    %19 = vector.broadcast %16 : vector<16x1xf32> to vector<16x16xf32>
    %20 = arith.subf %12, %19 : vector<16x16xf32>
    %21 = math.exp %20 : vector<16x16xf32>
    %c0_12 = arith.constant 0 : index
    %c0_13 = arith.constant 0 : index
    %22 = vector.load %arg8[%c0_12, %c0_13] : memref<16x32xf32, #tpu.memory_space<vmem>>, vector<16x16xf32>
    %23 = vector.broadcast %18 : vector<16x1xf32> to vector<16x16xf32>
    %24 = arith.mulf %23, %22 : vector<16x16xf32>
    %cst_14 = arith.constant dense<0.000000e+00> : vector<16xf32>
    %25 = vector.multi_reduction <add>, %21, %cst_14 [1] : vector<16x16xf32> to vector<16xf32>
    %26 = vector.shape_cast %25 : vector<16xf32> to vector<16x1xf32>
    %27 = vector.broadcast %26 : vector<16x1xf32> to vector<16x16xf32>
    %28 = arith.addf %24, %27 : vector<16x16xf32>
    %c0_15 = arith.constant 0 : index
    %c0_16 = arith.constant 0 : index
    %29 = vector.load %arg8[%c0_15, %c0_16] : memref<16x32xf32, #tpu.memory_space<vmem>>, vector<16x16xf32>
    tpu.vector_store %arg8[%c0_15, %c0_16], %28 {strides = array<i32>} : memref<16x32xf32, #tpu.memory_space<vmem>>, vector<16x16xf32>,
    %c0_17 = arith.constant 0 : index
    %c0_18 = arith.constant 0 : index
    %30 = vector.load %arg9[%c0_17, %c0_18] : memref<16x32xf32, #tpu.memory_space<vmem>>, vector<16x16xf32>
    %31 = vector.broadcast %18 : vector<16x1xf32> to vector<16x16xf32>
    %32 = arith.mulf %31, %30 : vector<16x16xf32>
    %33 = arith.truncf %21 : vector<16x16xf32> to vector<16x16xbf16>
    "tpu.trace_start"() <{level = 10 : i32, message = "qk,kd->qd"}> : () -> ()
    %cst_19 = arith.constant dense<0.000000e+00> : vector<16x16xf32>
    %34 = tpu.matmul %33, %11, %cst_19 {dimension_numbers = #tpu.dot_dimension_numbers<[1], [0], [0], [1], [0, 0, 1, 1], [], []>} : vector<16x16xbf16>, vector<16x16xbf16>, vector<16x16xf32> -> vector<16x16xf32>
    "tpu.trace_stop"() : () -> ()
    %35 = arith.addf %32, %34 : vector<16x16xf32>
    %c0_20 = arith.constant 0 : index
    %c0_21 = arith.constant 0 : index
    %36 = vector.load %arg9[%c0_20, %c0_21] : memref<16x32xf32, #tpu.memory_space<vmem>>, vector<16x16xf32>
    tpu.vector_store %arg9[%c0_20, %c0_21], %35 {strides = array<i32>} : memref<16x32xf32, #tpu.memory_space<vmem>>, vector<16x16xf32>,
    %c0_22 = arith.constant 0 : index
    %c0_23 = arith.constant 0 : index
    %37 = vector.load %arg7[%c0_22, %c0_23] : memref<16x2xf32, #tpu.memory_space<vmem>>, vector<16x1xf32>
    tpu.vector_store %arg7[%c0_22, %c0_23], %16 {strides = array<i32>} : memref<16x2xf32, #tpu.memory_space<vmem>>, vector<16x1xf32>,
    %38 = vector.extract_strided_slice %4 {offsets = [0, 16], sizes = [16, 16], strides = [1, 1]} : vector<16x32xbf16> to vector<16x16xbf16>
    %39 = vector.extract_strided_slice %6 {offsets = [0, 16], sizes = [16, 16], strides = [1, 1]} : vector<16x32xbf16> to vector<16x16xbf16>
    %40 = vector.extract_strided_slice %8 {offsets = [0, 16], sizes = [16, 16], strides = [1, 1]} : vector<16x32xbf16> to vector<16x16xbf16>
    "tpu.trace_start"() <{level = 10 : i32, message = "qd,kd->qk"}> : () -> ()
    %cst_24 = arith.constant dense<0.000000e+00> : vector<16x16xf32>
    %41 = tpu.matmul %38, %39, %cst_24 {dimension_numbers = #tpu.dot_dimension_numbers<[1], [1], [0], [0], [0, 0, 1, 0], [], []>} : vector<16x16xbf16>, vector<16x16xbf16>, vector<16x16xf32> -> vector<16x16xf32>
    "tpu.trace_stop"() : () -> ()
    %c0_25 = arith.constant 0 : index
    %c1 = arith.constant 1 : index
    %42 = vector.load %arg7[%c0_25, %c1] : memref<16x2xf32, #tpu.memory_space<vmem>>, vector<16x1xf32>
    %cst_26 = arith.constant dense<0xFF800000> : vector<16xf32>
    %43 = vector.multi_reduction <maximumf>, %41, %cst_26 [1] : vector<16x16xf32> to vector<16xf32>
    %44 = vector.shape_cast %43 : vector<16xf32> to vector<16x1xf32>
    %45 = arith.maximumf %42, %44 : vector<16x1xf32>
    %46 = arith.subf %42, %45 : vector<16x1xf32>
    %47 = math.exp %46 : vector<16x1xf32>
    %48 = vector.broadcast %45 : vector<16x1xf32> to vector<16x16xf32>
    %49 = arith.subf %41, %48 : vector<16x16xf32>
    %50 = math.exp %49 : vector<16x16xf32>
    %c0_27 = arith.constant 0 : index
    %c16 = arith.constant 16 : index
    %51 = vector.load %arg8[%c0_27, %c16] : memref<16x32xf32, #tpu.memory_space<vmem>>, vector<16x16xf32>
    %52 = vector.broadcast %47 : vector<16x1xf32> to vector<16x16xf32>
    %53 = arith.mulf %52, %51 : vector<16x16xf32>
    %cst_28 = arith.constant dense<0.000000e+00> : vector<16xf32>
    %54 = vector.multi_reduction <add>, %50, %cst_28 [1] : vector<16x16xf32> to vector<16xf32>
    %55 = vector.shape_cast %54 : vector<16xf32> to vector<16x1xf32>
    %56 = vector.broadcast %55 : vector<16x1xf32> to vector<16x16xf32>
    %57 = arith.addf %53, %56 : vector<16x16xf32>
    %c0_29 = arith.constant 0 : index
    %c16_30 = arith.constant 16 : index
    %58 = vector.load %arg8[%c0_29, %c16_30] : memref<16x32xf32, #tpu.memory_space<vmem>>, vector<16x16xf32>
    tpu.vector_store %arg8[%c0_29, %c16_30], %57 {strides = array<i32>} : memref<16x32xf32, #tpu.memory_space<vmem>>, vector<16x16xf32>,
    %c0_31 = arith.constant 0 : index
    %c16_32 = arith.constant 16 : index
    %59 = vector.load %arg9[%c0_31, %c16_32] : memref<16x32xf32, #tpu.memory_space<vmem>>, vector<16x16xf32>
    %60 = vector.broadcast %47 : vector<16x1xf32> to vector<16x16xf32>
    %61 = arith.mulf %60, %59 : vector<16x16xf32>
    %62 = arith.truncf %50 : vector<16x16xf32> to vector<16x16xbf16>
    "tpu.trace_start"() <{level = 10 : i32, message = "qk,kd->qd"}> : () -> ()
    %cst_33 = arith.constant dense<0.000000e+00> : vector<16x16xf32>
    %63 = tpu.matmul %62, %40, %cst_33 {dimension_numbers = #tpu.dot_dimension_numbers<[1], [0], [0], [1], [0, 0, 1, 1], [], []>} : vector<16x16xbf16>, vector<16x16xbf16>, vector<16x16xf32> -> vector<16x16xf32>
    "tpu.trace_stop"() : () -> ()
    %64 = arith.addf %61, %63 : vector<16x16xf32>
    %c0_34 = arith.constant 0 : index
    %c16_35 = arith.constant 16 : index
    %65 = vector.load %arg9[%c0_34, %c16_35] : memref<16x32xf32, #tpu.memory_space<vmem>>, vector<16x16xf32>
    tpu.vector_store %arg9[%c0_34, %c16_35], %64 {strides = array<i32>} : memref<16x32xf32, #tpu.memory_space<vmem>>, vector<16x16xf32>,
    %c0_36 = arith.constant 0 : index
    %c1_37 = arith.constant 1 : index
    %66 = vector.load %arg7[%c0_36, %c1_37] : memref<16x2xf32, #tpu.memory_space<vmem>>, vector<16x1xf32>
    tpu.vector_store %arg7[%c0_36, %c1_37], %45 {strides = array<i32>} : memref<16x2xf32, #tpu.memory_space<vmem>>, vector<16x1xf32>,
    %c0_i32_38 = arith.constant 0 : i32
    %67 = arith.cmpi eq, %arg2, %c0_i32_38 : i32
    %68 = arith.extui %67 : i1 to i32
    %c0_i32_39 = arith.constant 0 : i32
    %69 = arith.cmpi ne, %68, %c0_i32_39 : i32
    scf.if %69 {
      %c0_40 = arith.constant 0 : index
      %c0_41 = arith.constant 0 : index
      %70 = vector.load %arg9[%c0_40, %c0_41] : memref<16x32xf32, #tpu.memory_space<vmem>>, vector<16x32xf32>
      %c0_42 = arith.constant 0 : index
      %c0_43 = arith.constant 0 : index
      %71 = vector.load %arg8[%c0_42, %c0_43] : memref<16x32xf32, #tpu.memory_space<vmem>>, vector<16x32xf32>
      %72 = tpu.reciprocal %71 {approx = true} : vector<16x32xf32> -> vector<16x32xf32>
      %73 = arith.mulf %70, %72 : vector<16x32xf32>
      %74 = arith.truncf %73 : vector<16x32xf32> to vector<16x32xbf16>
      %c0_44 = arith.constant 0 : index
      %c0_45 = arith.constant 0 : index
      %c0_46 = arith.constant 0 : index
      %75 = vector.load %arg6[%c0_44, %c0_45, %c0_46] : memref<1x16x32xbf16, #tpu.memory_space<vmem>>, vector<1x16x32xbf16>
      %76 = vector.shape_cast %75 : vector<1x16x32xbf16> to vector<16x32xbf16>
      %77 = vector.shape_cast %74 : vector<16x32xbf16> to vector<1x16x32xbf16>
      tpu.vector_store %arg6[%c0_44, %c0_45, %c0_46], %77 {strides = array<i32>} : memref<1x16x32xbf16, #tpu.memory_space<vmem>>, vector<1x16x32xbf16>,
    } else {
    }
    return
  }
  func.func @transform_0(%arg0: i32, %arg1: i32, %arg2: i32) -> (i32, i32, i32) {
    %c0_i32 = arith.constant 0 : i32
    %c0_i32_0 = arith.constant 0 : i32
    return %arg0, %arg1, %c0_i32 : i32, i32, i32
  }
  func.func @transform_1(%arg0: i32, %arg1: i32, %arg2: i32) -> (i32, i32, i32) {
    %c0_i32 = arith.constant 0 : i32
    %c0_i32_0 = arith.constant 0 : i32
    return %arg0, %arg2, %c0_i32 : i32, i32, i32
  }
  func.func @transform_2(%arg0: i32, %arg1: i32, %arg2: i32) -> (i32, i32, i32) {
    %c0_i32 = arith.constant 0 : i32
    %c0_i32_0 = arith.constant 0 : i32
    return %arg0, %arg2, %c0_i32 : i32, i32, i32
  }
  func.func @transform_3(%arg0: i32, %arg1: i32, %arg2: i32) -> (i32, i32, i32) {
    %c0_i32 = arith.constant 0 : i32
    %c0_i32_0 = arith.constant 0 : i32
    return %arg0, %arg1, %c0_i32 : i32, i32, i32
  }
}

module attributes {stable_mosaic.version = 11 : i64} {
  func.func @_linear_kernel(%arg0: i32, %arg1: i32, %arg2: i32, %arg3: memref<32x128xbf16, #tpu.memory_space<vmem>>, %arg4: memref<128x128xbf16, #tpu.memory_space<vmem>>, %arg5: memref<1x128xf32, #tpu.memory_space<vmem>>, %arg6: memref<32x128xbf16, #tpu.memory_space<vmem>>, %arg7: memref<32x128xbf16, #tpu.memory_space<vmem>>, %arg8: memref<32x128xf32, #tpu.memory_space<vmem>>) attributes {dimension_semantics = [#tpu.dimension_semantics<parallel>, #tpu.dimension_semantics<parallel>, #tpu.dimension_semantics<arbitrary>], iteration_bounds = array<i64: 1, 1, 1>, scalar_prefetch = 0 : i64, scratch_operands = 1 : i64, tpu.core_type = #tpu.core_type<tc>, window_params = [{transform_indices = @transform_0, window_bounds = array<i64: 32, 128>}, {transform_indices = @transform_1, window_bounds = array<i64: 128, 128>}, {transform_indices = @transform_2, window_bounds = array<i64: 1, 128>}, {transform_indices = @transform_3, window_bounds = array<i64: 32, 128>}, {transform_indices = @transform_4, window_bounds = array<i64: 32, 128>}]} {
    %c0_i32 = arith.constant 0 : i32
    %0 = arith.cmpi eq, %arg2, %c0_i32 : i32
    %1 = arith.extui %0 : i1 to i32
    %c0_i32_0 = arith.constant 0 : i32
    %2 = arith.cmpi ne, %1, %c0_i32_0 : i32
    scf.if %2 {
      %cst_10 = arith.constant 0.000000e+00 : f32
      %12 = vector.broadcast %cst_10 : f32 to vector<32x128xf32>
      %c0_11 = arith.constant 0 : index
      %c0_12 = arith.constant 0 : index
      %13 = vector.load %arg8[%c0_11, %c0_12] : memref<32x128xf32, #tpu.memory_space<vmem>>, vector<32x128xf32>
      tpu.vector_store %arg8[%c0_11, %c0_12], %12 {strides = array<i32>} : memref<32x128xf32, #tpu.memory_space<vmem>>, vector<32x128xf32>,
    } else {
    }
    %c0 = arith.constant 0 : index
    %c0_1 = arith.constant 0 : index
    %3 = vector.load %arg8[%c0, %c0_1] : memref<32x128xf32, #tpu.memory_space<vmem>>, vector<32x128xf32>
    %c0_2 = arith.constant 0 : index
    %c0_3 = arith.constant 0 : index
    %4 = vector.load %arg3[%c0_2, %c0_3] : memref<32x128xbf16, #tpu.memory_space<vmem>>, vector<32x128xbf16>
    %c0_4 = arith.constant 0 : index
    %c0_5 = arith.constant 0 : index
    %5 = vector.load %arg4[%c0_4, %c0_5] : memref<128x128xbf16, #tpu.memory_space<vmem>>, vector<128x128xbf16>
    %cst = arith.constant dense<0.000000e+00> : vector<32x128xf32>
    %6 = tpu.matmul %4, %5, %cst {dimension_numbers = #tpu.dot_dimension_numbers<[1], [0], [0], [1], [0, 0, 1, 1], [], []>} : vector<32x128xbf16>, vector<128x128xbf16>, vector<32x128xf32> -> vector<32x128xf32>
    %7 = arith.addf %3, %6 : vector<32x128xf32>
    %c0_6 = arith.constant 0 : index
    %c0_7 = arith.constant 0 : index
    %8 = vector.load %arg8[%c0_6, %c0_7] : memref<32x128xf32, #tpu.memory_space<vmem>>, vector<32x128xf32>
    tpu.vector_store %arg8[%c0_6, %c0_7], %7 {strides = array<i32>} : memref<32x128xf32, #tpu.memory_space<vmem>>, vector<32x128xf32>,
    %c0_i32_8 = arith.constant 0 : i32
    %9 = arith.cmpi eq, %arg2, %c0_i32_8 : i32
    %10 = arith.extui %9 : i1 to i32
    %c0_i32_9 = arith.constant 0 : i32
    %11 = arith.cmpi ne, %10, %c0_i32_9 : i32
    scf.if %11 {
      %c0_10 = arith.constant 0 : index
      %c0_11 = arith.constant 0 : index
      %12 = vector.load %arg8[%c0_10, %c0_11] : memref<32x128xf32, #tpu.memory_space<vmem>>, vector<32x128xf32>
      %c0_12 = arith.constant 0 : index
      %c0_13 = arith.constant 0 : index
      %13 = vector.load %arg5[%c0_12, %c0_13] : memref<1x128xf32, #tpu.memory_space<vmem>>, vector<1x128xf32>
      %14 = vector.broadcast %13 : vector<1x128xf32> to vector<32x128xf32>
      %15 = arith.addf %12, %14 : vector<32x128xf32>
      %c0_14 = arith.constant 0 : index
      %c0_15 = arith.constant 0 : index
      %16 = vector.load %arg6[%c0_14, %c0_15] : memref<32x128xbf16, #tpu.memory_space<vmem>>, vector<32x128xbf16>
      %17 = arith.extf %16 : vector<32x128xbf16> to vector<32x128xf32>
      %18 = arith.addf %15, %17 : vector<32x128xf32>
      %19 = arith.truncf %18 : vector<32x128xf32> to vector<32x128xbf16>
      %c0_16 = arith.constant 0 : index
      %c0_17 = arith.constant 0 : index
      %20 = vector.load %arg7[%c0_16, %c0_17] : memref<32x128xbf16, #tpu.memory_space<vmem>>, vector<32x128xbf16>
      tpu.vector_store %arg7[%c0_16, %c0_17], %19 {strides = array<i32>} : memref<32x128xbf16, #tpu.memory_space<vmem>>, vector<32x128xbf16>,
    } else {
    }
    return
  }
  func.func @transform_0(%arg0: i32, %arg1: i32, %arg2: i32) -> (i32, i32) {
    %c0_i32 = arith.constant 0 : i32
    return %arg0, %arg2 : i32, i32
  }
  func.func @transform_1(%arg0: i32, %arg1: i32, %arg2: i32) -> (i32, i32) {
    %c0_i32 = arith.constant 0 : i32
    return %arg2, %arg1 : i32, i32
  }
  func.func @transform_2(%arg0: i32, %arg1: i32, %arg2: i32) -> (i32, i32) {
    %c0_i32 = arith.constant 0 : i32
    %c0_i32_0 = arith.constant 0 : i32
    return %c0_i32, %arg1 : i32, i32
  }
  func.func @transform_3(%arg0: i32, %arg1: i32, %arg2: i32) -> (i32, i32) {
    %c0_i32 = arith.constant 0 : i32
    return %arg0, %arg1 : i32, i32
  }
  func.func @transform_4(%arg0: i32, %arg1: i32, %arg2: i32) -> (i32, i32) {
    %c0_i32 = arith.constant 0 : i32
    return %arg0, %arg1 : i32, i32
  }
}

module attributes {stable_mosaic.version = 11 : i64} {
  func.func @_linear_kernel(%arg0: i32, %arg1: i32, %arg2: i32, %arg3: memref<16x128xbf16, #tpu.memory_space<vmem>>, %arg4: memref<128x128xbf16, #tpu.memory_space<vmem>>, %arg5: memref<1x128xf32, #tpu.memory_space<vmem>>, %arg6: memref<16x128xbf16, #tpu.memory_space<vmem>>, %arg7: memref<16x128xf32, #tpu.memory_space<vmem>>) attributes {dimension_semantics = [#tpu.dimension_semantics<parallel>, #tpu.dimension_semantics<parallel>, #tpu.dimension_semantics<arbitrary>], iteration_bounds = array<i64: 1, 1, 1>, scalar_prefetch = 0 : i64, scratch_operands = 1 : i64, tpu.core_type = #tpu.core_type<tc>, window_params = [{transform_indices = @transform_0, window_bounds = array<i64: 16, 128>}, {transform_indices = @transform_1, window_bounds = array<i64: 128, 128>}, {transform_indices = @transform_2, window_bounds = array<i64: 1, 128>}, {transform_indices = @transform_3, window_bounds = array<i64: 16, 128>}]} {
    %c0_i32 = arith.constant 0 : i32
    %0 = arith.cmpi eq, %arg2, %c0_i32 : i32
    %1 = arith.extui %0 : i1 to i32
    %c0_i32_0 = arith.constant 0 : i32
    %2 = arith.cmpi ne, %1, %c0_i32_0 : i32
    scf.if %2 {
      %cst_10 = arith.constant 0.000000e+00 : f32
      %12 = vector.broadcast %cst_10 : f32 to vector<16x128xf32>
      %c0_11 = arith.constant 0 : index
      %c0_12 = arith.constant 0 : index
      %13 = vector.load %arg7[%c0_11, %c0_12] : memref<16x128xf32, #tpu.memory_space<vmem>>, vector<16x128xf32>
      tpu.vector_store %arg7[%c0_11, %c0_12], %12 {strides = array<i32>} : memref<16x128xf32, #tpu.memory_space<vmem>>, vector<16x128xf32>,
    } else {
    }
    %c0 = arith.constant 0 : index
    %c0_1 = arith.constant 0 : index
    %3 = vector.load %arg7[%c0, %c0_1] : memref<16x128xf32, #tpu.memory_space<vmem>>, vector<16x128xf32>
    %c0_2 = arith.constant 0 : index
    %c0_3 = arith.constant 0 : index
    %4 = vector.load %arg3[%c0_2, %c0_3] : memref<16x128xbf16, #tpu.memory_space<vmem>>, vector<16x128xbf16>
    %c0_4 = arith.constant 0 : index
    %c0_5 = arith.constant 0 : index
    %5 = vector.load %arg4[%c0_4, %c0_5] : memref<128x128xbf16, #tpu.memory_space<vmem>>, vector<128x128xbf16>
    %cst = arith.constant dense<0.000000e+00> : vector<16x128xf32>
    %6 = tpu.matmul %4, %5, %cst {dimension_numbers = #tpu.dot_dimension_numbers<[1], [0], [0], [1], [0, 0, 1, 1], [], []>} : vector<16x128xbf16>, vector<128x128xbf16>, vector<16x128xf32> -> vector<16x128xf32>
    %7 = arith.addf %3, %6 : vector<16x128xf32>
    %c0_6 = arith.constant 0 : index
    %c0_7 = arith.constant 0 : index
    %8 = vector.load %arg7[%c0_6, %c0_7] : memref<16x128xf32, #tpu.memory_space<vmem>>, vector<16x128xf32>
    tpu.vector_store %arg7[%c0_6, %c0_7], %7 {strides = array<i32>} : memref<16x128xf32, #tpu.memory_space<vmem>>, vector<16x128xf32>,
    %c0_i32_8 = arith.constant 0 : i32
    %9 = arith.cmpi eq, %arg2, %c0_i32_8 : i32
    %10 = arith.extui %9 : i1 to i32
    %c0_i32_9 = arith.constant 0 : i32
    %11 = arith.cmpi ne, %10, %c0_i32_9 : i32
    scf.if %11 {
      %c0_10 = arith.constant 0 : index
      %c0_11 = arith.constant 0 : index
      %12 = vector.load %arg7[%c0_10, %c0_11] : memref<16x128xf32, #tpu.memory_space<vmem>>, vector<16x128xf32>
      %c0_12 = arith.constant 0 : index
      %c0_13 = arith.constant 0 : index
      %13 = vector.load %arg5[%c0_12, %c0_13] : memref<1x128xf32, #tpu.memory_space<vmem>>, vector<1x128xf32>
      %14 = vector.broadcast %13 : vector<1x128xf32> to vector<16x128xf32>
      %15 = arith.addf %12, %14 : vector<16x128xf32>
      %16 = arith.truncf %15 : vector<16x128xf32> to vector<16x128xbf16>
      %c0_14 = arith.constant 0 : index
      %c0_15 = arith.constant 0 : index
      %17 = vector.load %arg6[%c0_14, %c0_15] : memref<16x128xbf16, #tpu.memory_space<vmem>>, vector<16x128xbf16>
      tpu.vector_store %arg6[%c0_14, %c0_15], %16 {strides = array<i32>} : memref<16x128xbf16, #tpu.memory_space<vmem>>, vector<16x128xbf16>,
    } else {
    }
    return
  }
  func.func @transform_0(%arg0: i32, %arg1: i32, %arg2: i32) -> (i32, i32) {
    %c0_i32 = arith.constant 0 : i32
    return %arg0, %arg2 : i32, i32
  }
  func.func @transform_1(%arg0: i32, %arg1: i32, %arg2: i32) -> (i32, i32) {
    %c0_i32 = arith.constant 0 : i32
    return %arg2, %arg1 : i32, i32
  }
  func.func @transform_2(%arg0: i32, %arg1: i32, %arg2: i32) -> (i32, i32) {
    %c0_i32 = arith.constant 0 : i32
    %c0_i32_0 = arith.constant 0 : i32
    return %c0_i32, %arg1 : i32, i32
  }
  func.func @transform_3(%arg0: i32, %arg1: i32, %arg2: i32) -> (i32, i32) {
    %c0_i32 = arith.constant 0 : i32
    return %arg0, %arg1 : i32, i32
  }
}

module attributes {stable_mosaic.version = 11 : i64} {
  func.func @_flash_attn_kernel(%arg0: i32, %arg1: i32, %arg2: i32, %arg3: memref<1x16x32xbf16, #tpu.memory_space<vmem>>, %arg4: memref<1x8x32xbf16, #tpu.memory_space<vmem>>, %arg5: memref<1x8x32xbf16, #tpu.memory_space<vmem>>, %arg6: memref<1x16x32xbf16, #tpu.memory_space<vmem>>, %arg7: memref<16x2xf32, #tpu.memory_space<vmem>>, %arg8: memref<16x32xf32, #tpu.memory_space<vmem>>, %arg9: memref<16x32xf32, #tpu.memory_space<vmem>>) attributes {dimension_semantics = [#tpu.dimension_semantics<parallel>, #tpu.dimension_semantics<parallel>, #tpu.dimension_semantics<arbitrary>], iteration_bounds = array<i64: 2, 1, 1>, scalar_prefetch = 0 : i64, scratch_operands = 3 : i64, tpu.core_type = #tpu.core_type<tc>, window_params = [{transform_indices = @transform_0, window_bounds = array<i64: 1, 16, 32>}, {transform_indices = @transform_1, window_bounds = array<i64: 1, 8, 32>}, {transform_indices = @transform_2, window_bounds = array<i64: 1, 8, 32>}, {transform_indices = @transform_3, window_bounds = array<i64: 1, 16, 32>}]} {
    %c0_i32 = arith.constant 0 : i32
    %0 = arith.cmpi eq, %arg2, %c0_i32 : i32
    %1 = arith.extui %0 : i1 to i32
    %c0_i32_0 = arith.constant 0 : i32
    %2 = arith.cmpi ne, %1, %c0_i32_0 : i32
    scf.if %2 {
      %cst_40 = arith.constant 0xFF800000 : f32
      %70 = vector.broadcast %cst_40 : f32 to vector<16x2xf32>
      %c0_41 = arith.constant 0 : index
      %c0_42 = arith.constant 0 : index
      %71 = vector.load %arg7[%c0_41, %c0_42] : memref<16x2xf32, #tpu.memory_space<vmem>>, vector<16x2xf32>
      tpu.vector_store %arg7[%c0_41, %c0_42], %70 {strides = array<i32>} : memref<16x2xf32, #tpu.memory_space<vmem>>, vector<16x2xf32>,
      %cst_43 = arith.constant 0.000000e+00 : f32
      %72 = vector.broadcast %cst_43 : f32 to vector<16x32xf32>
      %c0_44 = arith.constant 0 : index
      %c0_45 = arith.constant 0 : index
      %73 = vector.load %arg8[%c0_44, %c0_45] : memref<16x32xf32, #tpu.memory_space<vmem>>, vector<16x32xf32>
      tpu.vector_store %arg8[%c0_44, %c0_45], %72 {strides = array<i32>} : memref<16x32xf32, #tpu.memory_space<vmem>>, vector<16x32xf32>,
      %cst_46 = arith.constant 0.000000e+00 : f32
      %74 = vector.broadcast %cst_46 : f32 to vector<16x32xf32>
      %c0_47 = arith.constant 0 : index
      %c0_48 = arith.constant 0 : index
      %75 = vector.load %arg9[%c0_47, %c0_48] : memref<16x32xf32, #tpu.memory_space<vmem>>, vector<16x32xf32>
      tpu.vector_store %arg9[%c0_47, %c0_48], %74 {strides = array<i32>} : memref<16x32xf32, #tpu.memory_space<vmem>>, vector<16x32xf32>,
    } else {
    }
    %c0 = arith.constant 0 : index
    %c0_1 = arith.constant 0 : index
    %c0_2 = arith.constant 0 : index
    %3 = vector.load %arg3[%c0, %c0_1, %c0_2] : memref<1x16x32xbf16, #tpu.memory_space<vmem>>, vector<1x16x32xbf16>
    %4 = vector.shape_cast %3 : vector<1x16x32xbf16> to vector<16x32xbf16>
    %c0_3 = arith.constant 0 : index
    %c0_4 = arith.constant 0 : index
    %c0_5 = arith.constant 0 : index
    %5 = vector.load %arg4[%c0_3, %c0_4, %c0_5] : memref<1x8x32xbf16, #tpu.memory_space<vmem>>, vector<1x8x32xbf16>
    %6 = vector.shape_cast %5 : vector<1x8x32xbf16> to vector<8x32xbf16>
    %c0_6 = arith.constant 0 : index
    %c0_7 = arith.constant 0 : index
    %c0_8 = arith.constant 0 : index
    %7 = vector.load %arg5[%c0_6, %c0_7, %c0_8] : memref<1x8x32xbf16, #tpu.memory_space<vmem>>, vector<1x8x32xbf16>
    %8 = vector.shape_cast %7 : vector<1x8x32xbf16> to vector<8x32xbf16>
    %9 = vector.extract_strided_slice %4 {offsets = [0, 0], sizes = [16, 16], strides = [1, 1]} : vector<16x32xbf16> to vector<16x16xbf16>
    %10 = vector.extract_strided_slice %6 {offsets = [0, 0], sizes = [8, 16], strides = [1, 1]} : vector<8x32xbf16> to vector<8x16xbf16>
    %11 = vector.extract_strided_slice %8 {offsets = [0, 0], sizes = [8, 16], strides = [1, 1]} : vector<8x32xbf16> to vector<8x16xbf16>
    "tpu.trace_start"() <{level = 10 : i32, message = "qd,kd->qk"}> : () -> ()
    %cst = arith.constant dense<0.000000e+00> : vector<16x8xf32>
    %12 = tpu.matmul %9, %10, %cst {dimension_numbers = #tpu.dot_dimension_numbers<[1], [1], [0], [0], [0, 0, 1, 0], [], []>} : vector<16x16xbf16>, vector<8x16xbf16>, vector<16x8xf32> -> vector<16x8xf32>
    "tpu.trace_stop"() : () -> ()
    %c0_9 = arith.constant 0 : index
    %c0_10 = arith.constant 0 : index
    %13 = vector.load %arg7[%c0_9, %c0_10] : memref<16x2xf32, #tpu.memory_space<vmem>>, vector<16x1xf32>
    %cst_11 = arith.constant dense<0xFF800000> : vector<16xf32>
    %14 = vector.multi_reduction <maximumf>, %12, %cst_11 [1] : vector<16x8xf32> to vector<16xf32>
    %15 = vector.shape_cast %14 : vector<16xf32> to vector<16x1xf32>
    %16 = arith.maximumf %13, %15 : vector<16x1xf32>
    %17 = arith.subf %13, %16 : vector<16x1xf32>
    %18 = math.exp %17 : vector<16x1xf32>
    %19 = vector.broadcast %16 : vector<16x1xf32> to vector<16x8xf32>
    %20 = arith.subf %12, %19 : vector<16x8xf32>
    %21 = math.exp %20 : vector<16x8xf32>
    %c0_12 = arith.constant 0 : index
    %c0_13 = arith.constant 0 : index
    %22 = vector.load %arg8[%c0_12, %c0_13] : memref<16x32xf32, #tpu.memory_space<vmem>>, vector<16x16xf32>
    %23 = vector.broadcast %18 : vector<16x1xf32> to vector<16x16xf32>
    %24 = arith.mulf %23, %22 : vector<16x16xf32>
    %cst_14 = arith.constant dense<0.000000e+00> : vector<16xf32>
    %25 = vector.multi_reduction <add>, %21, %cst_14 [1] : vector<16x8xf32> to vector<16xf32>
    %26 = vector.shape_cast %25 : vector<16xf32> to vector<16x1xf32>
    %27 = vector.broadcast %26 : vector<16x1xf32> to vector<16x16xf32>
    %28 = arith.addf %24, %27 : vector<16x16xf32>
    %c0_15 = arith.constant 0 : index
    %c0_16 = arith.constant 0 : index
    %29 = vector.load %arg8[%c0_15, %c0_16] : memref<16x32xf32, #tpu.memory_space<vmem>>, vector<16x16xf32>
    tpu.vector_store %arg8[%c0_15, %c0_16], %28 {strides = array<i32>} : memref<16x32xf32, #tpu.memory_space<vmem>>, vector<16x16xf32>,
    %c0_17 = arith.constant 0 : index
    %c0_18 = arith.constant 0 : index
    %30 = vector.load %arg9[%c0_17, %c0_18] : memref<16x32xf32, #tpu.memory_space<vmem>>, vector<16x16xf32>
    %31 = vector.broadcast %18 : vector<16x1xf32> to vector<16x16xf32>
    %32 = arith.mulf %31, %30 : vector<16x16xf32>
    %33 = arith.truncf %21 : vector<16x8xf32> to vector<16x8xbf16>
    "tpu.trace_start"() <{level = 10 : i32, message = "qk,kd->qd"}> : () -> ()
    %cst_19 = arith.constant dense<0.000000e+00> : vector<16x16xf32>
    %34 = tpu.matmul %33, %11, %cst_19 {dimension_numbers = #tpu.dot_dimension_numbers<[1], [0], [0], [1], [0, 0, 1, 1], [], []>} : vector<16x8xbf16>, vector<8x16xbf16>, vector<16x16xf32> -> vector<16x16xf32>
    "tpu.trace_stop"() : () -> ()
    %35 = arith.addf %32, %34 : vector<16x16xf32>
    %c0_20 = arith.constant 0 : index
    %c0_21 = arith.constant 0 : index
    %36 = vector.load %arg9[%c0_20, %c0_21] : memref<16x32xf32, #tpu.memory_space<vmem>>, vector<16x16xf32>
    tpu.vector_store %arg9[%c0_20, %c0_21], %35 {strides = array<i32>} : memref<16x32xf32, #tpu.memory_space<vmem>>, vector<16x16xf32>,
    %c0_22 = arith.constant 0 : index
    %c0_23 = arith.constant 0 : index
    %37 = vector.load %arg7[%c0_22, %c0_23] : memref<16x2xf32, #tpu.memory_space<vmem>>, vector<16x1xf32>
    tpu.vector_store %arg7[%c0_22, %c0_23], %16 {strides = array<i32>} : memref<16x2xf32, #tpu.memory_space<vmem>>, vector<16x1xf32>,
    %38 = vector.extract_strided_slice %4 {offsets = [0, 16], sizes = [16, 16], strides = [1, 1]} : vector<16x32xbf16> to vector<16x16xbf16>
    %39 = vector.extract_strided_slice %6 {offsets = [0, 16], sizes = [8, 16], strides = [1, 1]} : vector<8x32xbf16> to vector<8x16xbf16>
    %40 = vector.extract_strided_slice %8 {offsets = [0, 16], sizes = [8, 16], strides = [1, 1]} : vector<8x32xbf16> to vector<8x16xbf16>
    "tpu.trace_start"() <{level = 10 : i32, message = "qd,kd->qk"}> : () -> ()
    %cst_24 = arith.constant dense<0.000000e+00> : vector<16x8xf32>
    %41 = tpu.matmul %38, %39, %cst_24 {dimension_numbers = #tpu.dot_dimension_numbers<[1], [1], [0], [0], [0, 0, 1, 0], [], []>} : vector<16x16xbf16>, vector<8x16xbf16>, vector<16x8xf32> -> vector<16x8xf32>
    "tpu.trace_stop"() : () -> ()
    %c0_25 = arith.constant 0 : index
    %c1 = arith.constant 1 : index
    %42 = vector.load %arg7[%c0_25, %c1] : memref<16x2xf32, #tpu.memory_space<vmem>>, vector<16x1xf32>
    %cst_26 = arith.constant dense<0xFF800000> : vector<16xf32>
    %43 = vector.multi_reduction <maximumf>, %41, %cst_26 [1] : vector<16x8xf32> to vector<16xf32>
    %44 = vector.shape_cast %43 : vector<16xf32> to vector<16x1xf32>
    %45 = arith.maximumf %42, %44 : vector<16x1xf32>
    %46 = arith.subf %42, %45 : vector<16x1xf32>
    %47 = math.exp %46 : vector<16x1xf32>
    %48 = vector.broadcast %45 : vector<16x1xf32> to vector<16x8xf32>
    %49 = arith.subf %41, %48 : vector<16x8xf32>
    %50 = math.exp %49 : vector<16x8xf32>
    %c0_27 = arith.constant 0 : index
    %c16 = arith.constant 16 : index
    %51 = vector.load %arg8[%c0_27, %c16] : memref<16x32xf32, #tpu.memory_space<vmem>>, vector<16x16xf32>
    %52 = vector.broadcast %47 : vector<16x1xf32> to vector<16x16xf32>
    %53 = arith.mulf %52, %51 : vector<16x16xf32>
    %cst_28 = arith.constant dense<0.000000e+00> : vector<16xf32>
    %54 = vector.multi_reduction <add>, %50, %cst_28 [1] : vector<16x8xf32> to vector<16xf32>
    %55 = vector.shape_cast %54 : vector<16xf32> to vector<16x1xf32>
    %56 = vector.broadcast %55 : vector<16x1xf32> to vector<16x16xf32>
    %57 = arith.addf %53, %56 : vector<16x16xf32>
    %c0_29 = arith.constant 0 : index
    %c16_30 = arith.constant 16 : index
    %58 = vector.load %arg8[%c0_29, %c16_30] : memref<16x32xf32, #tpu.memory_space<vmem>>, vector<16x16xf32>
    tpu.vector_store %arg8[%c0_29, %c16_30], %57 {strides = array<i32>} : memref<16x32xf32, #tpu.memory_space<vmem>>, vector<16x16xf32>,
    %c0_31 = arith.constant 0 : index
    %c16_32 = arith.constant 16 : index
    %59 = vector.load %arg9[%c0_31, %c16_32] : memref<16x32xf32, #tpu.memory_space<vmem>>, vector<16x16xf32>
    %60 = vector.broadcast %47 : vector<16x1xf32> to vector<16x16xf32>
    %61 = arith.mulf %60, %59 : vector<16x16xf32>
    %62 = arith.truncf %50 : vector<16x8xf32> to vector<16x8xbf16>
    "tpu.trace_start"() <{level = 10 : i32, message = "qk,kd->qd"}> : () -> ()
    %cst_33 = arith.constant dense<0.000000e+00> : vector<16x16xf32>
    %63 = tpu.matmul %62, %40, %cst_33 {dimension_numbers = #tpu.dot_dimension_numbers<[1], [0], [0], [1], [0, 0, 1, 1], [], []>} : vector<16x8xbf16>, vector<8x16xbf16>, vector<16x16xf32> -> vector<16x16xf32>
    "tpu.trace_stop"() : () -> ()
    %64 = arith.addf %61, %63 : vector<16x16xf32>
    %c0_34 = arith.constant 0 : index
    %c16_35 = arith.constant 16 : index
    %65 = vector.load %arg9[%c0_34, %c16_35] : memref<16x32xf32, #tpu.memory_space<vmem>>, vector<16x16xf32>
    tpu.vector_store %arg9[%c0_34, %c16_35], %64 {strides = array<i32>} : memref<16x32xf32, #tpu.memory_space<vmem>>, vector<16x16xf32>,
    %c0_36 = arith.constant 0 : index
    %c1_37 = arith.constant 1 : index
    %66 = vector.load %arg7[%c0_36, %c1_37] : memref<16x2xf32, #tpu.memory_space<vmem>>, vector<16x1xf32>
    tpu.vector_store %arg7[%c0_36, %c1_37], %45 {strides = array<i32>} : memref<16x2xf32, #tpu.memory_space<vmem>>, vector<16x1xf32>,
    %c0_i32_38 = arith.constant 0 : i32
    %67 = arith.cmpi eq, %arg2, %c0_i32_38 : i32
    %68 = arith.extui %67 : i1 to i32
    %c0_i32_39 = arith.constant 0 : i32
    %69 = arith.cmpi ne, %68, %c0_i32_39 : i32
    scf.if %69 {
      %c0_40 = arith.constant 0 : index
      %c0_41 = arith.constant 0 : index
      %70 = vector.load %arg9[%c0_40, %c0_41] : memref<16x32xf32, #tpu.memory_space<vmem>>, vector<16x32xf32>
      %c0_42 = arith.constant 0 : index
      %c0_43 = arith.constant 0 : index
      %71 = vector.load %arg8[%c0_42, %c0_43] : memref<16x32xf32, #tpu.memory_space<vmem>>, vector<16x32xf32>
      %72 = tpu.reciprocal %71 {approx = true} : vector<16x32xf32> -> vector<16x32xf32>
      %73 = arith.mulf %70, %72 : vector<16x32xf32>
      %74 = arith.truncf %73 : vector<16x32xf32> to vector<16x32xbf16>
      %c0_44 = arith.constant 0 : index
      %c0_45 = arith.constant 0 : index
      %c0_46 = arith.constant 0 : index
      %75 = vector.load %arg6[%c0_44, %c0_45, %c0_46] : memref<1x16x32xbf16, #tpu.memory_space<vmem>>, vector<1x16x32xbf16>
      %76 = vector.shape_cast %75 : vector<1x16x32xbf16> to vector<16x32xbf16>
      %77 = vector.shape_cast %74 : vector<16x32xbf16> to vector<1x16x32xbf16>
      tpu.vector_store %arg6[%c0_44, %c0_45, %c0_46], %77 {strides = array<i32>} : memref<1x16x32xbf16, #tpu.memory_space<vmem>>, vector<1x16x32xbf16>,
    } else {
    }
    return
  }
  func.func @transform_0(%arg0: i32, %arg1: i32, %arg2: i32) -> (i32, i32, i32) {
    %c0_i32 = arith.constant 0 : i32
    %c0_i32_0 = arith.constant 0 : i32
    return %arg0, %arg1, %c0_i32 : i32, i32, i32
  }
  func.func @transform_1(%arg0: i32, %arg1: i32, %arg2: i32) -> (i32, i32, i32) {
    %c0_i32 = arith.constant 0 : i32
    %c0_i32_0 = arith.constant 0 : i32
    return %arg0, %arg2, %c0_i32 : i32, i32, i32
  }
  func.func @transform_2(%arg0: i32, %arg1: i32, %arg2: i32) -> (i32, i32, i32) {
    %c0_i32 = arith.constant 0 : i32
    %c0_i32_0 = arith.constant 0 : i32
    return %arg0, %arg2, %c0_i32 : i32, i32, i32
  }
  func.func @transform_3(%arg0: i32, %arg1: i32, %arg2: i32) -> (i32, i32, i32) {
    %c0_i32 = arith.constant 0 : i32
    %c0_i32_0 = arith.constant 0 : i32
    return %arg0, %arg1, %c0_i32 : i32, i32, i32
  }
}

module attributes {stable_mosaic.version = 11 : i64} {
  func.func @_linear_kernel(%arg0: i32, %arg1: i32, %arg2: i32, %arg3: memref<32x128xbf16, #tpu.memory_space<vmem>>, %arg4: memref<128x128xbf16, #tpu.memory_space<vmem>>, %arg5: memref<1x128xf32, #tpu.memory_space<vmem>>, %arg6: memref<32x128xbf16, #tpu.memory_space<vmem>>, %arg7: memref<32x128xf32, #tpu.memory_space<vmem>>) attributes {dimension_semantics = [#tpu.dimension_semantics<parallel>, #tpu.dimension_semantics<parallel>, #tpu.dimension_semantics<arbitrary>], iteration_bounds = array<i64: 1, 1, 1>, scalar_prefetch = 0 : i64, scratch_operands = 1 : i64, tpu.core_type = #tpu.core_type<tc>, window_params = [{transform_indices = @transform_0, window_bounds = array<i64: 32, 128>}, {transform_indices = @transform_1, window_bounds = array<i64: 128, 128>}, {transform_indices = @transform_2, window_bounds = array<i64: 1, 128>}, {transform_indices = @transform_3, window_bounds = array<i64: 32, 128>}]} {
    %c0_i32 = arith.constant 0 : i32
    %0 = arith.cmpi eq, %arg2, %c0_i32 : i32
    %1 = arith.extui %0 : i1 to i32
    %c0_i32_0 = arith.constant 0 : i32
    %2 = arith.cmpi ne, %1, %c0_i32_0 : i32
    scf.if %2 {
      %cst_10 = arith.constant 0.000000e+00 : f32
      %12 = vector.broadcast %cst_10 : f32 to vector<32x128xf32>
      %c0_11 = arith.constant 0 : index
      %c0_12 = arith.constant 0 : index
      %13 = vector.load %arg7[%c0_11, %c0_12] : memref<32x128xf32, #tpu.memory_space<vmem>>, vector<32x128xf32>
      tpu.vector_store %arg7[%c0_11, %c0_12], %12 {strides = array<i32>} : memref<32x128xf32, #tpu.memory_space<vmem>>, vector<32x128xf32>,
    } else {
    }
    %c0 = arith.constant 0 : index
    %c0_1 = arith.constant 0 : index
    %3 = vector.load %arg7[%c0, %c0_1] : memref<32x128xf32, #tpu.memory_space<vmem>>, vector<32x128xf32>
    %c0_2 = arith.constant 0 : index
    %c0_3 = arith.constant 0 : index
    %4 = vector.load %arg3[%c0_2, %c0_3] : memref<32x128xbf16, #tpu.memory_space<vmem>>, vector<32x128xbf16>
    %c0_4 = arith.constant 0 : index
    %c0_5 = arith.constant 0 : index
    %5 = vector.load %arg4[%c0_4, %c0_5] : memref<128x128xbf16, #tpu.memory_space<vmem>>, vector<128x128xbf16>
    %cst = arith.constant dense<0.000000e+00> : vector<32x128xf32>
    %6 = tpu.matmul %4, %5, %cst {dimension_numbers = #tpu.dot_dimension_numbers<[1], [0], [0], [1], [0, 0, 1, 1], [], []>} : vector<32x128xbf16>, vector<128x128xbf16>, vector<32x128xf32> -> vector<32x128xf32>
    %7 = arith.addf %3, %6 : vector<32x128xf32>
    %c0_6 = arith.constant 0 : index
    %c0_7 = arith.constant 0 : index
    %8 = vector.load %arg7[%c0_6, %c0_7] : memref<32x128xf32, #tpu.memory_space<vmem>>, vector<32x128xf32>
    tpu.vector_store %arg7[%c0_6, %c0_7], %7 {strides = array<i32>} : memref<32x128xf32, #tpu.memory_space<vmem>>, vector<32x128xf32>,
    %c0_i32_8 = arith.constant 0 : i32
    %9 = arith.cmpi eq, %arg2, %c0_i32_8 : i32
    %10 = arith.extui %9 : i1 to i32
    %c0_i32_9 = arith.constant 0 : i32
    %11 = arith.cmpi ne, %10, %c0_i32_9 : i32
    scf.if %11 {
      %c0_10 = arith.constant 0 : index
      %c0_11 = arith.constant 0 : index
      %12 = vector.load %arg7[%c0_10, %c0_11] : memref<32x128xf32, #tpu.memory_space<vmem>>, vector<32x128xf32>
      %c0_12 = arith.constant 0 : index
      %c0_13 = arith.constant 0 : index
      %13 = vector.load %arg5[%c0_12, %c0_13] : memref<1x128xf32, #tpu.memory_space<vmem>>, vector<1x128xf32>
      %14 = vector.broadcast %13 : vector<1x128xf32> to vector<32x128xf32>
      %15 = arith.addf %12, %14 : vector<32x128xf32>
      %cst_14 = arith.constant 5.000000e-01 : f32
      %16 = vector.broadcast %cst_14 : f32 to vector<32x128xf32>
      %17 = arith.mulf %16, %15 : vector<32x128xf32>
      %cst_15 = arith.constant 4.471500e-02 : f32
      %18 = vector.broadcast %cst_15 : f32 to vector<32x128xf32>
      %19 = arith.mulf %18, %15 : vector<32x128xf32>
      %20 = arith.mulf %19, %15 : vector<32x128xf32>
      %21 = arith.mulf %20, %15 : vector<32x128xf32>
      %22 = arith.addf %15, %21 : vector<32x128xf32>
      %cst_16 = arith.constant 0.797884583 : f32
      %23 = vector.broadcast %cst_16 : f32 to vector<32x128xf32>
      %24 = arith.mulf %23, %22 : vector<32x128xf32>
      %25 = math.tanh %24 : vector<32x128xf32>
      %cst_17 = arith.constant 1.000000e+00 : f32
      %26 = vector.broadcast %cst_17 : f32 to vector<32x128xf32>
      %27 = arith.addf %26, %25 : vector<32x128xf32>
      %28 = arith.mulf %17, %27 : vector<32x128xf32>
      %29 = arith.truncf %28 : vector<32x128xf32> to vector<32x128xbf16>
      %c0_18 = arith.constant 0 : index
      %c0_19 = arith.constant 0 : index
      %30 = vector.load %arg6[%c0_18, %c0_19] : memref<32x128xbf16, #tpu.memory_space<vmem>>, vector<32x128xbf16>
      tpu.vector_store %arg6[%c0_18, %c0_19], %29 {strides = array<i32>} : memref<32x128xbf16, #tpu.memory_space<vmem>>, vector<32x128xbf16>,
    } else {
    }
    return
  }
  func.func @transform_0(%arg0: i32, %arg1: i32, %arg2: i32) -> (i32, i32) {
    %c0_i32 = arith.constant 0 : i32
    return %arg0, %arg2 : i32, i32
  }
  func.func @transform_1(%arg0: i32, %arg1: i32, %arg2: i32) -> (i32, i32) {
    %c0_i32 = arith.constant 0 : i32
    return %arg2, %arg1 : i32, i32
  }
  func.func @transform_2(%arg0: i32, %arg1: i32, %arg2: i32) -> (i32, i32) {
    %c0_i32 = arith.constant 0 : i32
    %c0_i32_0 = arith.constant 0 : i32
    return %c0_i32, %arg1 : i32, i32
  }
  func.func @transform_3(%arg0: i32, %arg1: i32, %arg2: i32) -> (i32, i32) {
    %c0_i32 = arith.constant 0 : i32
    return %arg0, %arg1 : i32, i32
  }
}

module attributes {stable_mosaic.version = 11 : i64} {
  func.func @_linear_kernel(%arg0: i32, %arg1: i32, %arg2: i32, %arg3: memref<32x128xbf16, #tpu.memory_space<vmem>>, %arg4: memref<128x128xbf16, #tpu.memory_space<vmem>>, %arg5: memref<1x128xf32, #tpu.memory_space<vmem>>, %arg6: memref<32x128xf32, #tpu.memory_space<vmem>>, %arg7: memref<32x128xf32, #tpu.memory_space<vmem>>) attributes {dimension_semantics = [#tpu.dimension_semantics<parallel>, #tpu.dimension_semantics<parallel>, #tpu.dimension_semantics<arbitrary>], iteration_bounds = array<i64: 1, 1, 1>, scalar_prefetch = 0 : i64, scratch_operands = 1 : i64, tpu.core_type = #tpu.core_type<tc>, window_params = [{transform_indices = @transform_0, window_bounds = array<i64: 32, 128>}, {transform_indices = @transform_1, window_bounds = array<i64: 128, 128>}, {transform_indices = @transform_2, window_bounds = array<i64: 1, 128>}, {transform_indices = @transform_3, window_bounds = array<i64: 32, 128>}]} {
    %c0_i32 = arith.constant 0 : i32
    %0 = arith.cmpi eq, %arg2, %c0_i32 : i32
    %1 = arith.extui %0 : i1 to i32
    %c0_i32_0 = arith.constant 0 : i32
    %2 = arith.cmpi ne, %1, %c0_i32_0 : i32
    scf.if %2 {
      %cst_10 = arith.constant 0.000000e+00 : f32
      %12 = vector.broadcast %cst_10 : f32 to vector<32x128xf32>
      %c0_11 = arith.constant 0 : index
      %c0_12 = arith.constant 0 : index
      %13 = vector.load %arg7[%c0_11, %c0_12] : memref<32x128xf32, #tpu.memory_space<vmem>>, vector<32x128xf32>
      tpu.vector_store %arg7[%c0_11, %c0_12], %12 {strides = array<i32>} : memref<32x128xf32, #tpu.memory_space<vmem>>, vector<32x128xf32>,
    } else {
    }
    %c0 = arith.constant 0 : index
    %c0_1 = arith.constant 0 : index
    %3 = vector.load %arg7[%c0, %c0_1] : memref<32x128xf32, #tpu.memory_space<vmem>>, vector<32x128xf32>
    %c0_2 = arith.constant 0 : index
    %c0_3 = arith.constant 0 : index
    %4 = vector.load %arg3[%c0_2, %c0_3] : memref<32x128xbf16, #tpu.memory_space<vmem>>, vector<32x128xbf16>
    %c0_4 = arith.constant 0 : index
    %c0_5 = arith.constant 0 : index
    %5 = vector.load %arg4[%c0_4, %c0_5] : memref<128x128xbf16, #tpu.memory_space<vmem>>, vector<128x128xbf16>
    %cst = arith.constant dense<0.000000e+00> : vector<32x128xf32>
    %6 = tpu.matmul %4, %5, %cst {dimension_numbers = #tpu.dot_dimension_numbers<[1], [0], [0], [1], [0, 0, 1, 1], [], []>} : vector<32x128xbf16>, vector<128x128xbf16>, vector<32x128xf32> -> vector<32x128xf32>
    %7 = arith.addf %3, %6 : vector<32x128xf32>
    %c0_6 = arith.constant 0 : index
    %c0_7 = arith.constant 0 : index
    %8 = vector.load %arg7[%c0_6, %c0_7] : memref<32x128xf32, #tpu.memory_space<vmem>>, vector<32x128xf32>
    tpu.vector_store %arg7[%c0_6, %c0_7], %7 {strides = array<i32>} : memref<32x128xf32, #tpu.memory_space<vmem>>, vector<32x128xf32>,
    %c0_i32_8 = arith.constant 0 : i32
    %9 = arith.cmpi eq, %arg2, %c0_i32_8 : i32
    %10 = arith.extui %9 : i1 to i32
    %c0_i32_9 = arith.constant 0 : i32
    %11 = arith.cmpi ne, %10, %c0_i32_9 : i32
    scf.if %11 {
      %c0_10 = arith.constant 0 : index
      %c0_11 = arith.constant 0 : index
      %12 = vector.load %arg7[%c0_10, %c0_11] : memref<32x128xf32, #tpu.memory_space<vmem>>, vector<32x128xf32>
      %c0_12 = arith.constant 0 : index
      %c0_13 = arith.constant 0 : index
      %13 = vector.load %arg5[%c0_12, %c0_13] : memref<1x128xf32, #tpu.memory_space<vmem>>, vector<1x128xf32>
      %14 = vector.broadcast %13 : vector<1x128xf32> to vector<32x128xf32>
      %15 = arith.addf %12, %14 : vector<32x128xf32>
      %c0_14 = arith.constant 0 : index
      %c0_15 = arith.constant 0 : index
      %16 = vector.load %arg6[%c0_14, %c0_15] : memref<32x128xf32, #tpu.memory_space<vmem>>, vector<32x128xf32>
      tpu.vector_store %arg6[%c0_14, %c0_15], %15 {strides = array<i32>} : memref<32x128xf32, #tpu.memory_space<vmem>>, vector<32x128xf32>,
    } else {
    }
    return
  }
  func.func @transform_0(%arg0: i32, %arg1: i32, %arg2: i32) -> (i32, i32) {
    %c0_i32 = arith.constant 0 : i32
    return %arg0, %arg2 : i32, i32
  }
  func.func @transform_1(%arg0: i32, %arg1: i32, %arg2: i32) -> (i32, i32) {
    %c0_i32 = arith.constant 0 : i32
    return %arg2, %arg1 : i32, i32
  }
  func.func @transform_2(%arg0: i32, %arg1: i32, %arg2: i32) -> (i32, i32) {
    %c0_i32 = arith.constant 0 : i32
    %c0_i32_0 = arith.constant 0 : i32
    return %c0_i32, %arg1 : i32, i32
  }
  func.func @transform_3(%arg0: i32, %arg1: i32, %arg2: i32) -> (i32, i32) {
    %c0_i32 = arith.constant 0 : i32
    return %arg0, %arg1 : i32, i32
  }
}

module attributes {stable_mosaic.version = 11 : i64} {
  func.func @_loss_kernel(%arg0: i32, %arg1: memref<32x64xf32, #tpu.memory_space<vmem>>, %arg2: memref<32x1xi32, #tpu.memory_space<vmem>>, %arg3: memref<32x1xf32, #tpu.memory_space<vmem>>, %arg4: memref<1x1xf32, #tpu.memory_space<smem>>, %arg5: memref<2xf32, #tpu.memory_space<smem>>) attributes {dimension_semantics = [#tpu.dimension_semantics<arbitrary>], iteration_bounds = array<i64: 1>, scalar_prefetch = 0 : i64, scratch_operands = 1 : i64, tpu.core_type = #tpu.core_type<tc>, window_params = [{transform_indices = @transform_0, window_bounds = array<i64: 32, 64>}, {transform_indices = @transform_1, window_bounds = array<i64: 32, 1>}, {transform_indices = @transform_2, window_bounds = array<i64: 32, 1>}, {transform_indices = @transform_3, window_bounds = array<i64: 1, 1>}]} {
    %c0_i32 = arith.constant 0 : i32
    %0 = arith.cmpi eq, %arg0, %c0_i32 : i32
    %1 = arith.extui %0 : i1 to i32
    %c0_i32_0 = arith.constant 0 : i32
    %2 = arith.cmpi ne, %1, %c0_i32_0 : i32
    scf.if %2 {
      %cst_19 = arith.constant 0.000000e+00 : f32
      %c0_20 = arith.constant 0 : index
      %51 = memref.load %arg5[%c0_20] : memref<2xf32, #tpu.memory_space<smem>>
      memref.store %cst_19, %arg5[%c0_20] : memref<2xf32, #tpu.memory_space<smem>>
      %cst_21 = arith.constant 0.000000e+00 : f32
      %c1_22 = arith.constant 1 : index
      %52 = memref.load %arg5[%c1_22] : memref<2xf32, #tpu.memory_space<smem>>
      memref.store %cst_21, %arg5[%c1_22] : memref<2xf32, #tpu.memory_space<smem>>
    } else {
    }
    %c0 = arith.constant 0 : index
    %c0_1 = arith.constant 0 : index
    %3 = vector.load %arg1[%c0, %c0_1] : memref<32x64xf32, #tpu.memory_space<vmem>>, vector<32x64xf32>
    %c0_2 = arith.constant 0 : index
    %c0_3 = arith.constant 0 : index
    %4 = vector.load %arg2[%c0_2, %c0_3] : memref<32x1xi32, #tpu.memory_space<vmem>>, vector<32x1xi32>
    %c0_4 = arith.constant 0 : index
    %c0_5 = arith.constant 0 : index
    %5 = vector.load %arg3[%c0_4, %c0_5] : memref<32x1xf32, #tpu.memory_space<vmem>>, vector<32x1xf32>
    %cst = arith.constant dense<0xFF800000> : vector<32xf32>
    %6 = vector.multi_reduction <maximumf>, %3, %cst [1] : vector<32x64xf32> to vector<32xf32>
    %7 = vector.shape_cast %6 : vector<32xf32> to vector<32x1xf32>
    %8 = vector.broadcast %7 : vector<32x1xf32> to vector<32x64xf32>
    %9 = arith.subf %3, %8 : vector<32x64xf32>
    %10 = math.exp %9 : vector<32x64xf32>
    %cst_6 = arith.constant dense<0.000000e+00> : vector<32xf32>
    %11 = vector.multi_reduction <add>, %10, %cst_6 [1] : vector<32x64xf32> to vector<32xf32>
    %12 = vector.shape_cast %11 : vector<32xf32> to vector<32x1xf32>
    %13 = math.log %12 : vector<32x1xf32>
    %14 = arith.addf %13, %7 : vector<32x1xf32>
    %15 = tpu.iota {dimensions = array<i32: 1>} : vector<32x64xi32>
    %16 = vector.broadcast %4 : vector<32x1xi32> to vector<32x64xi32>
    %17 = arith.cmpi eq, %15, %16 : vector<32x64xi32>
    %18 = arith.extui %17 : vector<32x64xi1> to vector<32x64xi32>
    %19 = arith.sitofp %18 : vector<32x64xi32> to vector<32x64xf32>
    %20 = arith.mulf %3, %19 : vector<32x64xf32>
    %cst_7 = arith.constant dense<0.000000e+00> : vector<32xf32>
    %21 = vector.multi_reduction <add>, %20, %cst_7 [1] : vector<32x64xf32> to vector<32xf32>
    %22 = vector.shape_cast %21 : vector<32xf32> to vector<32x1xf32>
    %cst_8 = arith.constant dense<0.000000e+00> : vector<32xf32>
    %23 = vector.multi_reduction <add>, %3, %cst_8 [1] : vector<32x64xf32> to vector<32xf32>
    %24 = vector.shape_cast %23 : vector<32xf32> to vector<32x1xf32>
    %cst_9 = arith.constant 6.400000e+01 : f32
    %25 = vector.broadcast %cst_9 : f32 to vector<32x1xf32>
    %26 = arith.divf %24, %25 : vector<32x1xf32>
    %cst_10 = arith.constant 0.899999976 : f32
    %27 = vector.broadcast %cst_10 : f32 to vector<32x1xf32>
    %28 = arith.mulf %27, %22 : vector<32x1xf32>
    %29 = arith.subf %14, %28 : vector<32x1xf32>
    %cst_11 = arith.constant 1.000000e-01 : f32
    %30 = vector.broadcast %cst_11 : f32 to vector<32x1xf32>
    %31 = arith.mulf %30, %26 : vector<32x1xf32>
    %32 = arith.subf %29, %31 : vector<32x1xf32>
    %c0_12 = arith.constant 0 : index
    %33 = memref.load %arg5[%c0_12] : memref<2xf32, #tpu.memory_space<smem>>
    %34 = arith.mulf %32, %5 : vector<32x1xf32>
    %35 = vector.shape_cast %34 : vector<32x1xf32> to vector<1x32x1xf32>
    %cst_13 = arith.constant dense<0.000000e+00> : vector<1xf32>
    %36 = vector.multi_reduction <add>, %35, %cst_13 [1, 2] : vector<1x32x1xf32> to vector<1xf32>
    %37 = vector.shape_cast %36 : vector<1xf32> to vector<1x1x1xf32>
    %38 = vector.extract %37[0, 0, 0] : f32 from vector<1x1x1xf32>
    %39 = arith.addf %33, %38 : f32
    %c0_14 = arith.constant 0 : index
    %40 = memref.load %arg5[%c0_14] : memref<2xf32, #tpu.memory_space<smem>>
    memref.store %39, %arg5[%c0_14] : memref<2xf32, #tpu.memory_space<smem>>
    %c1 = arith.constant 1 : index
    %41 = memref.load %arg5[%c1] : memref<2xf32, #tpu.memory_space<smem>>
    %42 = vector.shape_cast %5 : vector<32x1xf32> to vector<1x32x1xf32>
    %cst_15 = arith.constant dense<0.000000e+00> : vector<1xf32>
    %43 = vector.multi_reduction <add>, %42, %cst_15 [1, 2] : vector<1x32x1xf32> to vector<1xf32>
    %44 = vector.shape_cast %43 : vector<1xf32> to vector<1x1x1xf32>
    %45 = vector.extract %44[0, 0, 0] : f32 from vector<1x1x1xf32>
    %46 = arith.addf %41, %45 : f32
    %c1_16 = arith.constant 1 : index
    %47 = memref.load %arg5[%c1_16] : memref<2xf32, #tpu.memory_space<smem>>
    memref.store %46, %arg5[%c1_16] : memref<2xf32, #tpu.memory_space<smem>>
    %c0_i32_17 = arith.constant 0 : i32
    %48 = arith.cmpi eq, %arg0, %c0_i32_17 : i32
    %49 = arith.extui %48 : i1 to i32
    %c0_i32_18 = arith.constant 0 : i32
    %50 = arith.cmpi ne, %49, %c0_i32_18 : i32
    scf.if %50 {
      %c0_19 = arith.constant 0 : index
      %51 = memref.load %arg5[%c0_19] : memref<2xf32, #tpu.memory_space<smem>>
      %c1_20 = arith.constant 1 : index
      %52 = memref.load %arg5[%c1_20] : memref<2xf32, #tpu.memory_space<smem>>
      %cst_21 = arith.constant 1.000000e-30 : f32
      %53 = arith.maximumf %52, %cst_21 : f32
      %54 = arith.divf %51, %53 : f32
      %c0_22 = arith.constant 0 : index
      %c0_23 = arith.constant 0 : index
      %55 = memref.load %arg4[%c0_22, %c0_23] : memref<1x1xf32, #tpu.memory_space<smem>>
      memref.store %54, %arg4[%c0_22, %c0_23] : memref<1x1xf32, #tpu.memory_space<smem>>
    } else {
    }
    return
  }
  func.func @transform_0(%arg0: i32) -> (i32, i32) {
    %c0_i32 = arith.constant 0 : i32
    %c0_i32_0 = arith.constant 0 : i32
    return %arg0, %c0_i32 : i32, i32
  }
  func.func @transform_1(%arg0: i32) -> (i32, i32) {
    %c0_i32 = arith.constant 0 : i32
    %c0_i32_0 = arith.constant 0 : i32
    return %arg0, %c0_i32 : i32, i32
  }
  func.func @transform_2(%arg0: i32) -> (i32, i32) {
    %c0_i32 = arith.constant 0 : i32
    %c0_i32_0 = arith.constant 0 : i32
    return %arg0, %c0_i32 : i32, i32
  }
  func.func @transform_3(%arg0: i32) -> (i32, i32) {
    %c0_i32 = arith.constant 0 : i32
    %c0_i32_0 = arith.constant 0 : i32
    %c0_i32_1 = arith.constant 0 : i32
    return %c0_i32, %c0_i32_0 : i32, i32
  }
}

</mosaic_0001>

<bundles_post_ra>
// kernel: pipeline_forward.14
= control target key start
LH: loop header
LB: loop body
LE: loop exit
PB: predicated region body
PF: predicated region fallthrough
CT: control target
= control target key end

     0   :  { %s335_s1 = inlined_call_operand.vmem [shape: bf16[128,128], index: 1, kind: input, shape index: {}]   ;;  %s336_s0 = inlined_call_operand.vmem [shape: bf16[32,128], index: 0, kind: input, shape index: {}]   ;;  %s337_s2 = inlined_call_operand.vmem [shape: f32[1,128], index: 2, kind: input, shape index: {}]   ;;  %s338_s3 = inlined_call_operand.vmem [shape: bf16[32,128], index: 3, kind: output, shape index: {}]  }
   0x1   :  { %v266_v0 = vld [vmem:[%s335_s1] sm:$0xff]   ;;  %v267_v1 = vld [vmem:[%s335_s1 + $0x8] sm:$0xff]   ;;  %v268_v2 = vld [vmem:[%s335_s1 + $0x10] sm:$0xff]  }
   0x2   :  { %246 = vmatprep.subr.bf16.mxu0 %v266_v0  ;;  %v269_v3 = vld [vmem:[%s335_s1 + $0x18] sm:$0xff]   ;;  %v274_v4 = vld [vmem:[%s336_s0] sm:$0xff]   ;;  %v271_v6 = vld [vmem:[%s335_s1 + $0x28] sm:$0xff]  }
   0x3   :  { %247 = vmatpush3.bf16.msra.mxu0 %v266_v0  ;;  %262 = vmatprep.mubr.bf16.mxu0 %v274_v4  ;;  %v270_v5 = vld [vmem:[%s335_s1 + $0x20] sm:$0xff]   ;;  %v272_v7 = vld [vmem:[%s335_s1 + $0x30] sm:$0xff]   ;;  %v273_v8 = vld [vmem:[%s335_s1 + $0x38] sm:$0xff]  }
   0x4   :  { %248 = vmatprep.subr.bf16.mxu0 %v267_v1  ;;  %v275_v9 = vld [vmem:[%s336_s0 + $0x8] sm:$0xff]   ;;  %v216_v11 = vld [vmem:[%s337_s2] ss:$0 sm:$0xff] }
   0x7   :  { %249 = vmatpush3.bf16.msra.mxu0 %v267_v1 }
   0x8   :  { %250 = vmatprep.subr.bf16.mxu0 %v268_v2 }
   0xb   :  { %251 = vmatpush3.bf16.msra.mxu0 %v268_v2 }
   0xc   :  { %252 = vmatprep.subr.bf16.mxu0 %v269_v3 }
   0xf   :  { %253 = vmatpush3.bf16.msra.mxu0 %v269_v3 }
  0x10   :  { %254 = vmatprep.subr.bf16.mxu0 %v270_v5 }
  0x13   :  { %255 = vmatpush3.bf16.msra.mxu0 %v270_v5 }
  0x14   :  { %256 = vmatprep.subr.bf16.mxu0 %v271_v6 }
  0x17   :  { %257 = vmatpush3.bf16.msra.mxu0 %v271_v6 }
  0x18   :  { %258 = vmatprep.subr.bf16.mxu0 %v272_v7 }
  0x1b   :  { %259 = vmatpush3.bf16.msra.mxu0 %v272_v7 }
  0x1c   :  { %260 = vmatprep.subr.bf16.mxu0 %v273_v8 }
  0x1f   :  { %261 = vmatpush3.bf16.msra.mxu0 %v273_v8 }
  0x22   :  { %263 = vmatmul.mubr.bf16.vlgmr.msra.gmra.mrb[0].mxu0 %v275_v9 }
  0xf5   :  { %v264_v10 = vpop.f32.mrb[0].mxu0 }
  0xf6   :  { %v141_v12 = vpop.f32.mrb[1].mxu0  ;;  %v180_v14 = vadd.f32 %v264_v10, %v216_v11 }
  0xf7   :  { %v265_v13 = vpop.f32.mrb[2].mxu0  ;;  %v178_v17 = vadd.f32 %v216_v11, %v141_v12 }
  0xf8   :  { %v181_v15 = vadd.f32 %v265_v13, %v216_v11  ;;  %v144_v16 = vpop.f32.mrb[3].mxu0 }
  0xf9   :  { %v179_v18 = vadd.f32 %v216_v11, %v144_v16 }
  0xfa   :  { %v233_v19 = vpack.c.bf16 %v181_v15, %v180_v14 }
  0xfb   :  { %v228_v20 = vpack.c.bf16 %v179_v18, %v178_v17 }
  0xfc   :  { %235 = vst [vmem:[%s338_s3 + $0x8] sm:$0xff] %v233_v19  }
  0xfd   :  { %229 = vst [vmem:[%s338_s3] sm:$0xff] %v228_v20  }

// kernel: pipeline_forward.15
= control target key start
LH: loop header
LB: loop body
LE: loop exit
PB: predicated region body
PF: predicated region fallthrough
CT: control target
= control target key end

     0   :  { %vm98_vm0 = vcmask 261120   ;;  %vm19_vm1 = vcmask 7168   ;;  %v386_v18 = vmov inf   ;;  %v194_v19 = vlaneseq  ;;  %s551_s1 = inlined_call_operand.vmem [shape: bf16[128,32], index: 1, kind: input, shape index: {}]   ;;  %s552_s0 = inlined_call_operand.vmem [shape: bf16[32,32], index: 0, kind: input, shape index: {}]   ;;  %s553_s2 = inlined_call_operand.vmem [shape: f32[1,128], index: 2, kind: input, shape index: {}]   ;;  %s554_s3 = inlined_call_operand.vmem [shape: s32[32,1], index: 3, kind: output, shape index: {}]  }
   0x1   :  { %v376_v0 = vld [vmem:[%s551_s1] sm:$0xff]   ;;  %v377_v1 = vld [vmem:[%s551_s1 + $0x8] sm:$0xff]   ;;  %v378_v3 = vld [vmem:[%s551_s1 + $0x10] sm:$0xff]   ;;  %22 = vst.msk [vmem:[#allocation2 + $0x10] sm:$0xff] %vm19_vm1, %v386_v18  ;;  %v387_v62 = vmov 0  }
   0x2   :  { %366 = vmatprep.subr.msk.bf16.mxu0 %vm98_vm0, %v376_v0  ;;  %v106_v2 = vsel %vm98_vm0, %v376_v0, 0  ;;  %v109_v4 = vsel %vm98_vm0, %v377_v1, 0  ;;  %v384_v5 = vld [vmem:[%s552_s0] sm:$0xff]   ;;  %v112_v6 = vsel %vm98_vm0, %v378_v3, 0  ;;  %v379_v7 = vld [vmem:[%s551_s1 + $0x18] sm:$0xff]   ;;  %v381_v11 = vld [vmem:[%s551_s1 + $0x28] sm:$0xff]  }
   0x3   :  { %347 = vmatpush3.bf16.xpose.msra.mxu0 %v106_v2  ;;  %362 = vmatprep.mubr.msk.bf16.mxu0 %vm98_vm0, %v384_v5  ;;  %v115_v8 = vsel %vm98_vm0, %v379_v7, 0  ;;  %v380_v9 = vld [vmem:[%s551_s1 + $0x20] sm:$0xff]   ;;  %v121_v12 = vsel %vm98_vm0, %v381_v11, 0  ;;  %v382_v13 = vld [vmem:[%s551_s1 + $0x30] sm:$0xff]   ;;  %v383_v15 = vld [vmem:[%s551_s1 + $0x38] sm:$0xff]   ;;  %20 = vst.msk [vmem:[#allocation2] sm:$0xff] %vm19_vm1, %v386_v18 }
   0x4   :  { %367 = vmatprep.subr.msk.bf16.mxu0 %vm98_vm0, %v377_v1  ;;  %v118_v10 = vsel %vm98_vm0, %v380_v9, 0  ;;  %v124_v14 = vsel %vm98_vm0, %v382_v13, 0  ;;  %v127_v16 = vsel %vm98_vm0, %v383_v15, 0  ;;  %v385_v17 = vld [vmem:[%s552_s0 + $0x8] sm:$0xff]   ;;  %21 = vst.msk [vmem:[#allocation2 + $0x8] sm:$0xff] %vm19_vm1, %v386_v18  ;;  %23 = vst.msk [vmem:[#allocation2 + $0x18] sm:$0xff] %vm19_vm1, %v386_v18 }
   0x5   :  { %v195_v20 = vand.u32 127, %v194_v19  ;;  %v335_v22 = vld [vmem:[%s553_s2] ss:$0 sm:$0xff]  ;;  %24 = vst.msk [vmem:[#allocation3] sm:$0xff] %vm19_vm1, %v387_v62  ;;  %25 = vst.msk [vmem:[#allocation3 + $0x8] sm:$0xff] %vm19_vm1, %v387_v62 }
   0x6   :  { %26 = vst.msk [vmem:[#allocation3 + $0x10] sm:$0xff] %vm19_vm1, %v387_v62  ;;  %27 = vst.msk [vmem:[#allocation3 + $0x18] sm:$0xff] %vm19_vm1, %v387_v62 }
   0x7   :  { %vm198_vm2 = vcmp.lt.s32.totalorder %v195_v20, 64 }
   0x8   :  { %v463_v38 = vld [vmem:[#allocation2 + $0x10] sm:$0xff] }
   0xa   :  { %v465_v39 = vld [vmem:[#allocation2] sm:$0xff] }
   0xb   :  { %349 = vmatpush3.bf16.xpose.msra.mxu0 %v109_v4  ;;  %v482_v43 = vld [vmem:[#allocation2 + $0x18] sm:$0xff]  ;;  %v490_v46 = vld [vmem:[#allocation2 + $0x8] sm:$0xff] }
   0xc   :  { %368 = vmatprep.subr.msk.bf16.mxu0 %vm98_vm0, %v378_v3 }
  0x13   :  { %351 = vmatpush3.bf16.xpose.msra.mxu0 %v112_v6 }
  0x14   :  { %369 = vmatprep.subr.msk.bf16.mxu0 %vm98_vm0, %v379_v7 }
  0x1b   :  { %353 = vmatpush3.bf16.xpose.msra.mxu0 %v115_v8 }
  0x1c   :  { %370 = vmatprep.subr.msk.bf16.mxu0 %vm98_vm0, %v380_v9 }
  0x23   :  { %355 = vmatpush3.bf16.xpose.msra.mxu0 %v118_v10 }
  0x24   :  { %371 = vmatprep.subr.msk.bf16.mxu0 %vm98_vm0, %v381_v11 }
  0x2b   :  { %357 = vmatpush3.bf16.xpose.msra.mxu0 %v121_v12 }
  0x2c   :  { %372 = vmatprep.subr.msk.bf16.mxu0 %vm98_vm0, %v382_v13 }
  0x33   :  { %359 = vmatpush3.bf16.xpose.msra.mxu0 %v124_v14 }
  0x34   :  { %373 = vmatprep.subr.msk.bf16.mxu0 %vm98_vm0, %v383_v15 }
  0x3b   :  { %361 = vmatpush3.bf16.xpose.msra.mxu0 %v127_v16 }
  0x42   :  { %363 = vmatmul.mubr.msk.bf16.vlgmr.msra.gmra.mrb[0].mxu0 %vm98_vm0, %v385_v17 }
 0x115   :  { %v364_v21 = vpop.f32.mrb[0].mxu0 }
 0x116   :  { %v181_v23 = vmul.f32 2.0, %v364_v21  ;;  %v163_v24 = vpop.f32.mrb[1].mxu0  ;;  %v283_v21 = vld [vmem:[#allocation3] sm:$0xff] }
 0x117   :  { %v179_v25 = vmul.f32 2.0, %v163_v24  ;;  %v365_v26 = vpop.f32.mrb[2].mxu0 }
 0x118   :  { %v182_v27 = vmul.f32 2.0, %v365_v26  ;;  %v166_v28 = vpop.f32.mrb[3].mxu0  ;;  %v191_v29 = vsub.f32 %v335_v22, %v181_v23 }
 0x119   :  { %v180_v30 = vmul.f32 2.0, %v166_v28  ;;  %v189_v31 = vsub.f32 %v335_v22, %v179_v25 }
 0x11a   :  { %v201_v32 = vsel %vm198_vm2, %v191_v29, inf  ;;  %v192_v33 = vsub.f32 %v335_v22, %v182_v27 }
 0x11b   :  { %v190_v34 = vsub.f32 %v335_v22, %v180_v30  ;;  %207 = vmin.xlane.f32.xlu1 %v201_v32  ;;  %v199_v35 = vsel %vm198_vm2, %v189_v31, inf  ;;  %v284_v31 = vld [vmem:[#allocation3 + $0x8] sm:$0xff] }
 0x11c   :  { %203 = vmin.xlane.f32.xlu0 %v199_v35  ;;  %v202_v36 = vsel %vm198_vm2, %v192_v33, inf }
 0x11d   :  { %v200_v37 = vsel %vm198_vm2, %v190_v34, inf }
 0x11f   :  { %209 = vmin.xlane.f32.xlu1 %v202_v36 }
 0x120   :  { %205 = vmin.xlane.f32.xlu0 %v200_v37 }
 0x1a8   :  { %v467_v40 = vpop.xlane.xlu1 %207 }
 0x1a9   :  { %vm213_vm3 = vcmp.le.f32.partialorder %v201_v32, %v467_v40  ;;  %vm281_vm4 = vcmp.lt.f32.partialorder %v467_v40, %v463_v38  ;;  %v472_v41 = vpop.xlane.xlu0 %203  ;;  %v285_v32 = vld [vmem:[#allocation3 + $0x10] sm:$0xff] }
 0x1aa   :  { %v302_v42 = vsel %vm281_vm4, %v467_v40, %v463_v38  ;;  %vm211_vm5 = vcmp.le.f32.partialorder %v199_v35, %v472_v41  ;;  %vm279_vm6 = vcmp.lt.f32.partialorder %v472_v41, %v465_v39  ;;  %v217_v44 = vsel %vm213_vm3, %v195_v20, 1073741824 }
 0x1ab   :  { %306 = vst.msk [vmem:[#allocation2 + $0x10] sm:$0xff] %vm19_vm1, %v302_v42  ;;  %v300_v45 = vsel %vm279_vm6, %v472_v41, %v465_v39  ;;  %v215_v47 = vsel %vm211_vm5, %v195_v20, 1073741824  ;;  %v248_v51 = vshra.s32 %v217_v44, 16  ;;  %v247_v3 = vand.u32 65535, %v217_v44  ;;  %v286_v41 = vld [vmem:[#allocation3 + $0x18] sm:$0xff] }
 0x1ac   :  { %304 = vst.msk [vmem:[#allocation2] sm:$0xff] %vm19_vm1, %v300_v45  ;;  %v493_v48 = vpop.xlane.xlu1 %209  ;;  %v220_v49 = vshra.s32 %v215_v47, 16  ;;  %v219_v63 = vand.u32 65535, %v215_v47 }
 0x1ad   :  { %vm214_vm7 = vcmp.le.f32.partialorder %v202_v36, %v493_v48  ;;  %vm282_vm8 = vcmp.lt.f32.partialorder %v493_v48, %v482_v43  ;;  %v498_v50 = vpop.xlane.xlu0 %205  ;;  %v250_v58 = vcvt.s32.f32 %v248_v51  ;;  %v249_v8 = vcvt.s32.f32 %v247_v3 }
 0x1ae   :  { %v303_v52 = vsel %vm282_vm8, %v493_v48, %v482_v43  ;;  %vm212_vm9 = vcmp.le.f32.partialorder %v200_v37, %v498_v50  ;;  %vm280_vm10 = vcmp.lt.f32.partialorder %v498_v50, %v490_v46  ;;  %v222_v53 = vcvt.s32.f32 %v220_v49 }
 0x1af   :  { %307 = vst.msk [vmem:[#allocation2 + $0x18] sm:$0xff] %vm19_vm1, %v303_v52  ;;  %v301_v54 = vsel %vm280_vm10, %v498_v50, %v490_v46  ;;  %v216_v55 = vsel %vm212_vm9, %v195_v20, 1073741824  ;;  %v218_v56 = vsel %vm214_vm7, %v195_v20, 1073741824  ;;  %v221_v1 = vcvt.s32.f32 %v219_v63 }
 0x1b0   :  { %305 = vst.msk [vmem:[#allocation2 + $0x8] sm:$0xff] %vm19_vm1, %v301_v54  ;;  %223 = vmin.xlane.f32.xlu0 %v222_v53  ;;  %v234_v57 = vshra.s32 %v216_v55, 16  ;;  %v262_v60 = vshra.s32 %v218_v56, 16  ;;  %v233_v2 = vand.u32 65535, %v216_v55  ;;  %v261_v9 = vand.u32 65535, %v218_v56 }
 0x1b2   :  { %v236_v59 = vcvt.s32.f32 %v234_v57  ;;  %v264_v61 = vcvt.s32.f32 %v262_v60  ;;  %v235_v7 = vcvt.s32.f32 %v233_v2  ;;  %v263_v13 = vcvt.s32.f32 %v261_v9 }
 0x1b4   :  { %251 = vmin.xlane.f32.xlu0 %v250_v58  ;;  %237 = vmin.xlane.f32.xlu1 %v236_v59 }
 0x1b8   :  { %265 = vmin.xlane.f32.xlu1 %v264_v61 }
 0x23d   :  { %v224_v0 = vpop.xlane.xlu0 %223 }
 0x23e   :  { %vm225_vm11 = vcmp.eq.f32.partialorder %v222_v53, %v224_v0  ;;  %v230_v15 = vcvt.f32.s32 %v224_v0 }
 0x23f   :  { %v226_v4 = vsel %vm225_vm11, %v221_v1, inf }
 0x240   :  { %227 = vmin.xlane.f32.xlu0 %v226_v4  ;;  %v231_v19 = vshll.u32 %v230_v15, 16 }
 0x241   :  { %v238_v5 = vpop.xlane.xlu1 %237  ;;  %v252_v6 = vpop.xlane.xlu0 %251 }
 0x242   :  { %vm239_vm12 = vcmp.eq.f32.partialorder %v236_v59, %v238_v5  ;;  %vm253_vm13 = vcmp.eq.f32.partialorder %v250_v58, %v252_v6  ;;  %v244_v16 = vcvt.f32.s32 %v238_v5  ;;  %v258_v17 = vcvt.f32.s32 %v252_v6 }
 0x243   :  { %v240_v10 = vsel %vm239_vm12, %v235_v7, inf  ;;  %v254_v11 = vsel %vm253_vm13, %v249_v8, inf }
 0x244   :  { %241 = vmin.xlane.f32.xlu1 %v240_v10  ;;  %255 = vmin.xlane.f32.xlu0 %v254_v11  ;;  %v245_v23 = vshll.u32 %v244_v16, 16  ;;  %v259_v24 = vshll.u32 %v258_v17, 16 }
 0x245   :  { %v266_v12 = vpop.xlane.xlu1 %265 }
 0x246   :  { %vm267_vm14 = vcmp.eq.f32.partialorder %v264_v61, %v266_v12  ;;  %v272_v27 = vcvt.f32.s32 %v266_v12 }
 0x247   :  { %v268_v14 = vsel %vm267_vm14, %v263_v13, inf }
 0x248   :  { %269 = vmin.xlane.f32.xlu1 %v268_v14  ;;  %v273_v36 = vshll.u32 %v272_v27, 16 }
 0x2cd   :  { %v228_v18 = vpop.xlane.xlu0 %227 }
 0x2ce   :  { %v229_v20 = vcvt.f32.s32 %v228_v18 }
 0x2d0   :  { %v232_v22 = vadd.s32 %v231_v19, %v229_v20 }
 0x2d1   :  { %v242_v25 = vpop.xlane.xlu1 %241  ;;  %v256_v26 = vpop.xlane.xlu0 %255 }
 0x2d2   :  { %v287_v28 = vsel %vm279_vm6, %v232_v22, %v283_v21  ;;  %v243_v29 = vcvt.f32.s32 %v242_v25  ;;  %v257_v30 = vcvt.f32.s32 %v256_v26 }
 0x2d3   :  { %292 = vst.msk [vmem:[#allocation3] sm:$0xff] %vm19_vm1, %v287_v28 }
 0x2d4   :  { %v246_v33 = vadd.s32 %v245_v23, %v243_v29  ;;  %v260_v34 = vadd.s32 %v259_v24, %v257_v30 }
 0x2d5   :  { %v270_v35 = vpop.xlane.xlu1 %269 }
 0x2d6   :  { %v288_v37 = vsel %vm280_vm10, %v246_v33, %v284_v31  ;;  %v289_v42 = vsel %vm281_vm4, %v260_v34, %v285_v32  ;;  %v271_v39 = vcvt.f32.s32 %v270_v35 }
 0x2d7   :  { %293 = vst.msk [vmem:[#allocation3 + $0x8] sm:$0xff] %vm19_vm1, %v288_v37  ;;  %294 = vst.msk [vmem:[#allocation3 + $0x10] sm:$0xff] %vm19_vm1, %v289_v42 }
 0x2d8   :  { %v274_v44 = vadd.s32 %v273_v36, %v271_v39 }
 0x2da   :  { %v311_v45 = vld [vmem:[#allocation3] sm:$0xff]  ;;  %v290_v47 = vsel %vm282_vm8, %v274_v44, %v286_v41 }
 0x2db   :  { %315 = vst.msk [vmem:[%s554_s3] sm:$0xff] %vm19_vm1, %v311_v45  ;;  %295 = vst.msk [vmem:[#allocation3 + $0x18] sm:$0xff] %vm19_vm1, %v290_v47 }
 0x2de   :  { %v312_v38 = vld [vmem:[#allocation3 + $0x8] sm:$0xff]  ;;  %v313_v40 = vld [vmem:[#allocation3 + $0x10] sm:$0xff] }
 0x2df   :  { %316 = vst.msk [vmem:[%s554_s3 + $0x8] sm:$0xff] %vm19_vm1, %v312_v38  ;;  %317 = vst.msk [vmem:[%s554_s3 + $0x10] sm:$0xff] %vm19_vm1, %v313_v40 }
 0x2e2   :  { %v314_v43 = vld [vmem:[#allocation3 + $0x18] sm:$0xff] }
 0x2e3   :  { %318 = vst.msk [vmem:[%s554_s3 + $0x18] sm:$0xff] %vm19_vm1, %v314_v43 }

// kernel: pipeline_forward.16
= control target key start
LH: loop header
LB: loop body
LE: loop exit
PB: predicated region body
PF: predicated region fallthrough
CT: control target
= control target key end

     0   :  { %s363_s1 = inlined_call_operand.vmem [shape: bf16[128,128], index: 1, kind: input, shape index: {}]   ;;  %s364_s0 = inlined_call_operand.vmem [shape: bf16[32,128], index: 0, kind: input, shape index: {}]   ;;  %s365_s2 = inlined_call_operand.vmem [shape: f32[1,128], index: 2, kind: input, shape index: {}]   ;;  %s366_s3 = inlined_call_operand.vmem [shape: f32[32,128], index: 3, kind: input, shape index: {}]   ;;  %s367_s4 = inlined_call_operand.vmem [shape: bf16[32,128], index: 4, kind: output, shape index: {}]  }
   0x1   :  { %v277_v0 = vld [vmem:[%s363_s1] sm:$0xff]   ;;  %v278_v1 = vld [vmem:[%s363_s1 + $0x8] sm:$0xff]   ;;  %v279_v2 = vld [vmem:[%s363_s1 + $0x10] sm:$0xff]  }
   0x2   :  { %257 = vmatprep.subr.bf16.mxu0 %v277_v0  ;;  %v280_v3 = vld [vmem:[%s363_s1 + $0x18] sm:$0xff]   ;;  %v285_v4 = vld [vmem:[%s364_s0] sm:$0xff]   ;;  %v282_v6 = vld [vmem:[%s363_s1 + $0x28] sm:$0xff]  }
   0x3   :  { %258 = vmatpush3.bf16.msra.mxu0 %v277_v0  ;;  %273 = vmatprep.mubr.bf16.mxu0 %v285_v4  ;;  %v281_v5 = vld [vmem:[%s363_s1 + $0x20] sm:$0xff]   ;;  %v283_v7 = vld [vmem:[%s363_s1 + $0x30] sm:$0xff]   ;;  %v284_v8 = vld [vmem:[%s363_s1 + $0x38] sm:$0xff]  }
   0x4   :  { %259 = vmatprep.subr.bf16.mxu0 %v278_v1  ;;  %v286_v9 = vld [vmem:[%s364_s0 + $0x8] sm:$0xff]   ;;  %v227_v10 = vld [vmem:[%s365_s2] ss:$0 sm:$0xff]  ;;  %v187_v14 = vld [vmem:[%s366_s3 + $0x10] sm:$0xff] }
   0x5   :  { %v188_v17 = vld [vmem:[%s366_s3 + $0x18] sm:$0xff]  ;;  %v185_v18 = vld [vmem:[%s366_s3] sm:$0xff]  ;;  %v186_v21 = vld [vmem:[%s366_s3 + $0x8] sm:$0xff] }
   0x7   :  { %260 = vmatpush3.bf16.msra.mxu0 %v278_v1 }
   0x8   :  { %261 = vmatprep.subr.bf16.mxu0 %v279_v2 }
   0xb   :  { %262 = vmatpush3.bf16.msra.mxu0 %v279_v2 }
   0xc   :  { %263 = vmatprep.subr.bf16.mxu0 %v280_v3 }
   0xf   :  { %264 = vmatpush3.bf16.msra.mxu0 %v280_v3 }
  0x10   :  { %265 = vmatprep.subr.bf16.mxu0 %v281_v5 }
  0x13   :  { %266 = vmatpush3.bf16.msra.mxu0 %v281_v5 }
  0x14   :  { %267 = vmatprep.subr.bf16.mxu0 %v282_v6 }
  0x17   :  { %268 = vmatpush3.bf16.msra.mxu0 %v282_v6 }
  0x18   :  { %269 = vmatprep.subr.bf16.mxu0 %v283_v7 }
  0x1b   :  { %270 = vmatpush3.bf16.msra.mxu0 %v283_v7 }
  0x1c   :  { %271 = vmatprep.subr.bf16.mxu0 %v284_v8 }
  0x1f   :  { %272 = vmatpush3.bf16.msra.mxu0 %v284_v8 }
  0x22   :  { %274 = vmatmul.mubr.bf16.vlgmr.msra.gmra.mrb[0].mxu0 %v286_v9 }
  0xf5   :  { %v275_v11 = vpop.f32.mrb[0].mxu0 }
  0xf6   :  { %v183_v12 = vadd.f32 %v275_v11, %v227_v10  ;;  %v144_v13 = vpop.f32.mrb[1].mxu0 }
  0xf7   :  { %v181_v15 = vadd.f32 %v227_v10, %v144_v13  ;;  %v276_v16 = vpop.f32.mrb[2].mxu0 }
  0xf8   :  { %v184_v19 = vadd.f32 %v276_v16, %v227_v10  ;;  %v147_v20 = vpop.f32.mrb[3].mxu0  ;;  %v191_v23 = vadd.f32 %v187_v14, %v183_v12 }
  0xf9   :  { %v182_v22 = vadd.f32 %v227_v10, %v147_v20  ;;  %v189_v25 = vadd.f32 %v185_v18, %v181_v15 }
  0xfa   :  { %v192_v24 = vadd.f32 %v188_v17, %v184_v19 }
  0xfb   :  { %v190_v26 = vadd.f32 %v186_v21, %v182_v22 }
  0xfc   :  { %v244_v27 = vpack.c.bf16 %v192_v24, %v191_v23 }
  0xfd   :  { %v239_v28 = vpack.c.bf16 %v190_v26, %v189_v25 }
  0xfe   :  { %246 = vst [vmem:[%s367_s4 + $0x8] sm:$0xff] %v244_v27  }
  0xff   :  { %240 = vst [vmem:[%s367_s4] sm:$0xff] %v239_v28  }

// kernel: pipeline_forward.18
= control target key start
LH: loop header
LB: loop body
LE: loop exit
PB: predicated region body
PF: predicated region fallthrough
CT: control target
= control target key end

     0   :  { %s978_s12 = smov 0   ;;  %s980_s13 = smov 0   ;;  %s1096_s0 = inlined_call_operand.vmem [shape: bf16[2,16,32], index: 0, kind: input, shape index: {}]   ;;  %s1097_s1 = inlined_call_operand.vmem [shape: bf16[2,16,32], index: 1, kind: input, shape index: {}]   ;;  %s1098_s2 = inlined_call_operand.vmem [shape: bf16[2,16,32], index: 2, kind: input, shape index: {}]   ;;  %s1099_s3 = inlined_call_operand.vmem [shape: bf16[2,16,32], index: 3, kind: output, shape index: {}]  }
   0x1   :  { %s982_s14 = smov 0  }
   0x2 LB: > { %s32_s15 = sadd.s32 1, %s945_s13  ;;  %p811_p0 = scmp.ge.s32.totalorder %s949_s14, 1  ;;  %s949_s14 = sphi %s982_s14, %s13_s14   ;;  %s945_s13 = sphi %s980_s13, %s1101_s13   ;;  %s941_s12 = sphi %s978_s12, %s1100_s12  }
   0x3   : > { %p34_p1 = scmp.ge.s32.totalorder %s32_s15, 2  ;;  %p199_p2 = scmp.lt.s32.totalorder %s949_s14, 3 }
   0x5   : > { %s1103_s15 = smov (%p34_p1, %s32_s15), 0  ;;  %p200_p3 = pnand %p811_p0, %p199_p2 }
   0x6   : > { %p250_p4 = scmp.lt.s32.totalorder (!%p200_p3), %s941_s12, 1  ;;  %v951_v0 = vmov (!%p200_p3), 0.0   ;;  %vm952_vm0 = vmmov (!%p200_p3), 0   ;;  %vm318_vm1 = vcmask (!%p200_p3), 130048   ;;  %vm294_vm2 = vcmask (!%p200_p3), 15360   ;;  %s955_s23 = smov (!%p200_p3), 112  }
   0x7   : > { %203 = sbr.rel (%p200_p3) target bundleno = 1388 (0x56c), region = 32  ;;  %845 = vmatprep.subr.bf16.mxu0 (!%p200_p3), %v951_v0  ;;  %847 = vmatprep.mubr.msk.bf16.mxu0 (!%p200_p3), %vm952_vm0, %v951_v0  ;;  %v953_v4 = vmov (!%p200_p3), -inf   ;;  %v954_v11 = vmov (!%p200_p3), 0   ;;  %vm481_vm3 = vcmask (!%p200_p3), 7168   ;;  %v956_v43 = vmov (!%p200_p3), 1   ;;  %s957_s27 = smov (!%p200_p3), 16  }
   0x8   : > { %851 = vmatprep.subr.bf16.mxu1 (!%p200_p3), %v951_v0  ;;  %853 = vmatprep.mubr.msk.bf16.mxu1 (!%p200_p3), %vm952_vm0, %v951_v0  ;;  %295 = vst.msk [vmem:[#allocation2] sm:$0xff] (!%p200_p3), %vm294_vm2, %v953_v4  ;;  %296 = vst.msk [vmem:[#allocation2 + $0x8] sm:$0xff] (!%p200_p3), %vm294_vm2, %v953_v4  ;;  %vm656_vm4 = vcmask (!%p200_p3), 15368   ;;  %vm297_vm5 = vcmask (!%p200_p3), 261120   ;;  %vm589_vm6 = vcmask (!%p200_p3), 261248   ;;  %vm678_vm7 = vcmask (!%p200_p3), 257024  }
   0x9   : > { %900 = vset.pattern.permute.xlu1 (!%p200_p3), %v954_v11  ;;  %902 = vset.pattern.permute.xlu0 (!%p200_p3), %v956_v43  ;;  %298 = vst.msk [vmem:[#allocation3] sm:$0xff] (!%p200_p3), %vm297_vm5, %v951_v0  ;;  %300 = vst.msk [vmem:[#allocation4] sm:$0xff] (!%p200_p3), %vm297_vm5, %v951_v0 }
   0xa   : > { %299 = vst.msk [vmem:[#allocation3 + $0x8] sm:$0xff] (!%p200_p3), %vm297_vm5, %v951_v0  ;;  %301 = vst.msk [vmem:[#allocation4 + $0x8] sm:$0xff] (!%p200_p3), %vm297_vm5, %v951_v0 }
   0xe   : > { %s1105_s12 = smov (!%p250_p4, %s941_s12), 1 }
   0xf   : > { %s1002_s16 = sshll.u32 %s1105_s12, 3  ;;  %v1021_v12 = vld [vmem:[#allocation2] sm:$0xff]  ;;  %v1026_v15 = vld [vmem:[#allocation2 + $0x8] sm:$0xff] }
  0x10   : > { %s267_s19 = scalar_lea.vmem %s1097_s1, %s1002_s16  ;;  %s257_s22 = scalar_lea.vmem %s1096_s0, %s1002_s16 }
  0x11   : > { %v904_v1 = vld [vmem:[%s267_s19] sm:$0xff]   ;;  %s277_s26 = scalar_lea.vmem %s1098_s2, %s1002_s16  ;;  %s287_s30 = scalar_lea.vmem %s1099_s3, %s1002_s16 }
  0x12   : > { %v323_v2 = vsel %vm318_vm1, %v904_v1, 0  ;;  %v905_v3 = vld [vmem:[%s257_s22] sm:$0xff]  }
  0x13   : > { %846 = vmatpush3.bf16.xpose.msra.mxu0 %v323_v2  ;;  %v906_v20 = vld [vmem:[%s277_s26] sm:$0xff]  }
  0x14   : > { %863 = vmatprep.subr.bf16.mxu0 %v951_v0  ;;  %852 = vmatpush3.bf16.msra.mxu1 %v906_v20 }
  0x15   : > { %857 = vmatprep.subr.bf16.mxu1 %v951_v0 }
  0x1a   : > { %848 = vmatmul.mubr.msk.bf16.vlgmr.msra.gmra.mrb[0].mxu0 %vm318_vm1, %v905_v3 }
  0x1b   : > { %865 = vmatprep.mubr.msk.bf16.mxu0 %vm952_vm0, %v951_v0 }
  0xed   : > { %v359_v5 = vpop.f32.mrb[0].mxu0 }
  0xee   : > { %v849_v6 = vpop.f32.mrb[1].mxu0  ;;  %v368_v7 = vsel %vm318_vm1, %v359_v5, -inf }
  0xef   : > { %369 = vmax.xlane.f32.xlu0 %v368_v7  ;;  %v362_v8 = vpop.f32.mrb[2].mxu0 }
  0xf0   : > { %v850_v9 = vpop.f32.mrb[3].mxu0  ;;  %v371_v10 = vsel %vm318_vm1, %v362_v8, -inf }
  0xf3   : > { %372 = vmax.xlane.f32.xlu0 %v371_v10 }
 0x109   : > { %486 = vrot.lane.b32.xlu0 %v904_v1, %s955_s23 }
 0x17c   : > { %v370_v13 = vpop.xlane.xlu0 %369 }
 0x17d   : > { %v1024_v14 = vmax.f32 %v1021_v12, %v370_v13 }
 0x17f   : > { %v376_v16 = vsub.f32 %v1021_v12, %v1024_v14  ;;  %482 = vst.msk [vmem:[#allocation2] sm:$0xff] %vm481_vm3, %v1024_v14  ;;  %384 = vperm.xlu1 %900, %v1024_v14   ;;  %v422_v12 = vld [vmem:[#allocation4] sm:$0xff] }
 0x180   : > { %v373_v17 = vpop.xlane.xlu0 %372 }
 0x181   : > { %v1033_v18 = vmax.f32 %v1026_v15, %v373_v17  ;;  %v378_v55 = vmul.f32 1.442695, %v376_v16  ;;  %v399_v16 = vld [vmem:[#allocation3 + $0x8] sm:$0xff]  ;;  %v423_v17 = vld [vmem:[#allocation4 + $0x8] sm:$0xff] }
 0x183   : > { %v377_v19 = vsub.f32 %v1026_v15, %v1033_v18  ;;  %483 = vst.msk [vmem:[#allocation2 + $0x8] sm:$0xff] %vm481_vm3, %v1033_v18  ;;  %389 = vperm.xlu1 %900, %v1033_v18  }
 0x184   : > { %v487_v27 = vpop.permute.xlu0 %486 }
 0x185   : > { %v492_v30 = vsel %vm318_vm1, %v487_v27, 0  ;;  %v380_v57 = vmul.f32 1.442695, %v377_v19 }
 0x186   : > { %v535_v44 = vld [vmem:[#allocation2] sm:$0xff] }
 0x187   : > { %484 = vrot.lane.b32.xlu1 %v905_v3, %s955_s23 }
 0x188   : > { %901 = vset.pattern.permute.xlu1 %v956_v43 }
 0x18a   : > { %v536_v47 = vld [vmem:[#allocation2 + $0x8] sm:$0xff] }
 0x1fe   : > { %v385_v21 = vpop.permute.xlu1 %384 }
 0x1ff   : > { %v392_v22 = vsub.f32 %v359_v5, %v385_v21 }
 0x201   : > { %v394_v23 = vmul.f32 1.442695, %v392_v22 }
 0x202   : > { %v390_v24 = vpop.permute.xlu1 %389 }
 0x203   : > { %v393_v25 = vsub.f32 %v362_v8, %v390_v24  ;;  %907 = vpow2.f32 %v394_v23 }
 0x205   : > { %v396_v26 = vmul.f32 1.442695, %v393_v25 }
 0x206   : > { %v485_v32 = vpop.permute.xlu1 %484 }
 0x207   : > { %909 = vpow2.f32 %v396_v26 }
 0x20d   : > { %v908_v28 = vpop.eup %907 }
 0x20e   : > { %v412_v52 = vsel %vm318_vm1, %v908_v28, 0.0 }
 0x211   : > { %v910_v29 = vpop.eup %909 }
 0x212   : > { %v426_v31 = vpack.c.bf16 %v910_v29, %v908_v28  ;;  %v415_v50 = vsel %vm318_vm1, %v910_v29, 0.0 }
 0x214   : > { %854 = vmatmul.mubr.msk.bf16.vlgmr.msra.gmra.mrb[0].mxu1 %vm318_vm1, %v426_v31 }
 0x215   : > { %858 = vmatpush3.bf16.xpose.msra.mxu1 %v492_v30  ;;  %859 = vmatprep.mubr.msk.bf16.mxu1 %vm952_vm0, %v951_v0 }
 0x21c   : > { %860 = vmatmul.mubr.msk.bf16.vlgmr.msra.gmra.mrb[4].mxu1 %vm318_vm1, %v485_v32 }
 0x2e7   : > { %v1050_v33 = vpop.f32.mrb[0].mxu1 }
 0x2e8   : > { %v855_v34 = vpop.f32.mrb[1].mxu1 }
 0x2e9   : > { %v1052_v35 = vpop.f32.mrb[2].mxu1 }
 0x2ea   : > { %v856_v36 = vpop.f32.mrb[3].mxu1 }
 0x2ef   : > { %v528_v37 = vpop.f32.mrb[4].mxu1 }
 0x2f0   : > { %v861_v38 = vpop.f32.mrb[5].mxu1  ;;  %v537_v39 = vsel %vm318_vm1, %v528_v37, -inf }
 0x2f1   : > { %538 = vmax.xlane.f32.xlu1 %v537_v39  ;;  %v531_v40 = vpop.f32.mrb[6].mxu1 }
 0x2f2   : > { %v862_v41 = vpop.f32.mrb[7].mxu1  ;;  %v540_v42 = vsel %vm318_vm1, %v531_v40, -inf }
 0x2f3   : > { %541 = vmax.xlane.f32.xlu0 %v540_v42 }
 0x37e   : > { %v539_v45 = vpop.xlane.xlu1 %538 }
 0x37f   : > { %v543_v46 = vmax.f32 %v535_v44, %v539_v45 }
 0x380   : > { %v542_v48 = vpop.xlane.xlu0 %541 }
 0x381   : > { %657 = vst.msk [vmem:[#allocation2] sm:$0xff] %vm656_vm4, %v543_v46  ;;  %v544_v49 = vmax.f32 %v536_v47, %v542_v48  ;;  %553 = vperm.xlu1 %901, %v543_v46   ;;  %v545_v51 = vsub.f32 %v535_v44, %v543_v46 }
 0x383   : > { %658 = vst.msk [vmem:[#allocation2 + $0x8] sm:$0xff] %vm656_vm4, %v544_v49  ;;  %558 = vperm.xlu0 %902, %v544_v49   ;;  %v547_v53 = vmul.f32 1.442695, %v545_v51  ;;  %v546_v54 = vsub.f32 %v536_v47, %v544_v49 }
 0x385   : > { %597 = vrot.lane.b32.xlu1 %v906_v20, %s955_s23  ;;  %911 = vpow2.f32 %v547_v53  ;;  %v549_v56 = vmul.f32 1.442695, %v546_v54 }
 0x386   : > { %903 = vset.pattern.permute.xlu1 %v954_v11  ;;  %913 = vpow2.f32 %v378_v55  ;;  %v398_v11 = vld [vmem:[#allocation3] sm:$0xff] }
 0x387   : > { %915 = vpow2.f32 %v549_v56 }
 0x388   : > { %917 = vpow2.f32 %v380_v57 }
 0x38f   : > { %v912_v58 = vpop.eup %911 }
 0x390   : > { %v914_v59 = vpop.eup %913 }
 0x391   : > { %v916_v60 = vpop.eup %915 }
 0x392   : > { %v918_v61 = vpop.eup %917 }
 0x3a2   : > { %416 = vadd.xlane.f32.xlu0 %v415_v50 }
 0x3a9   : > { %413 = vadd.xlane.f32.xlu1 %v412_v52 }
 0x3b8   : > { %571 = vperm.xlu0 %902, %v912_v58  }
 0x3ba   : > { %402 = vperm.xlu1 %903, %v914_v59  }
 0x3bc   : > { %576 = vperm.xlu0 %902, %v916_v60  }
 0x3be   : > { %407 = vperm.xlu1 %903, %v918_v61  }
 0x400   : > { %v554_v62 = vpop.permute.xlu1 %553 }
 0x401   : > { %v561_v63 = vsub.f32 %v528_v37, %v554_v62 }
 0x402   : > { %v559_v1 = vpop.permute.xlu0 %558 }
 0x403   : > { %v563_v2 = vmul.f32 1.442695, %v561_v63  ;;  %v562_v3 = vsub.f32 %v531_v40, %v559_v1 }
 0x404   : > { %v598_v4 = vpop.permute.xlu1 %597 }
 0x405   : > { %919 = vpow2.f32 %v563_v2  ;;  %v565_v5 = vmul.f32 1.442695, %v562_v3  ;;  %864 = vmatpush3.bf16.msra.mxu0 %v598_v4 }
 0x407   : > { %921 = vpow2.f32 %v565_v5 }
 0x40f   : > { %v920_v6 = vpop.eup %919 }
 0x410   : > { %v581_v0 = vsel %vm318_vm1, %v920_v6, 0.0 }
 0x411   : > { %v922_v7 = vpop.eup %921  ;;  %582 = vadd.xlane.f32.xlu1 %v581_v0 }
 0x412   : > { %v584_v8 = vsel %vm318_vm1, %v922_v7, 0.0  ;;  %v596_v9 = vpack.c.bf16 %v922_v7, %v920_v6 }
 0x413   : > { %585 = vadd.xlane.f32.xlu0 %v584_v8 }
 0x414   : > { %866 = vmatmul.mubr.msk.bf16.vlgmr.msra.gmra.mrb[4].mxu0 %vm318_vm1, %v596_v9 }
 0x42f   : > { %v417_v23 = vpop.xlane.xlu0 %416 }
 0x436   : > { %v414_v10 = vpop.xlane.xlu1 %413 }
 0x437   : > { %v572_v26 = vpop.permute.xlu0 %571 }
 0x43a   : > { %v403_v13 = vpop.permute.xlu1 %402 }
 0x43b   : > { %v410_v14 = vmul.f32 %v403_v13, %v398_v11  ;;  %v424_v15 = vmul.f32 %v422_v12, %v403_v13  ;;  %v577_v28 = vpop.permute.xlu0 %576 }
 0x43d   : > { %v418_v18 = vadd.f32 %v414_v10, %v410_v14  ;;  %v477_v19 = vadd.f32 %v1050_v33, %v424_v15 }
 0x43e   : > { %v408_v20 = vpop.permute.xlu1 %407 }
 0x43f   : > { %420 = vst.msk [vmem:[#allocation3] sm:$0xff] %vm318_vm1, %v418_v18  ;;  %479 = vst.msk [vmem:[#allocation4] sm:$0xff] %vm318_vm1, %v477_v19  ;;  %v411_v21 = vmul.f32 %v408_v20, %v399_v16  ;;  %v425_v22 = vmul.f32 %v423_v17, %v408_v20 }
 0x441   : > { %v419_v24 = vadd.f32 %v417_v23, %v411_v21  ;;  %v478_v25 = vadd.f32 %v1052_v35, %v425_v22 }
 0x443   : > { %421 = vst.msk [vmem:[#allocation3 + $0x8] sm:$0xff] %vm318_vm1, %v419_v24  ;;  %480 = vst.msk [vmem:[#allocation4 + $0x8] sm:$0xff] %vm318_vm1, %v478_v25 }
 0x446   : > { %v567_v27 = vld [vmem:[#allocation3] sm:$0xff]  ;;  %v592_v40 = vld [vmem:[#allocation4] sm:$0xff] }
 0x447   : > { %v579_v30 = vmul.f32 %v572_v26, %v567_v27  ;;  %v594_v44 = vmul.f32 %v592_v40, %v572_v26 }
 0x44a   : > { %v568_v29 = vld [vmem:[#allocation3 + $0x8] sm:$0xff]  ;;  %v593_v42 = vld [vmem:[#allocation4 + $0x8] sm:$0xff] }
 0x44b   : > { %v580_v33 = vmul.f32 %v577_v28, %v568_v29  ;;  %v595_v47 = vmul.f32 %v593_v42, %v577_v28 }
 0x49e   : > { %v583_v31 = vpop.xlane.xlu1 %582 }
 0x49f   : > { %v587_v32 = vadd.f32 %v583_v31, %v579_v30 }
 0x4a0   : > { %v586_v34 = vpop.xlane.xlu0 %585 }
 0x4a1   : > { %590 = vst.msk [vmem:[#allocation3] sm:$0xff] %vm589_vm6, %v587_v32  ;;  %v588_v36 = vadd.f32 %v586_v34, %v580_v33 }
 0x4a3   : > { %591 = vst.msk [vmem:[#allocation3 + $0x8] sm:$0xff] %vm589_vm6, %v588_v36 }
 0x4a8   : > { %v664_v41 = vld [vmem:[#allocation3] sm:$0xff] }
 0x4a9   : > { %923 = vrcp.f32 %v664_v41 }
 0x4aa   : > { %v665_v43 = vld [vmem:[#allocation3 + $0x8] sm:$0xff] }
 0x4ab   : > { %925 = vrcp.f32 %v665_v43 }
 0x4b3   : > { %v924_v50 = vpop.eup %923 }
 0x4b5   : > { %v926_v53 = vpop.eup %925 }
 0x4e7   : > { %v637_v35 = vpop.f32.mrb[4].mxu0 }
 0x4e8   : > { %646 = vrot.lane.b32.xlu1 %v637_v35, %s957_s27  ;;  %v867_v37 = vpop.f32.mrb[5].mxu0 }
 0x4e9   : > { %v640_v38 = vpop.f32.mrb[6].mxu0 }
 0x4ea   : > { %648 = vrot.lane.b32.xlu0 %v640_v38, %s957_s27  ;;  %v868_v39 = vpop.f32.mrb[7].mxu0 }
 0x55a   : > { %v647_v45 = vpop.permute.xlu1 %646 }
 0x55b   : > { %v652_v46 = vadd.f32 %v647_v45, %v594_v44 }
 0x55c   : > { %v649_v48 = vpop.permute.xlu0 %648 }
 0x55d   : > { %654 = vst.msk [vmem:[#allocation4] sm:$0xff] %vm589_vm6, %v652_v46  ;;  %v653_v49 = vadd.f32 %v649_v48, %v595_v47 }
 0x55f   : > { %655 = vst.msk [vmem:[#allocation4 + $0x8] sm:$0xff] %vm589_vm6, %v653_v49 }
 0x564   : > { %v662_v51 = vld [vmem:[#allocation4] sm:$0xff] }
 0x565   : > { %v668_v52 = vmul.f32 %v924_v50, %v662_v51 }
 0x566   : > { %v663_v54 = vld [vmem:[#allocation4 + $0x8] sm:$0xff] }
 0x567   : > { %v835_v55 = vpack.c.bf16 %v668_v52, %v668_v52  ;;  %v669_v56 = vmul.f32 %v926_v53, %v663_v54 }
 0x569   : > { %679 = vst.msk [vmem:[%s287_s30] sm:$0xf] %vm678_vm7, %v835_v55  ;;  %v836_v57 = vpack.c.bf16 %v669_v56, %v669_v56 }
 0x56b   : > { %680 = vst.msk [vmem:[%s287_s30 + $0x4] sm:$0xf] %vm678_vm7, %v836_v57 }
 0x56c PF: > { %s13_s14 = sadd.s32 1, %s949_s14   ;;  %s1100_s12 = smov %s945_s13 }
 0x56d   : > { %p10_p5 = scmp.ge.s32.totalorder %s13_s14, 4   ;;  %s1101_s13 = smov %s1103_s15 }
 0x56f   :  { %12 = sbr.rel (!%p10_p5) target bundleno = 2 (0x2), region = 76 }

// kernel: pipeline_forward.19
= control target key start
LH: loop header
LB: loop body
LE: loop exit
PB: predicated region body
PF: predicated region fallthrough
CT: control target
= control target key end

     0   :  { %s370_s1 = inlined_call_operand.vmem [shape: bf16[128,128], index: 1, kind: input, shape index: {}]   ;;  %s371_s0 = inlined_call_operand.vmem [shape: bf16[32,128], index: 0, kind: input, shape index: {}]   ;;  %s372_s2 = inlined_call_operand.vmem [shape: f32[1,128], index: 2, kind: input, shape index: {}]   ;;  %s373_s3 = inlined_call_operand.vmem [shape: bf16[32,128], index: 3, kind: input, shape index: {}]   ;;  %s374_s4 = inlined_call_operand.vmem [shape: bf16[32,128], index: 4, kind: output, shape index: {}]  }
   0x1   :  { %v290_v0 = vld [vmem:[%s370_s1] sm:$0xff]   ;;  %v291_v1 = vld [vmem:[%s370_s1 + $0x8] sm:$0xff]   ;;  %v292_v2 = vld [vmem:[%s370_s1 + $0x10] sm:$0xff]  }
   0x2   :  { %270 = vmatprep.subr.bf16.mxu0 %v290_v0  ;;  %v293_v3 = vld [vmem:[%s370_s1 + $0x18] sm:$0xff]   ;;  %v298_v4 = vld [vmem:[%s371_s0] sm:$0xff]   ;;  %v295_v6 = vld [vmem:[%s370_s1 + $0x28] sm:$0xff]  }
   0x3   :  { %271 = vmatpush3.bf16.msra.mxu0 %v290_v0  ;;  %286 = vmatprep.mubr.bf16.mxu0 %v298_v4  ;;  %v294_v5 = vld [vmem:[%s370_s1 + $0x20] sm:$0xff]   ;;  %v296_v7 = vld [vmem:[%s370_s1 + $0x30] sm:$0xff]   ;;  %v297_v8 = vld [vmem:[%s370_s1 + $0x38] sm:$0xff]  }
   0x4   :  { %272 = vmatprep.subr.bf16.mxu0 %v291_v1  ;;  %v299_v9 = vld [vmem:[%s371_s0 + $0x8] sm:$0xff]   ;;  %v231_v10 = vld [vmem:[%s372_s2] ss:$0 sm:$0xff] }
   0x5   :  { %v258_v11 = vld [vmem:[%s373_s3 + $0x8] sm:$0xff]   ;;  %v241_v12 = vld [vmem:[%s373_s3] sm:$0xff]  }
   0x6   :  { %v246_v15 = vunpack.c.l.bf16 %v258_v11  ;;  %v247_v17 = vunpack.c.h.bf16 %v258_v11  ;;  %v242_v19 = vunpack.c.l.bf16 %v241_v12  ;;  %v243_v21 = vunpack.c.h.bf16 %v241_v12 }
   0x7   :  { %273 = vmatpush3.bf16.msra.mxu0 %v291_v1 }
   0x8   :  { %274 = vmatprep.subr.bf16.mxu0 %v292_v2 }
   0xb   :  { %275 = vmatpush3.bf16.msra.mxu0 %v292_v2 }
   0xc   :  { %276 = vmatprep.subr.bf16.mxu0 %v293_v3 }
   0xf   :  { %277 = vmatpush3.bf16.msra.mxu0 %v293_v3 }
  0x10   :  { %278 = vmatprep.subr.bf16.mxu0 %v294_v5 }
  0x13   :  { %279 = vmatpush3.bf16.msra.mxu0 %v294_v5 }
  0x14   :  { %280 = vmatprep.subr.bf16.mxu0 %v295_v6 }
  0x17   :  { %281 = vmatpush3.bf16.msra.mxu0 %v295_v6 }
  0x18   :  { %282 = vmatprep.subr.bf16.mxu0 %v296_v7 }
  0x1b   :  { %283 = vmatpush3.bf16.msra.mxu0 %v296_v7 }
  0x1c   :  { %284 = vmatprep.subr.bf16.mxu0 %v297_v8 }
  0x1f   :  { %285 = vmatpush3.bf16.msra.mxu0 %v297_v8 }
  0x22   :  { %287 = vmatmul.mubr.bf16.vlgmr.msra.gmra.mrb[0].mxu0 %v299_v9 }
  0xf5   :  { %v288_v13 = vpop.f32.mrb[0].mxu0 }
  0xf6   :  { %v183_v14 = vadd.f32 %v288_v13, %v231_v10  ;;  %v144_v16 = vpop.f32.mrb[1].mxu0 }
  0xf7   :  { %v181_v18 = vadd.f32 %v231_v10, %v144_v16  ;;  %v289_v20 = vpop.f32.mrb[2].mxu0 }
  0xf8   :  { %v184_v22 = vadd.f32 %v289_v20, %v231_v10  ;;  %v147_v23 = vpop.f32.mrb[3].mxu0  ;;  %v195_v25 = vadd.f32 %v246_v15, %v183_v14 }
  0xf9   :  { %v182_v24 = vadd.f32 %v231_v10, %v147_v23  ;;  %v193_v27 = vadd.f32 %v242_v19, %v181_v18 }
  0xfa   :  { %v196_v26 = vadd.f32 %v247_v17, %v184_v22 }
  0xfb   :  { %v194_v28 = vadd.f32 %v243_v21, %v182_v24 }
  0xfc   :  { %v256_v29 = vpack.c.bf16 %v196_v26, %v195_v25 }
  0xfd   :  { %v251_v30 = vpack.c.bf16 %v194_v28, %v193_v27 }
  0xfe   :  { %259 = vst [vmem:[%s374_s4 + $0x8] sm:$0xff] %v256_v29  }
  0xff   :  { %252 = vst [vmem:[%s374_s4] sm:$0xff] %v251_v30  }

// kernel: pipeline_forward.21
= control target key start
LH: loop header
LB: loop body
LE: loop exit
PB: predicated region body
PF: predicated region fallthrough
CT: control target
= control target key end

     0   :  { %v227_v0 = vmov 0.0   ;;  %vm228_vm0 = vmmov 0   ;;  %s282_s1 = inlined_call_operand.vmem [shape: bf16[128,128], index: 1, kind: input, shape index: {}]   ;;  %s283_s0 = inlined_call_operand.vmem [shape: bf16[16,128], index: 0, kind: input, shape index: {}]   ;;  %s284_s2 = inlined_call_operand.vmem [shape: f32[1,128], index: 2, kind: input, shape index: {}]   ;;  %s285_s3 = inlined_call_operand.vmem [shape: bf16[16,128], index: 3, kind: output, shape index: {}]  }
   0x1   :  { %196 = vmatprep.subr.bf16.mxu0 %v227_v0  ;;  %v218_v1 = vld [vmem:[%s282_s1] sm:$0xff]   ;;  %212 = vmatprep.mubr.msk.bf16.mxu0 %vm228_vm0, %v227_v0  ;;  %v219_v2 = vld [vmem:[%s282_s1 + $0x8] sm:$0xff]   ;;  %v220_v3 = vld [vmem:[%s282_s1 + $0x10] sm:$0xff]  }
   0x2   :  { %197 = vmatpush3.bf16.msra.mxu0 %v218_v1  ;;  %v221_v4 = vld [vmem:[%s282_s1 + $0x18] sm:$0xff]   ;;  %v222_v5 = vld [vmem:[%s282_s1 + $0x20] sm:$0xff]   ;;  %v223_v6 = vld [vmem:[%s282_s1 + $0x28] sm:$0xff]  }
   0x3   :  { %198 = vmatprep.subr.bf16.mxu0 %v227_v0  ;;  %v224_v7 = vld [vmem:[%s282_s1 + $0x30] sm:$0xff]   ;;  %v225_v8 = vld [vmem:[%s282_s1 + $0x38] sm:$0xff]   ;;  %v226_v9 = vld [vmem:[%s283_s0] sm:$0xff]  }
   0x4   :  { %v177_v11 = vld [vmem:[%s284_s2] ss:$0 sm:$0xff] }
   0x6   :  { %199 = vmatpush3.bf16.msra.mxu0 %v219_v2 }
   0x7   :  { %200 = vmatprep.subr.bf16.mxu0 %v227_v0 }
   0xa   :  { %201 = vmatpush3.bf16.msra.mxu0 %v220_v3 }
   0xb   :  { %202 = vmatprep.subr.bf16.mxu0 %v227_v0 }
   0xe   :  { %203 = vmatpush3.bf16.msra.mxu0 %v221_v4 }
   0xf   :  { %204 = vmatprep.subr.bf16.mxu0 %v227_v0 }
  0x12   :  { %205 = vmatpush3.bf16.msra.mxu0 %v222_v5 }
  0x13   :  { %206 = vmatprep.subr.bf16.mxu0 %v227_v0 }
  0x16   :  { %207 = vmatpush3.bf16.msra.mxu0 %v223_v6 }
  0x17   :  { %208 = vmatprep.subr.bf16.mxu0 %v227_v0 }
  0x1a   :  { %209 = vmatpush3.bf16.msra.mxu0 %v224_v7 }
  0x1b   :  { %210 = vmatprep.subr.bf16.mxu0 %v227_v0 }
  0x1e   :  { %211 = vmatpush3.bf16.msra.mxu0 %v225_v8 }
  0x21   :  { %213 = vmatmul.mubr.bf16.vlgmr.msra.gmra.mrb[0].mxu0 %v226_v9 }
  0xf4   :  { %v129_v10 = vpop.f32.mrb[0].mxu0 }
  0xf5   :  { %v214_v12 = vpop.f32.mrb[1].mxu0  ;;  %v152_v14 = vadd.f32 %v177_v11, %v129_v10 }
  0xf6   :  { %v132_v13 = vpop.f32.mrb[2].mxu0 }
  0xf7   :  { %v153_v15 = vadd.f32 %v177_v11, %v132_v13  ;;  %v215_v16 = vpop.f32.mrb[3].mxu0 }
  0xf9   :  { %v185_v17 = vpack.c.bf16 %v153_v15, %v152_v14 }
  0xfb   :  { %186 = vst [vmem:[%s285_s3] sm:$0xff] %v185_v17  }

// kernel: pipeline_forward.22
= control target key start
LH: loop header
LB: loop body
LE: loop exit
PB: predicated region body
PF: predicated region fallthrough
CT: control target
= control target key end

     0   :  { %s952_s12 = smov 0   ;;  %s954_s13 = smov 0   ;;  %s1078_s0 = inlined_call_operand.vmem [shape: bf16[2,16,32], index: 0, kind: input, shape index: {}]   ;;  %s1079_s1 = inlined_call_operand.vmem [shape: bf16[2,8,32], index: 1, kind: input, shape index: {}]   ;;  %s1080_s2 = inlined_call_operand.vmem [shape: bf16[2,8,32], index: 2, kind: input, shape index: {}]   ;;  %s1081_s3 = inlined_call_operand.vmem [shape: bf16[2,16,32], index: 3, kind: output, shape index: {}]  }
   0x1   :  { %s956_s14 = smov 0  }
   0x2 LB: > { %s32_s15 = sadd.s32 1, %s919_s13  ;;  %p789_p0 = scmp.ge.s32.totalorder %s923_s14, 1  ;;  %s923_s14 = sphi %s956_s14, %s13_s14   ;;  %s919_s13 = sphi %s954_s13, %s1083_s13   ;;  %s915_s12 = sphi %s952_s12, %s1082_s12  }
   0x3   : > { %p34_p1 = scmp.ge.s32.totalorder %s32_s15, 2  ;;  %p193_p2 = scmp.lt.s32.totalorder %s923_s14, 3 }
   0x5   : > { %s1085_s15 = smov (%p34_p1, %s32_s15), 0  ;;  %p194_p3 = pnand %p789_p0, %p193_p2 }
   0x6   : > { %p240_p4 = scmp.lt.s32.totalorder (!%p194_p3), %s915_s12, 1  ;;  %v925_v0 = vmov (!%p194_p3), 0.0   ;;  %vm926_vm0 = vmmov (!%p194_p3), 0   ;;  %vm295_vm1 = vcmask (!%p194_p3), 130048   ;;  %vm278_vm2 = vcmask (!%p194_p3), 15360   ;;  %s929_s24 = smov (!%p194_p3), 112  }
   0x7   : > { %197 = sbr.rel (%p194_p3) target bundleno = 1388 (0x56c), region = 32  ;;  %819 = vmatprep.subr.bf16.mxu0 (!%p194_p3), %v925_v0  ;;  %821 = vmatprep.mubr.msk.bf16.mxu0 (!%p194_p3), %vm926_vm0, %v925_v0  ;;  %v927_v4 = vmov (!%p194_p3), -inf   ;;  %vm345_vm3 = vcmask (!%p194_p3), 64512   ;;  %v928_v11 = vmov (!%p194_p3), 0   ;;  %vm457_vm4 = vcmask (!%p194_p3), 7168   ;;  %s931_s28 = smov (!%p194_p3), 16  }
   0x8   : > { %825 = vmatprep.subr.bf16.mxu1 (!%p194_p3), %v925_v0  ;;  %827 = vmatprep.mubr.msk.bf16.mxu1 (!%p194_p3), %vm926_vm0, %v925_v0  ;;  %279 = vst.msk [vmem:[#allocation2] sm:$0xff] (!%p194_p3), %vm278_vm2, %v927_v4  ;;  %280 = vst.msk [vmem:[#allocation2 + $0x8] sm:$0xff] (!%p194_p3), %vm278_vm2, %v927_v4  ;;  %vm408_vm5 = vcmask (!%p194_p3), 1043456   ;;  %v930_v45 = vmov (!%p194_p3), 1   ;;  %vm640_vm6 = vcmask (!%p194_p3), 15368   ;;  %vm281_vm7 = vcmask (!%p194_p3), 261120  }
   0x9   : > { %874 = vset.pattern.permute.xlu1 (!%p194_p3), %v928_v11  ;;  %876 = vset.pattern.permute.xlu0 (!%p194_p3), %v930_v45  ;;  %282 = vst.msk [vmem:[#allocation3] sm:$0xff] (!%p194_p3), %vm281_vm7, %v925_v0  ;;  %284 = vst.msk [vmem:[#allocation4] sm:$0xff] (!%p194_p3), %vm281_vm7, %v925_v0  ;;  %vm568_vm8 = vcmask (!%p194_p3), 261248   ;;  %vm662_vm9 = vcmask (!%p194_p3), 257024  }
   0xa   : > { %283 = vst.msk [vmem:[#allocation3 + $0x8] sm:$0xff] (!%p194_p3), %vm281_vm7, %v925_v0  ;;  %285 = vst.msk [vmem:[#allocation4 + $0x8] sm:$0xff] (!%p194_p3), %vm281_vm7, %v925_v0 }
   0xe   : > { %s1087_s12 = smov (!%p240_p4, %s915_s12), 1 }
   0xf   : > { %s807_s16 = sshll.u32 %s1087_s12, 3  ;;  %s792_s17 = sshll.u32 %s1087_s12, 2  ;;  %v999_v13 = vld [vmem:[#allocation2] sm:$0xff]  ;;  %v1004_v16 = vld [vmem:[#allocation2 + $0x8] sm:$0xff] }
  0x10   : > { %s247_s20 = scalar_lea.vmem %s1078_s0, %s807_s16  ;;  %s255_s23 = scalar_lea.vmem %s1079_s1, %s792_s17 }
  0x11   : > { %v288_v1 = vld [vmem:[%s255_s23] sm:$0xf]  ;;  %s262_s27 = scalar_lea.vmem %s1080_s2, %s792_s17  ;;  %s271_s4 = scalar_lea.vmem %s1081_s3, %s807_s16 }
  0x12   : > { %v300_v2 = vsel %vm295_vm1, %v288_v1, 0  ;;  %v879_v3 = vld [vmem:[%s247_s20] sm:$0xff]   ;;  %v799_v12 = vcombine.low %v288_v1, %v288_v1 }
  0x13   : > { %820 = vmatpush3.bf16.xpose.msra.mxu0 %v300_v2  ;;  %v289_v21 = vld [vmem:[%s262_s27] sm:$0xf] }
  0x14   : > { %837 = vmatprep.subr.bf16.mxu0 %v925_v0  ;;  %v410_v22 = vsel %vm408_vm5, %v289_v21, 0  ;;  %v801_v51 = vcombine.low %v289_v21, %v289_v21  ;;  %v401_v21 = vld [vmem:[#allocation4 + $0x8] sm:$0xff] }
  0x15   : > { %826 = vmatpush3.bf16.msra.mxu1 %v410_v22 }
  0x16   : > { %831 = vmatprep.subr.bf16.mxu1 %v925_v0 }
  0x1a   : > { %822 = vmatmul.mubr.msk.bf16.vlgmr.msra.gmra.mrb[0].mxu0 %vm295_vm1, %v879_v3 }
  0x1b   : > { %839 = vmatprep.mubr.msk.bf16.mxu0 %vm926_vm0, %v925_v0 }
  0xed   : > { %v336_v5 = vpop.f32.mrb[0].mxu0 }
  0xee   : > { %v823_v6 = vpop.f32.mrb[1].mxu0  ;;  %v346_v7 = vsel %vm345_vm3, %v336_v5, -inf }
  0xef   : > { %347 = vmax.xlane.f32.xlu0 %v346_v7  ;;  %v339_v8 = vpop.f32.mrb[2].mxu0 }
  0xf0   : > { %v824_v9 = vpop.f32.mrb[3].mxu0  ;;  %v349_v10 = vsel %vm345_vm3, %v339_v8, -inf }
  0xf3   : > { %350 = vmax.xlane.f32.xlu0 %v349_v10 }
 0x109   : > { %465 = vrot.lane.b32.xlu0 %v799_v12, %s929_s24 }
 0x17c   : > { %v348_v14 = vpop.xlane.xlu0 %347 }
 0x17d   : > { %v1002_v15 = vmax.f32 %v999_v13, %v348_v14 }
 0x17f   : > { %v354_v17 = vsub.f32 %v999_v13, %v1002_v15  ;;  %458 = vst.msk [vmem:[#allocation2] sm:$0xff] %vm457_vm4, %v1002_v15  ;;  %362 = vperm.xlu1 %874, %v1002_v15   ;;  %v376_v15 = vld [vmem:[#allocation3] sm:$0xff] }
 0x180   : > { %v351_v18 = vpop.xlane.xlu0 %350 }
 0x181   : > { %v1011_v19 = vmax.f32 %v1004_v16, %v351_v18  ;;  %v356_v58 = vmul.f32 1.442695, %v354_v17 }
 0x183   : > { %v355_v20 = vsub.f32 %v1004_v16, %v1011_v19  ;;  %459 = vst.msk [vmem:[#allocation2 + $0x8] sm:$0xff] %vm457_vm4, %v1011_v19  ;;  %367 = vperm.xlu1 %874, %v1011_v19   ;;  %v400_v16 = vld [vmem:[#allocation4] sm:$0xff] }
 0x184   : > { %v466_v29 = vpop.permute.xlu0 %465 }
 0x185   : > { %v471_v32 = vsel %vm295_vm1, %v466_v29, 0  ;;  %v358_v60 = vmul.f32 1.442695, %v355_v20  ;;  %v377_v20 = vld [vmem:[#allocation3 + $0x8] sm:$0xff] }
 0x186   : > { %v514_v46 = vld [vmem:[#allocation2] sm:$0xff] }
 0x187   : > { %460 = vrot.lane.b32.xlu1 %v879_v3, %s929_s24 }
 0x188   : > { %875 = vset.pattern.permute.xlu1 %v930_v45 }
 0x18a   : > { %v515_v49 = vld [vmem:[#allocation2 + $0x8] sm:$0xff] }
 0x1fe   : > { %v363_v23 = vpop.permute.xlu1 %362 }
 0x1ff   : > { %v370_v24 = vsub.f32 %v336_v5, %v363_v23 }
 0x201   : > { %v372_v25 = vmul.f32 1.442695, %v370_v24 }
 0x202   : > { %v368_v26 = vpop.permute.xlu1 %367 }
 0x203   : > { %v371_v27 = vsub.f32 %v339_v8, %v368_v26  ;;  %881 = vpow2.f32 %v372_v25 }
 0x205   : > { %v374_v28 = vmul.f32 1.442695, %v371_v27 }
 0x206   : > { %v461_v34 = vpop.permute.xlu1 %460 }
 0x207   : > { %883 = vpow2.f32 %v374_v28 }
 0x20d   : > { %v882_v30 = vpop.eup %881 }
 0x20e   : > { %v390_v55 = vsel %vm345_vm3, %v882_v30, 0.0 }
 0x211   : > { %v884_v31 = vpop.eup %883 }
 0x212   : > { %v404_v33 = vpack.c.bf16 %v884_v31, %v882_v30  ;;  %v393_v53 = vsel %vm345_vm3, %v884_v31, 0.0 }
 0x214   : > { %828 = vmatmul.mubr.msk.bf16.vlgmr.msra.gmra.mrb[0].mxu1 %vm345_vm3, %v404_v33 }
 0x215   : > { %832 = vmatpush3.bf16.xpose.msra.mxu1 %v471_v32  ;;  %833 = vmatprep.mubr.msk.bf16.mxu1 %vm926_vm0, %v925_v0 }
 0x21c   : > { %834 = vmatmul.mubr.msk.bf16.vlgmr.msra.gmra.mrb[4].mxu1 %vm295_vm1, %v461_v34 }
 0x2e7   : > { %v1030_v35 = vpop.f32.mrb[0].mxu1 }
 0x2e8   : > { %v829_v36 = vpop.f32.mrb[1].mxu1 }
 0x2e9   : > { %v1032_v37 = vpop.f32.mrb[2].mxu1 }
 0x2ea   : > { %v830_v38 = vpop.f32.mrb[3].mxu1 }
 0x2ef   : > { %v507_v39 = vpop.f32.mrb[4].mxu1 }
 0x2f0   : > { %v835_v40 = vpop.f32.mrb[5].mxu1  ;;  %v516_v41 = vsel %vm345_vm3, %v507_v39, -inf }
 0x2f1   : > { %517 = vmax.xlane.f32.xlu1 %v516_v41  ;;  %v510_v42 = vpop.f32.mrb[6].mxu1 }
 0x2f2   : > { %v836_v43 = vpop.f32.mrb[7].mxu1  ;;  %v519_v44 = vsel %vm345_vm3, %v510_v42, -inf }
 0x2f3   : > { %520 = vmax.xlane.f32.xlu0 %v519_v44 }
 0x37e   : > { %v518_v47 = vpop.xlane.xlu1 %517 }
 0x37f   : > { %v522_v48 = vmax.f32 %v514_v46, %v518_v47 }
 0x380   : > { %v521_v50 = vpop.xlane.xlu0 %520 }
 0x381   : > { %641 = vst.msk [vmem:[#allocation2] sm:$0xff] %vm640_vm6, %v522_v48  ;;  %v523_v52 = vmax.f32 %v515_v49, %v521_v50  ;;  %532 = vperm.xlu1 %875, %v522_v48   ;;  %v524_v54 = vsub.f32 %v514_v46, %v522_v48 }
 0x383   : > { %642 = vst.msk [vmem:[#allocation2 + $0x8] sm:$0xff] %vm640_vm6, %v523_v52  ;;  %537 = vperm.xlu0 %876, %v523_v52   ;;  %v526_v56 = vmul.f32 1.442695, %v524_v54  ;;  %v525_v57 = vsub.f32 %v515_v49, %v523_v52 }
 0x385   : > { %579 = vrot.lane.b32.xlu1 %v801_v51, %s929_s24  ;;  %885 = vpow2.f32 %v526_v56  ;;  %v528_v59 = vmul.f32 1.442695, %v525_v57 }
 0x386   : > { %877 = vset.pattern.permute.xlu1 %v928_v11  ;;  %887 = vpow2.f32 %v356_v58 }
 0x387   : > { %889 = vpow2.f32 %v528_v59 }
 0x388   : > { %891 = vpow2.f32 %v358_v60 }
 0x38f   : > { %v886_v61 = vpop.eup %885 }
 0x390   : > { %v888_v62 = vpop.eup %887 }
 0x391   : > { %v890_v63 = vpop.eup %889 }
 0x392   : > { %v892_v1 = vpop.eup %891 }
 0x3a2   : > { %394 = vadd.xlane.f32.xlu0 %v393_v53 }
 0x3a9   : > { %391 = vadd.xlane.f32.xlu1 %v390_v55 }
 0x3b8   : > { %550 = vperm.xlu0 %876, %v886_v61  }
 0x3ba   : > { %380 = vperm.xlu1 %877, %v888_v62  }
 0x3bc   : > { %555 = vperm.xlu0 %876, %v890_v63  }
 0x3be   : > { %385 = vperm.xlu1 %877, %v892_v1  }
 0x400   : > { %v533_v2 = vpop.permute.xlu1 %532 }
 0x401   : > { %v540_v3 = vsub.f32 %v507_v39, %v533_v2 }
 0x402   : > { %v538_v4 = vpop.permute.xlu0 %537 }
 0x403   : > { %v542_v5 = vmul.f32 1.442695, %v540_v3  ;;  %v541_v6 = vsub.f32 %v510_v42, %v538_v4 }
 0x404   : > { %v580_v7 = vpop.permute.xlu1 %579 }
 0x405   : > { %893 = vpow2.f32 %v542_v5  ;;  %v544_v8 = vmul.f32 1.442695, %v541_v6  ;;  %v585_v9 = vsel %vm408_vm5, %v580_v7, 0 }
 0x406   : > { %838 = vmatpush3.bf16.msra.mxu0 %v585_v9 }
 0x407   : > { %895 = vpow2.f32 %v544_v8 }
 0x40f   : > { %v894_v0 = vpop.eup %893 }
 0x410   : > { %v560_v10 = vsel %vm345_vm3, %v894_v0, 0.0 }
 0x411   : > { %v896_v11 = vpop.eup %895  ;;  %561 = vadd.xlane.f32.xlu1 %v560_v10 }
 0x412   : > { %v563_v12 = vsel %vm345_vm3, %v896_v11, 0.0  ;;  %v575_v13 = vpack.c.bf16 %v896_v11, %v894_v0 }
 0x413   : > { %564 = vadd.xlane.f32.xlu0 %v563_v12 }
 0x414   : > { %840 = vmatmul.mubr.msk.bf16.vlgmr.msra.gmra.mrb[4].mxu0 %vm345_vm3, %v575_v13 }
 0x42f   : > { %v395_v27 = vpop.xlane.xlu0 %394 }
 0x436   : > { %v392_v14 = vpop.xlane.xlu1 %391 }
 0x437   : > { %v551_v30 = vpop.permute.xlu0 %550 }
 0x43a   : > { %v381_v17 = vpop.permute.xlu1 %380 }
 0x43b   : > { %v388_v18 = vmul.f32 %v381_v17, %v376_v15  ;;  %v402_v19 = vmul.f32 %v400_v16, %v381_v17  ;;  %v556_v32 = vpop.permute.xlu0 %555 }
 0x43d   : > { %v396_v22 = vadd.f32 %v392_v14, %v388_v18  ;;  %v453_v23 = vadd.f32 %v1030_v35, %v402_v19 }
 0x43e   : > { %v386_v24 = vpop.permute.xlu1 %385 }
 0x43f   : > { %398 = vst.msk [vmem:[#allocation3] sm:$0xff] %vm295_vm1, %v396_v22  ;;  %455 = vst.msk [vmem:[#allocation4] sm:$0xff] %vm295_vm1, %v453_v23  ;;  %v389_v25 = vmul.f32 %v386_v24, %v377_v20  ;;  %v403_v26 = vmul.f32 %v401_v21, %v386_v24 }
 0x441   : > { %v397_v28 = vadd.f32 %v395_v27, %v389_v25  ;;  %v454_v29 = vadd.f32 %v1032_v37, %v403_v26 }
 0x443   : > { %399 = vst.msk [vmem:[#allocation3 + $0x8] sm:$0xff] %vm295_vm1, %v397_v28  ;;  %456 = vst.msk [vmem:[#allocation4 + $0x8] sm:$0xff] %vm295_vm1, %v454_v29 }
 0x446   : > { %v546_v31 = vld [vmem:[#allocation3] sm:$0xff]  ;;  %v571_v44 = vld [vmem:[#allocation4] sm:$0xff] }
 0x447   : > { %v558_v34 = vmul.f32 %v551_v30, %v546_v31  ;;  %v573_v48 = vmul.f32 %v571_v44, %v551_v30 }
 0x44a   : > { %v547_v33 = vld [vmem:[#allocation3 + $0x8] sm:$0xff]  ;;  %v572_v46 = vld [vmem:[#allocation4 + $0x8] sm:$0xff] }
 0x44b   : > { %v559_v38 = vmul.f32 %v556_v32, %v547_v33  ;;  %v574_v51 = vmul.f32 %v572_v46, %v556_v32 }
 0x49e   : > { %v562_v35 = vpop.xlane.xlu1 %561 }
 0x49f   : > { %v566_v36 = vadd.f32 %v562_v35, %v558_v34 }
 0x4a0   : > { %v565_v39 = vpop.xlane.xlu0 %564 }
 0x4a1   : > { %569 = vst.msk [vmem:[#allocation3] sm:$0xff] %vm568_vm8, %v566_v36  ;;  %v567_v40 = vadd.f32 %v565_v39, %v559_v38 }
 0x4a3   : > { %570 = vst.msk [vmem:[#allocation3 + $0x8] sm:$0xff] %vm568_vm8, %v567_v40 }
 0x4a8   : > { %v648_v45 = vld [vmem:[#allocation3] sm:$0xff] }
 0x4a9   : > { %897 = vrcp.f32 %v648_v45 }
 0x4aa   : > { %v649_v47 = vld [vmem:[#allocation3 + $0x8] sm:$0xff] }
 0x4ab   : > { %899 = vrcp.f32 %v649_v47 }
 0x4b3   : > { %v898_v54 = vpop.eup %897 }
 0x4b5   : > { %v900_v57 = vpop.eup %899 }
 0x4e7   : > { %v621_v37 = vpop.f32.mrb[4].mxu0 }
 0x4e8   : > { %630 = vrot.lane.b32.xlu1 %v621_v37, %s931_s28  ;;  %v841_v41 = vpop.f32.mrb[5].mxu0 }
 0x4e9   : > { %v624_v42 = vpop.f32.mrb[6].mxu0 }
 0x4ea   : > { %632 = vrot.lane.b32.xlu0 %v624_v42, %s931_s28  ;;  %v842_v43 = vpop.f32.mrb[7].mxu0 }
 0x55a   : > { %v631_v49 = vpop.permute.xlu1 %630 }
 0x55b   : > { %v636_v50 = vadd.f32 %v631_v49, %v573_v48 }
 0x55c   : > { %v633_v52 = vpop.permute.xlu0 %632 }
 0x55d   : > { %638 = vst.msk [vmem:[#allocation4] sm:$0xff] %vm568_vm8, %v636_v50  ;;  %v637_v53 = vadd.f32 %v633_v52, %v574_v51 }
 0x55f   : > { %639 = vst.msk [vmem:[#allocation4 + $0x8] sm:$0xff] %vm568_vm8, %v637_v53 }
 0x564   : > { %v646_v55 = vld [vmem:[#allocation4] sm:$0xff] }
 0x565   : > { %v652_v56 = vmul.f32 %v898_v54, %v646_v55 }
 0x566   : > { %v647_v58 = vld [vmem:[#allocation4 + $0x8] sm:$0xff] }
 0x567   : > { %v809_v59 = vpack.c.bf16 %v652_v56, %v652_v56  ;;  %v653_v60 = vmul.f32 %v900_v57, %v647_v58 }
 0x569   : > { %663 = vst.msk [vmem:[%s271_s4] sm:$0xf] %vm662_vm9, %v809_v59  ;;  %v810_v61 = vpack.c.bf16 %v653_v60, %v653_v60 }
 0x56b   : > { %664 = vst.msk [vmem:[%s271_s4 + $0x4] sm:$0xf] %vm662_vm9, %v810_v61 }
 0x56c PF: > { %s13_s14 = sadd.s32 1, %s923_s14   ;;  %s1082_s12 = smov %s919_s13 }
 0x56d   : > { %p10_p5 = scmp.ge.s32.totalorder %s13_s14, 4   ;;  %s1083_s13 = smov %s1085_s15 }
 0x56f   :  { %12 = sbr.rel (!%p10_p5) target bundleno = 2 (0x2), region = 76 }

// kernel: pipeline_forward.24
= control target key start
LH: loop header
LB: loop body
LE: loop exit
PB: predicated region body
PF: predicated region fallthrough
CT: control target
= control target key end

     0   :  { %s379_s1 = inlined_call_operand.vmem [shape: bf16[128,128], index: 1, kind: input, shape index: {}]   ;;  %s380_s0 = inlined_call_operand.vmem [shape: bf16[32,128], index: 0, kind: input, shape index: {}]   ;;  %s381_s2 = inlined_call_operand.vmem [shape: f32[1,128], index: 2, kind: input, shape index: {}]   ;;  %s382_s3 = inlined_call_operand.vmem [shape: bf16[32,128], index: 3, kind: output, shape index: {}]  }
   0x1   :  { %v302_v0 = vld [vmem:[%s379_s1] sm:$0xff]   ;;  %v303_v1 = vld [vmem:[%s379_s1 + $0x8] sm:$0xff]   ;;  %v304_v2 = vld [vmem:[%s379_s1 + $0x10] sm:$0xff]  }
   0x2   :  { %282 = vmatprep.subr.bf16.mxu0 %v302_v0  ;;  %v305_v3 = vld [vmem:[%s379_s1 + $0x18] sm:$0xff]   ;;  %v310_v4 = vld [vmem:[%s380_s0] sm:$0xff]   ;;  %v307_v6 = vld [vmem:[%s379_s1 + $0x28] sm:$0xff]  }
   0x3   :  { %283 = vmatpush3.bf16.msra.mxu0 %v302_v0  ;;  %298 = vmatprep.mubr.bf16.mxu0 %v310_v4  ;;  %v306_v5 = vld [vmem:[%s379_s1 + $0x20] sm:$0xff]   ;;  %v308_v7 = vld [vmem:[%s379_s1 + $0x30] sm:$0xff]   ;;  %v309_v8 = vld [vmem:[%s379_s1 + $0x38] sm:$0xff]  }
   0x4   :  { %284 = vmatprep.subr.bf16.mxu0 %v303_v1  ;;  %v311_v9 = vld [vmem:[%s380_s0 + $0x8] sm:$0xff]   ;;  %v252_v10 = vld [vmem:[%s381_s2] ss:$0 sm:$0xff] }
   0x7   :  { %285 = vmatpush3.bf16.msra.mxu0 %v303_v1 }
   0x8   :  { %286 = vmatprep.subr.bf16.mxu0 %v304_v2 }
   0xb   :  { %287 = vmatpush3.bf16.msra.mxu0 %v304_v2 }
   0xc   :  { %288 = vmatprep.subr.bf16.mxu0 %v305_v3 }
   0xf   :  { %289 = vmatpush3.bf16.msra.mxu0 %v305_v3 }
  0x10   :  { %290 = vmatprep.subr.bf16.mxu0 %v306_v5 }
  0x13   :  { %291 = vmatpush3.bf16.msra.mxu0 %v306_v5 }
  0x14   :  { %292 = vmatprep.subr.bf16.mxu0 %v307_v6 }
  0x17   :  { %293 = vmatpush3.bf16.msra.mxu0 %v307_v6 }
  0x18   :  { %294 = vmatprep.subr.bf16.mxu0 %v308_v7 }
  0x1b   :  { %295 = vmatpush3.bf16.msra.mxu0 %v308_v7 }
  0x1c   :  { %296 = vmatprep.subr.bf16.mxu0 %v309_v8 }
  0x1f   :  { %297 = vmatpush3.bf16.msra.mxu0 %v309_v8 }
  0x22   :  { %299 = vmatmul.mubr.bf16.vlgmr.msra.gmra.mrb[0].mxu0 %v311_v9 }
  0xf5   :  { %v300_v11 = vpop.f32.mrb[0].mxu0 }
  0xf6   :  { %v180_v12 = vadd.f32 %v300_v11, %v252_v10  ;;  %v141_v13 = vpop.f32.mrb[1].mxu0 }
  0xf7   :  { %v178_v14 = vadd.f32 %v252_v10, %v141_v13  ;;  %v301_v15 = vpop.f32.mrb[2].mxu0 }
  0xf8   :  { %v188_v16 = vmul.f32 0.044715, %v180_v12  ;;  %v181_v17 = vadd.f32 %v301_v15, %v252_v10  ;;  %v144_v18 = vpop.f32.mrb[3].mxu0  ;;  %v184_v45 = vmul.f32 0.5, %v180_v12 }
  0xf9   :  { %v186_v19 = vmul.f32 0.044715, %v178_v14  ;;  %v179_v20 = vadd.f32 %v252_v10, %v144_v18  ;;  %v182_v48 = vmul.f32 0.5, %v178_v14 }
  0xfa   :  { %v192_v21 = vmul.f32 %v188_v16, %v180_v12  ;;  %v189_v22 = vmul.f32 0.044715, %v181_v17  ;;  %v185_v46 = vmul.f32 0.5, %v181_v17 }
  0xfb   :  { %v190_v23 = vmul.f32 %v186_v19, %v178_v14  ;;  %v187_v24 = vmul.f32 0.044715, %v179_v20  ;;  %v183_v49 = vmul.f32 0.5, %v179_v20 }
  0xfc   :  { %v196_v25 = vmul.f32 %v192_v21, %v180_v12  ;;  %v193_v26 = vmul.f32 %v189_v22, %v181_v17 }
  0xfd   :  { %v194_v27 = vmul.f32 %v190_v23, %v178_v14  ;;  %v191_v28 = vmul.f32 %v187_v24, %v179_v20 }
  0xfe   :  { %v200_v29 = vadd.f32 %v196_v25, %v180_v12  ;;  %v197_v30 = vmul.f32 %v193_v26, %v181_v17 }
  0xff   :  { %v198_v31 = vadd.f32 %v194_v27, %v178_v14  ;;  %v195_v32 = vmul.f32 %v191_v28, %v179_v20 }
 0x100   :  { %v204_v33 = vmul.f32 0.7978846, %v200_v29  ;;  %v201_v34 = vadd.f32 %v197_v30, %v181_v17 }
 0x101   :  { %v202_v35 = vmul.f32 0.7978846, %v198_v31  ;;  %v199_v36 = vadd.f32 %v195_v32, %v179_v20 }
 0x102   :  { %312 = vtanh.f32 %v204_v33  ;;  %v205_v37 = vmul.f32 0.7978846, %v201_v34 }
 0x103   :  { %314 = vtanh.f32 %v202_v35  ;;  %v203_v38 = vmul.f32 0.7978846, %v199_v36 }
 0x104   :  { %316 = vtanh.f32 %v205_v37 }
 0x105   :  { %318 = vtanh.f32 %v203_v38 }
 0x10c   :  { %v313_v39 = vpop.eup %312 }
 0x10d   :  { %v315_v40 = vpop.eup %314  ;;  %v212_v41 = vadd.f32 1.0, %v313_v39 }
 0x10e   :  { %v317_v42 = vpop.eup %316  ;;  %v210_v43 = vadd.f32 1.0, %v315_v40 }
 0x10f   :  { %v319_v44 = vpop.eup %318  ;;  %v213_v47 = vadd.f32 1.0, %v317_v42  ;;  %v216_v51 = vmul.f32 %v212_v41, %v184_v45 }
 0x110   :  { %v211_v50 = vadd.f32 1.0, %v319_v44  ;;  %v214_v53 = vmul.f32 %v210_v43, %v182_v48 }
 0x111   :  { %v217_v52 = vmul.f32 %v213_v47, %v185_v46 }
 0x112   :  { %v215_v54 = vmul.f32 %v211_v50, %v183_v49 }
 0x113   :  { %v269_v55 = vpack.c.bf16 %v217_v52, %v216_v51 }
 0x114   :  { %v264_v56 = vpack.c.bf16 %v215_v54, %v214_v53 }
 0x115   :  { %271 = vst [vmem:[%s382_s3 + $0x8] sm:$0xff] %v269_v55  }
 0x116   :  { %265 = vst [vmem:[%s382_s3] sm:$0xff] %v264_v56  }

// kernel: pipeline_forward.26
= control target key start
LH: loop header
LB: loop body
LE: loop exit
PB: predicated region body
PF: predicated region fallthrough
CT: control target
= control target key end

     0   :  { %s306_s1 = inlined_call_operand.vmem [shape: bf16[128,128], index: 1, kind: input, shape index: {}]   ;;  %s307_s0 = inlined_call_operand.vmem [shape: bf16[32,128], index: 0, kind: input, shape index: {}]   ;;  %s308_s2 = inlined_call_operand.vmem [shape: f32[1,128], index: 2, kind: input, shape index: {}]   ;;  %s309_s3 = inlined_call_operand.vmem [shape: f32[32,128], index: 3, kind: output, shape index: {}]  }
   0x1   :  { %v231_v0 = vld [vmem:[%s306_s1] sm:$0xff]   ;;  %v232_v1 = vld [vmem:[%s306_s1 + $0x8] sm:$0xff]   ;;  %v233_v2 = vld [vmem:[%s306_s1 + $0x10] sm:$0xff]  }
   0x2   :  { %211 = vmatprep.subr.bf16.mxu0 %v231_v0  ;;  %v234_v3 = vld [vmem:[%s306_s1 + $0x18] sm:$0xff]   ;;  %v239_v4 = vld [vmem:[%s307_s0] sm:$0xff]   ;;  %v236_v6 = vld [vmem:[%s306_s1 + $0x28] sm:$0xff]  }
   0x3   :  { %212 = vmatpush3.bf16.msra.mxu0 %v231_v0  ;;  %227 = vmatprep.mubr.bf16.mxu0 %v239_v4  ;;  %v235_v5 = vld [vmem:[%s306_s1 + $0x20] sm:$0xff]   ;;  %v237_v7 = vld [vmem:[%s306_s1 + $0x30] sm:$0xff]   ;;  %v238_v8 = vld [vmem:[%s306_s1 + $0x38] sm:$0xff]  }
   0x4   :  { %213 = vmatprep.subr.bf16.mxu0 %v232_v1  ;;  %v240_v9 = vld [vmem:[%s307_s0 + $0x8] sm:$0xff]   ;;  %v200_v10 = vld [vmem:[%s308_s2] ss:$0 sm:$0xff] }
   0x7   :  { %214 = vmatpush3.bf16.msra.mxu0 %v232_v1 }
   0x8   :  { %215 = vmatprep.subr.bf16.mxu0 %v233_v2 }
   0xb   :  { %216 = vmatpush3.bf16.msra.mxu0 %v233_v2 }
   0xc   :  { %217 = vmatprep.subr.bf16.mxu0 %v234_v3 }
   0xf   :  { %218 = vmatpush3.bf16.msra.mxu0 %v234_v3 }
  0x10   :  { %219 = vmatprep.subr.bf16.mxu0 %v235_v5 }
  0x13   :  { %220 = vmatpush3.bf16.msra.mxu0 %v235_v5 }
  0x14   :  { %221 = vmatprep.subr.bf16.mxu0 %v236_v6 }
  0x17   :  { %222 = vmatpush3.bf16.msra.mxu0 %v236_v6 }
  0x18   :  { %223 = vmatprep.subr.bf16.mxu0 %v237_v7 }
  0x1b   :  { %224 = vmatpush3.bf16.msra.mxu0 %v237_v7 }
  0x1c   :  { %225 = vmatprep.subr.bf16.mxu0 %v238_v8 }
  0x1f   :  { %226 = vmatpush3.bf16.msra.mxu0 %v238_v8 }
  0x22   :  { %228 = vmatmul.mubr.bf16.vlgmr.msra.gmra.mrb[0].mxu0 %v240_v9 }
  0xf5   :  { %v229_v11 = vpop.f32.mrb[0].mxu0 }
  0xf6   :  { %v180_v12 = vadd.f32 %v229_v11, %v200_v10  ;;  %v141_v13 = vpop.f32.mrb[1].mxu0 }
  0xf7   :  { %v178_v14 = vadd.f32 %v200_v10, %v141_v13  ;;  %v230_v15 = vpop.f32.mrb[2].mxu0 }
  0xf8   :  { %184 = vst [vmem:[%s309_s3 + $0x10] sm:$0xff] %v180_v12  ;;  %v181_v16 = vadd.f32 %v230_v15, %v200_v10  ;;  %v144_v17 = vpop.f32.mrb[3].mxu0 }
  0xf9   :  { %182 = vst [vmem:[%s309_s3] sm:$0xff] %v178_v14  ;;  %v179_v18 = vadd.f32 %v200_v10, %v144_v17 }
  0xfa   :  { %185 = vst [vmem:[%s309_s3 + $0x18] sm:$0xff] %v181_v16 }
  0xfb   :  { %183 = vst [vmem:[%s309_s3 + $0x8] sm:$0xff] %v179_v18 }

// kernel: pipeline_forward.27
= control target key start
LH: loop header
LB: loop body
LE: loop exit
PB: predicated region body
PF: predicated region fallthrough
CT: control target
= control target key end

     0   :  { %vm35_vm0 = vcmask 523264   ;;  %v277_v6 = vmov 0   ;;  %s413_s0 = inlined_call_operand.vmem [shape: f32[32,64], index: 0, kind: input, shape index: {}]   ;;  %s414_s1 = inlined_call_operand.vmem [shape: s32[32,1], index: 1, kind: input, shape index: {}]   ;;  %s415_s2 = inlined_call_operand.vmem [shape: f32[32,1], index: 2, kind: input, shape index: {}]   ;;  %s416_s3 = inlined_call_operand.hbm [shape: f32[1,1], index: 3, kind: output, shape index: {}]  }
   0x1   :  { %v304_v0 = vld [vmem:[%s413_s0] sm:$0xff]  ;;  %v309_v1 = vld [vmem:[%s413_s0 + $0x8] sm:$0xff]  ;;  %v314_v2 = vld [vmem:[%s413_s0 + $0x10] sm:$0xff]  ;;  %245 = vset.pattern.permute.xlu0 %v277_v6  ;;  %246 = vset.pattern.permute.xlu1 %v277_v6 }
   0x2   :  { %v36_v3 = vsel %vm35_vm0, %v304_v0, -inf  ;;  %v42_v4 = vsel %vm35_vm0, %v314_v2, -inf  ;;  %v323_v5 = vld [vmem:[%s413_s0 + $0x18] sm:$0xff] }
   0x3   :  { %37 = vmax.xlane.f32.xlu0 %v36_v3  ;;  %43 = vmax.xlane.f32.xlu1 %v42_v4 }
   0x4   :  { %8 = vsyncpa [#allocation4], 0  ;;  %v39_v7 = vsel %vm35_vm0, %v309_v1, -inf  ;;  %v45_v8 = vsel %vm35_vm0, %v323_v5, -inf  ;;  %v28_v9 = vld [vmem:[%s414_s1 + $0x8] sm:$0xff]  ;;  %v29_v10 = vld [vmem:[%s414_s1 + $0x10] sm:$0xff]  ;;  %v84_v23 = vlaneseq }
   0x5   :  { %v27_v11 = vld [vmem:[%s414_s1] sm:$0xff]  ;;  %v30_v12 = vld [vmem:[%s414_s1 + $0x18] sm:$0xff]  ;;  %v278_v30 = vmov 0.0   ;;  %v126_v41 = vsel %vm35_vm0, %v304_v0, 0.0  ;;  %v129_v53 = vsel %vm35_vm0, %v309_v1, 0.0  ;;  %v132_v54 = vsel %vm35_vm0, %v314_v2, 0.0 }
   0x6   :  { %v85_v27 = vand.u32 127, %v84_v23  ;;  %v135_v55 = vsel %vm35_vm0, %v323_v5, 0.0  ;;  %v31_v56 = vld [vmem:[%s415_s2] sm:$0xff]  ;;  %v32_v57 = vld [vmem:[%s415_s2 + $0x8] sm:$0xff]  ;;  %vm164_vm5 = vcmask 7168   ;;  %v33_v60 = vld [vmem:[%s415_s2 + $0x10] sm:$0xff] }
   0x7   :  { %40 = vmax.xlane.f32.xlu0 %v39_v7  ;;  %46 = vmax.xlane.f32.xlu1 %v45_v8  ;;  %v185_v58 = vsel %vm164_vm5, %v31_v56, 0.0  ;;  %v186_v59 = vsel %vm164_vm5, %v32_v57, 0.0  ;;  %v188_v62 = vsel %vm164_vm5, %v33_v60, 0.0  ;;  %v34_v63 = vld [vmem:[%s415_s2 + $0x18] sm:$0xff]  ;;  %s279_s8 = smov 1e-30  }
   0x8   :  { %v187_v61 = vadd.f32 %v186_v59, %v185_v58  ;;  %s265_s14 = scalar_lea.hbm %s416_s3, 16 }
   0x9   :  { %p266_p0 = scmp.ne.s32.totalorder %s416_s3, %s265_s14  ;;  %p269_p1 = scmp.lt.u32.totalorder %s265_s14, %s416_s3 }
   0xb   :  { %p271_p2 = pnand %p269_p1, %p266_p0 }
  0x18   :  { %90 = vperm.xlu1 %246, %v28_v9  }
  0x1c   :  { %93 = vperm.xlu1 %246, %v29_v10  }
  0x1d   :  { %87 = vperm.xlu0 %245, %v27_v11  }
  0x20   :  { %96 = vperm.xlu1 %246, %v30_v12  }
  0x90   :  { %v341_v13 = vpop.xlane.xlu0 %37  ;;  %v343_v14 = vpop.xlane.xlu1 %43 }
  0x91   :  { %v48_v15 = vsub.f32 %v304_v0, %v341_v13  ;;  %v50_v16 = vsub.f32 %v314_v2, %v343_v14 }
  0x93   :  { %v52_v17 = vmul.f32 1.442695, %v48_v15  ;;  %v56_v19 = vmul.f32 1.442695, %v50_v16 }
  0x94   :  { %v349_v18 = vpop.xlane.xlu0 %40  ;;  %v351_v20 = vpop.xlane.xlu1 %46 }
  0x95   :  { %247 = vpow2.f32 %v52_v17  ;;  %v49_v21 = vsub.f32 %v309_v1, %v349_v18  ;;  %v51_v22 = vsub.f32 %v323_v5, %v351_v20 }
  0x96   :  { %249 = vpow2.f32 %v56_v19 }
  0x97   :  { %v54_v24 = vmul.f32 1.442695, %v49_v21  ;;  %v58_v26 = vmul.f32 1.442695, %v51_v22 }
  0x98   :  { %v91_v25 = vpop.permute.xlu1 %90 }
  0x99   :  { %251 = vpow2.f32 %v54_v24  ;;  %vm99_vm3 = vcmp.eq.s32.totalorder %v85_v27, %v91_v25 }
  0x9a   :  { %253 = vpow2.f32 %v58_v26  ;;  %v230_v45 = vsel %vm99_vm3, 1.0, %v278_v30 }
  0x9b   :  { %v111_v50 = vmul.f32 %v230_v45, %v309_v1  ;;  %v190_v1 = vsel %vm164_vm5, %v34_v63, 0.0 }
  0x9c   :  { %v88_v28 = vpop.permute.xlu0 %87  ;;  %v94_v29 = vpop.permute.xlu1 %93 }
  0x9d   :  { %vm98_vm1 = vcmp.eq.s32.totalorder %v85_v27, %v88_v28  ;;  %vm100_vm2 = vcmp.eq.s32.totalorder %v85_v27, %v94_v29  ;;  %v117_v52 = vsel %vm35_vm0, %v111_v50, 0.0 }
  0x9e   :  { %v229_v31 = vsel %vm98_vm1, 1.0, %v278_v30  ;;  %v231_v39 = vsel %vm100_vm2, 1.0, %v278_v30 }
  0x9f   :  { %v248_v32 = vpop.eup %247  ;;  %v110_v33 = vmul.f32 %v229_v31, %v304_v0  ;;  %v112_v43 = vmul.f32 %v231_v39, %v314_v2  ;;  %v189_v0 = vadd.f32 %v188_v62, %v187_v61 }
  0xa0   :  { %v60_v34 = vsel %vm35_vm0, %v248_v32, 0.0  ;;  %v97_v35 = vpop.permute.xlu1 %96  ;;  %v250_v36 = vpop.eup %249 }
  0xa1   :  { %61 = vadd.xlane.f32.xlu1 %v60_v34  ;;  %v114_v37 = vsel %vm35_vm0, %v110_v33, 0.0  ;;  %vm101_vm4 = vcmp.eq.s32.totalorder %v85_v27, %v97_v35  ;;  %v66_v42 = vsel %vm35_vm0, %v250_v36, 0.0  ;;  %v120_v47 = vsel %vm35_vm0, %v112_v43, 0.0 }
  0xa2   :  { %v232_v46 = vsel %vm101_vm4, 1.0, %v278_v30  ;;  %v191_v2 = vadd.f32 %v190_v1, %v189_v0 }
  0xa3   :  { %v252_v38 = vpop.eup %251  ;;  %v113_v49 = vmul.f32 %v232_v46, %v323_v5 }
  0xa4   :  { %v63_v40 = vsel %vm35_vm0, %v252_v38, 0.0  ;;  %v254_v44 = vpop.eup %253 }
  0xa5   :  { %64 = vadd.xlane.f32.xlu0 %v63_v40  ;;  %115 = vadd.xlane.f32.xlu1 %v114_v37  ;;  %v69_v48 = vsel %vm35_vm0, %v254_v44, 0.0  ;;  %v123_v51 = vsel %vm35_vm0, %v113_v49, 0.0 }
  0xa9   :  { %127 = vadd.xlane.f32.xlu0 %v126_v41  ;;  %67 = vadd.xlane.f32.xlu1 %v66_v42 }
  0xad   :  { %121 = vadd.xlane.f32.xlu0 %v120_v47  ;;  %70 = vadd.xlane.f32.xlu1 %v69_v48 }
  0xb1   :  { %124 = vadd.xlane.f32.xlu0 %v123_v51  ;;  %118 = vadd.xlane.f32.xlu1 %v117_v52 }
  0xb5   :  { %130 = vadd.xlane.f32.xlu1 %v129_v53 }
  0xb9   :  { %133 = vadd.xlane.f32.xlu1 %v132_v54 }
  0xbd   :  { %136 = vadd.xlane.f32.xlu1 %v135_v55 }
  0xc1   :  { %192 = vadd.xlane.f32.xlu1 %v191_v2 }
 0x12e   :  { %v62_v3 = vpop.xlane.xlu1 %61 }
 0x12f   :  { %255 = vlog2.f32 %v62_v3 }
 0x132   :  { %v116_v4 = vpop.xlane.xlu1 %115  ;;  %v65_v5 = vpop.xlane.xlu0 %64 }
 0x133   :  { %257 = vlog2.f32 %v65_v5  ;;  %v143_v21 = vmul.f32 0.9, %v116_v4 }
 0x136   :  { %v68_v6 = vpop.xlane.xlu1 %67  ;;  %v128_v10 = vpop.xlane.xlu0 %127 }
 0x137   :  { %259 = vlog2.f32 %v68_v6  ;;  %v139_v17 = vmul.f32 0.015625, %v128_v10 }
 0x139   :  { %v256_v7 = vpop.eup %255  ;;  %v151_v28 = vmul.f32 0.1, %v139_v17 }
 0x13a   :  { %v71_v8 = vpop.xlane.xlu1 %70  ;;  %v73_v9 = vmul.f32 0.6931472, %v256_v7  ;;  %v122_v25 = vpop.xlane.xlu0 %121 }
 0x13b   :  { %261 = vlog2.f32 %v71_v8  ;;  %v145_v36 = vmul.f32 0.9, %v122_v25 }
 0x13c   :  { %v80_v16 = vadd.f32 %v73_v9, %v341_v13 }
 0x13d   :  { %v258_v11 = vpop.eup %257 }
 0x13e   :  { %v75_v12 = vmul.f32 0.6931472, %v258_v11  ;;  %v119_v15 = vpop.xlane.xlu1 %118  ;;  %v147_v27 = vsub.f32 %v80_v16, %v143_v21  ;;  %v125_v39 = vpop.xlane.xlu0 %124 }
 0x13f   :  { %v144_v23 = vmul.f32 0.9, %v119_v15  ;;  %v146_v45 = vmul.f32 0.9, %v125_v39 }
 0x140   :  { %v81_v22 = vadd.f32 %v75_v12, %v349_v18  ;;  %v155_v13 = vsub.f32 %v147_v27, %v151_v28 }
 0x141   :  { %v260_v19 = vpop.eup %259 }
 0x142   :  { %v77_v24 = vmul.f32 0.6931472, %v260_v19  ;;  %v131_v26 = vpop.xlane.xlu1 %130  ;;  %v148_v32 = vsub.f32 %v81_v22, %v144_v23  ;;  %v160_v44 = vmul.f32 %v155_v13, %v31_v56 }
 0x143   :  { %v140_v29 = vmul.f32 0.015625, %v131_v26 }
 0x144   :  { %v82_v31 = vadd.f32 %v77_v24, %v343_v14  ;;  %v165_v52 = vsel %vm164_vm5, %v160_v44, 0.0 }
 0x145   :  { %v262_v30 = vpop.eup %261  ;;  %v152_v33 = vmul.f32 0.1, %v140_v29 }
 0x146   :  { %v79_v34 = vmul.f32 0.6931472, %v262_v30  ;;  %v134_v35 = vpop.xlane.xlu1 %133  ;;  %v149_v18 = vsub.f32 %v82_v31, %v145_v36 }
 0x147   :  { %v156_v37 = vsub.f32 %v148_v32, %v152_v33  ;;  %v141_v38 = vmul.f32 0.015625, %v134_v35 }
 0x148   :  { %v83_v40 = vadd.f32 %v79_v34, %v351_v20 }
 0x149   :  { %v161_v41 = vmul.f32 %v156_v37, %v32_v57  ;;  %v153_v42 = vmul.f32 0.1, %v141_v38 }
 0x14a   :  { %v137_v43 = vpop.xlane.xlu1 %136  ;;  %v150_v14 = vsub.f32 %v83_v40, %v146_v45 }
 0x14b   :  { %v157_v46 = vsub.f32 %v149_v18, %v153_v42  ;;  %v142_v47 = vmul.f32 0.015625, %v137_v43  ;;  %v166_v50 = vsel %vm164_vm5, %v161_v41, 0.0 }
 0x14c   :  { %v167_v54 = vadd.f32 %v166_v50, %v165_v52 }
 0x14d   :  { %v162_v48 = vmul.f32 %v157_v46, %v33_v60  ;;  %v154_v49 = vmul.f32 0.1, %v142_v47 }
 0x14e   :  { %v193_v56 = vpop.xlane.xlu1 %192 }
 0x14f   :  { %v158_v51 = vsub.f32 %v150_v14, %v154_v49  ;;  %v168_v53 = vsel %vm164_vm5, %v162_v48, 0.0  ;;  %v194_v59 = vrot.slane %v193_v56, 4 }
 0x150   :  { %v169_v20 = vadd.f32 %v168_v53, %v167_v54 }
 0x151   :  { %v163_v55 = vmul.f32 %v158_v51, %v34_v63  ;;  %v195_v61 = vadd.f32 %v194_v59, %v193_v56 }
 0x153   :  { %v170_v57 = vsel %vm164_vm5, %v163_v55, 0.0  ;;  %v196_v62 = vrot.slane %v195_v61, 2 }
 0x154   :  { %v171_v58 = vadd.f32 %v170_v57, %v169_v20 }
 0x155   :  { %v197_v2 = vadd.f32 %v196_v62, %v195_v61 }
 0x156   :  { %172 = vadd.xlane.f32.xlu0 %v171_v58 }
 0x157   :  { %v198_v5 = vrot.slane %v197_v2, 1 }
 0x159   :  { %v199_v8 = vadd.f32 %v198_v5, %v197_v2 }
 0x1e3   :  { %v173_v60 = vpop.xlane.xlu0 %172 }
 0x1e4   :  { %v174_v0 = vrot.slane %v173_v60, 4 }
 0x1e6   :  { %v175_v1 = vadd.f32 %v174_v0, %v173_v60 }
 0x1e8   :  { %v176_v3 = vrot.slane %v175_v1, 2 }
 0x1ea   :  { %v177_v4 = vadd.f32 %v176_v3, %v175_v1 }
 0x1ec   :  { %v178_v6 = vrot.slane %v177_v4, 1 }
 0x1ee   :  { %v179_v7 = vadd.f32 %v178_v6, %v177_v4 }
 0x1f0   :  { %235 = vpush %v179_v7 }
 0x1f1   :  { %237 = vpush %v199_v8 }
 0x221   :  { %s236_s2 = spop %235 }
 0x222   :  { %s238_s7 = spop %237 }
 0x223   :  { %s209_s9 = smax.f32 %s279_s8, %s238_s7 }
 0x224   :  { %v210_v63 = vstv %s209_s9 }
 0x225   :  { %263 = vrcp.f32 %v210_v63 }
 0x22f   :  { %v264_v9 = vpop.eup %263 }
 0x230   :  { %239 = vpush %v264_v9 }
 0x261   :  { %s240_s10 = spop %239 }
 0x262   :  { %s213_s11 = smul.f32 %s240_s10, %s236_s2 }
 0x264   :  { %215 = sst [smem:[#allocation3]] %s213_s11 }
 0x265   :  { %274 = shalt.err (!%p271_p2)
}
 0x266   :  { %s280_s19 = smov [#allocation3]  }
 0x267   :  { %223 = dma.smem_to_hbm %s280_s19, 16, %s416_s3, [#allocation4]  }
 0x268   :  { %275 = dma.done.wait [#allocation4], 16  }
 0x269   :  { %276 = vsyncadd [#allocation4], 4294967280 }
 0x26a   :  { %227 = sfence }
 0x26b   :  { %228 = vsyncpa [#allocation4], 1 }

</bundles_post_ra>
